<compile_context>
chip_gen: v7x
topology: tpu7x:2x2x1
jax: 0.10.0
libtpu: 0.0.40
codegen_flags: <defaults>
</compile_context>

<pallas_src>
import jax
import jax.numpy as jnp
from jax import lax
from jax.experimental import pallas as pl
from jax.experimental.pallas import tpu as pltpu

_EPS = 1e-5
_LANES = 128


def _round_up(x, m):
    return (x + m - 1) // m * m


# ----------------------------------------------------------------------------
# Fused BasicBlock kernel (one image per grid step)
# ----------------------------------------------------------------------------
def _make_basic_block_kernel(*, Cin, Cpm, Cpo, Ho, Wo, Wg, stride):
    s = stride
    Qh = Ho + 2                      # padded rows per H-phase (halo each side)
    Wq = Wg + 2                      # padded cols (halo each side)
    sCin = s * Cin
    bf16 = jnp.bfloat16

    def _phase(k):
        # tap offset k-1 == s*q + b  with b in [0, s)
        b = (k - 1) % s
        return b, (k - 1 - b) // s

    def kernel(x_ref, w1_ref, s1_ref, b1_ref, w2_ref, s2_ref, b2_ref,
               wres_ref, sres_ref, bres_ref, out_ref, xpad_ref, o1pad_ref):
        # ---- refresh only the zero-halo strips (interiors rewritten below).
        # Cheap, and safe under megacore splitting of the parallel batch axis.
        for p in range(s):
            r0 = p * Qh
            xpad_ref[r0:r0 + 1, :, :] = jnp.zeros((1, Wq, sCin), bf16)
            xpad_ref[r0 + Qh - 1:r0 + Qh, :, :] = jnp.zeros((1, Wq, sCin), bf16)
        xpad_ref[:, 0:1, :] = jnp.zeros((s * Qh, 1, sCin), bf16)
        xpad_ref[:, Wq - 1:Wq, :] = jnp.zeros((s * Qh, 1, sCin), bf16)
        o1pad_ref[0:1, :, :] = jnp.zeros((1, Wo + 2, Cpm), bf16)
        o1pad_ref[Ho + 1:Ho + 2, :, :] = jnp.zeros((1, Wo + 2, Cpm), bf16)
        o1pad_ref[:, 0:1, :] = jnp.zeros((Ho + 2, 1, Cpm), bf16)
        o1pad_ref[:, Wo + 1:Wo + 2, :] = jnp.zeros((Ho + 2, 1, Cpm), bf16)

        # ---- stage x (already bf16 + W-space-to-depth) split by H phase ----
        if s == 1:
            xpad_ref[1:Ho + 1, 1:Wg + 1, :] = x_ref[0]
        else:
            xr = x_ref[0].reshape(Ho, s, Wg, sCin)     # split leading dim only
            for p in range(s):
                r0 = p * Qh
                xpad_ref[r0 + 1:r0 + 1 + Ho, 1:Wg + 1, :] = xr[:, p]
        xp = xpad_ref[...]                             # (s*Qh, Wq, s*Cin) bf16

        def tap(kh, kw):
            """(Ho*Wo, Cin) input patch for tap (kh, kw); unit-stride slices
            only, thanks to the per-phase (H & W space-to-depth) layout."""
            bh, qh = _phase(kh)
            bw, qw = _phase(kw)
            r0 = bh * Qh + 1 + qh
            p = xp[r0:r0 + Ho, 1 + qw:1 + qw + Wo, bw * Cin:(bw + 1) * Cin]
            return p.reshape(Ho * Wo, Cin)

        # ---- conv1 (3x3, stride s) + bn1 + relu ----------------------------
        acc1 = jnp.zeros((Ho * Wo, Cpm), jnp.float32)
        for kh in range(3):
            for kw in range(3):
                acc1 = acc1 + jnp.dot(tap(kh, kw), w1_ref[kh, kw],
                                      preferred_element_type=jnp.float32)
        out1 = jnp.maximum(acc1 * s1_ref[...] + b1_ref[...], 0.0)
        o1pad_ref[1:Ho + 1, 1:Wo + 1, :] = (
            out1.reshape(Ho, Wo, Cpm).astype(bf16))

        # ---- conv2 (3x3, stride 1) + bn2 (stays on-chip) --------------------
        acc2 = jnp.zeros((Ho * Wo, Cpo), jnp.float32)
        for kh in range(3):
            for kw in range(3):
                p2 = o1pad_ref[kh:kh + Ho, kw:kw + Wo, :].reshape(Ho * Wo, Cpm)
                acc2 = acc2 + jnp.dot(p2, w2_ref[kh, kw],
                                      preferred_element_type=jnp.float32)
        y = acc2 * s2_ref[...] + b2_ref[...]

        # ---- residual: strided center tap through wres (1x1 conv / eye) ----
        res = jnp.dot(tap(1, 1), wres_ref[...],
                      preferred_element_type=jnp.float32)
        y = y + (res * sres_ref[...] + bres_ref[...])

        # Lane-dense (Cpo = multiple of 128) unmasked store.
        out_ref[0] = jnp.maximum(y, 0.0).reshape(Ho, Wo, Cpo).astype(out_ref.dtype)

    return kernel


# ----------------------------------------------------------------------------
# Wrapper: layout plumbing, BN folding, channel padding, pallas_call
# ----------------------------------------------------------------------------
def _fold_bn(bn, n_pad):
    gamma, beta, mean, var = bn
    scale = gamma / jnp.sqrt(var + _EPS)
    bias = beta - mean * scale
    scale = scale.reshape(1, -1).astype(jnp.float32)
    bias = bias.reshape(1, -1).astype(jnp.float32)
    pad = ((0, 0), (0, n_pad - scale.shape[1]))
    return jnp.pad(scale, pad), jnp.pad(bias, pad)


def basic_block_forward(x_nchw, params, stride):
    s = stride
    x = jnp.transpose(x_nchw, (0, 2, 3, 1)).astype(jnp.bfloat16)   # NCHW->NHWC
    B, H, W, Cin = x.shape
    Cmid = params["w1"].shape[-1]
    Cout = params["w2"].shape[-1]
    Ho = (H - 1) // s + 1
    Wo = (W - 1) // s + 1
    Wg = Wo                                   # ceil(W/s)
    Hp = s * Ho
    Cpm = _round_up(Cmid, _LANES)             # lane-dense mid channels
    Cpo = _round_up(Cout, _LANES)             # lane-dense out channels

    # Zero-pad H, W up to multiples of the stride (those zeros ARE the conv
    # halo), then W space-to-depth: a pure row-major reshape, no extra HBM pass.
    x = jnp.pad(x, ((0, 0), (0, Hp - H), (0, s * Wg - W), (0, 0)))
    x_s2d = x.reshape(B, Hp, Wg, s * Cin)

    s1, b1 = _fold_bn(params["bn1"], Cpm)
    s2, b2 = _fold_bn(params["bn2"], Cpo)
    w1 = jnp.pad(params["w1"],
                 ((0, 0), (0, 0), (0, 0), (0, Cpm - Cmid))).astype(jnp.bfloat16)
    w2 = jnp.pad(params["w2"],
                 ((0, 0), (0, 0), (0, Cpm - Cmid), (0, Cpo - Cout))
                 ).astype(jnp.bfloat16)

    if "wds" in params:
        wres = params["wds"]                              # (Cin, Cout)
        sres, bres = _fold_bn(params["bnds"], Cpo)
    else:
        wres = jnp.eye(Cin, dtype=jnp.float32)            # exact in bf16
        sres = jnp.pad(jnp.ones((1, Cout), jnp.float32),
                       ((0, 0), (0, Cpo - Cout)))
        bres = jnp.zeros((1, Cpo), jnp.float32)
    wres = jnp.pad(wres, ((0, 0), (0, Cpo - wres.shape[-1]))).astype(jnp.bfloat16)

    kernel = _make_basic_block_kernel(Cin=Cin, Cpm=Cpm, Cpo=Cpo,
                                      Ho=Ho, Wo=Wo, Wg=Wg, stride=s)

    out = pl.pallas_call(
        kernel,
        out_shape=jax.ShapeDtypeStruct((B, Ho, Wo, Cpo), jnp.float32),
        grid_spec=pltpu.PrefetchScalarGridSpec(
            num_scalar_prefetch=0,
            grid=(B,),
            in_specs=[
                pl.BlockSpec((1, Hp, Wg, s * Cin), lambda b: (b, 0, 0, 0)),
                pl.BlockSpec((3, 3, Cin, Cpm), lambda b: (0, 0, 0, 0)),
                pl.BlockSpec((1, Cpm), lambda b: (0, 0)),
                pl.BlockSpec((1, Cpm), lambda b: (0, 0)),
                pl.BlockSpec((3, 3, Cpm, Cpo), lambda b: (0, 0, 0, 0)),
                pl.BlockSpec((1, Cpo), lambda b: (0, 0)),
                pl.BlockSpec((1, Cpo), lambda b: (0, 0)),
                pl.BlockSpec((Cin, Cpo), lambda b: (0, 0)),
                pl.BlockSpec((1, Cpo), lambda b: (0, 0)),
                pl.BlockSpec((1, Cpo), lambda b: (0, 0)),
            ],
            out_specs=pl.BlockSpec((1, Ho, Wo, Cpo), lambda b: (b, 0, 0, 0)),
            scratch_shapes=[
                # H-phase-stacked, zero-halo, W-s2d input staging (bf16).
                pltpu.VMEM((s * (Ho + 2), Wg + 2, s * Cin), jnp.bfloat16),
                # zero-halo conv1 output staging (bf16, lane-dense channels).
                pltpu.VMEM((Ho + 2, Wo + 2, Cpm), jnp.bfloat16),
            ]),
        compiler_params=pltpu.CompilerParams(
            dimension_semantics=("parallel",)),   # batch items independent
    )(x_s2d, w1, s1, b1, w2, s2, b2, wres, sres, bres)

    out = out[..., :Cout]                                 # drop lane padding
    return jnp.transpose(out, (0, 3, 1, 2))               # NHWC -> NCHW


# ----------------------------------------------------------------------------
# Deterministic parameter init + pure-JAX reference
# ----------------------------------------------------------------------------
def init_params(key, in_planes, planes, stride):
    keys = jax.random.split(key, 6)

    def bn_params(k):
        k1, k2, k3, k4 = jax.random.split(k, 4)
        gamma = 1.0 + 0.1 * jax.random.normal(k1, (planes,))
        beta = 0.1 * jax.random.normal(k2, (planes,))
        mean = 0.1 * jax.random.normal(k3, (planes,))
        var = 1.0 + 0.1 * jax.random.uniform(k4, (planes,))
        return (gamma, beta, mean, var)

    params = {
        "w1": 0.2 * jax.random.normal(keys[0], (3, 3, in_planes, planes)),
        "bn1": bn_params(keys[1]),
        "w2": 0.2 * jax.random.normal(keys[2], (3, 3, planes, planes)),
        "bn2": bn_params(keys[3]),
    }
    if stride != 1 or in_planes != planes:
        params["wds"] = 0.2 * jax.random.normal(keys[4], (in_planes, planes))
        params["bnds"] = bn_params(keys[5])
    return params


def reference_forward(x_nchw, params, stride, matmul_dtype=jnp.float32):
    """Pure-JAX reference.  matmul_dtype=bfloat16 mirrors the kernel's MXU
    precision policy (bf16 operands incl. the residual input, f32 accumulation,
    f32 BN/ReLU epilogue)."""
    x = jnp.transpose(x_nchw, (0, 2, 3, 1)).astype(jnp.float32)
    dn = ("NHWC", "HWIO", "NHWC")
    md = matmul_dtype

    def conv(v, w, strides, pad):
        return lax.conv_general_dilated(v.astype(md), w.astype(md), strides, pad,
                                        dimension_numbers=dn,
                                        preferred_element_type=jnp.float32)

    def bn_apply(y, bn):
        gamma, beta, mean, var = bn
        return (y - mean) / jnp.sqrt(var + _EPS) * gamma + beta

    y = conv(x, params["w1"], (stride, stride), ((1, 1), (1, 1)))
    y = jnp.maximum(bn_apply(y, params["bn1"]), 0.0)
    y2 = conv(y, params["w2"], (1, 1), ((1, 1), (1, 1)))
    y2 = bn_apply(y2, params["bn2"])
    if "wds" in params:
        res = conv(x, params["wds"][None, None], (stride, stride),
                   ((0, 0), (0, 0)))
        res = bn_apply(res, params["bnds"])
    else:
        res = x.astype(md).astype(jnp.float32)     # kernel quantizes x to bf16
    out = jnp.maximum(y2 + res, 0.0)
    return jnp.transpose(out, (0, 3, 1, 2))


# ----------------------------------------------------------------------------
if __name__ == "__main__":
    key = jax.random.PRNGKey(0)
    kx, kp1, kp2 = jax.random.split(key, 3)

    # (B, in_planes, planes, H, W, stride): strided block w/ 1x1 downsample,
    # and a stride-1 identity-residual block.
    configs = [(2, 4, 8, 16, 16, 2),
               (2, 8, 8, 16, 16, 1)]
    pkeys = [kp1, kp2]

    for (B, in_planes, planes, H, W, stride), kp in zip(configs, pkeys):
        x = jax.random.normal(kx, (B, in_planes, H, W), dtype=jnp.float32)
        params = init_params(kp, in_planes, planes, stride)

        out = jax.block_until_ready(basic_block_forward(x, params, stride))

        ref_policy = reference_forward(x, params, stride,
                                       matmul_dtype=jnp.bfloat16)
        ref_f32 = reference_forward(x, params, stride,
                                    matmul_dtype=jnp.float32)
        assert out.shape == ref_f32.shape, (out.shape, ref_f32.shape)
        err_p = float(jnp.max(jnp.abs(out - ref_policy)))
        err_f = float(jnp.max(jnp.abs(out - ref_f32)))
        # Exact-policy check (bf16 MXU operands, f32 accumulation).
        assert err_p < 2e-2, f"bf16-policy max abs err {err_p}"
        # Sanity check vs full-f32 reference (bounds bf16 quantization only).
        assert err_f < 2.5e-1, f"f32-reference max abs err {err_f}"

    print("KERNEL_OK")
</pallas_src>

<mosaic_0001>
module attributes {stable_mosaic.version = 11 : i64} {
  func.func @kernel(%arg0: i32, %arg1: memref<1x16x8x8xbf16, #tpu.memory_space<vmem>>, %arg2: memref<3x3x4x128xbf16, #tpu.memory_space<vmem>>, %arg3: memref<1x128xf32, #tpu.memory_space<vmem>>, %arg4: memref<1x128xf32, #tpu.memory_space<vmem>>, %arg5: memref<3x3x128x128xbf16, #tpu.memory_space<vmem>>, %arg6: memref<1x128xf32, #tpu.memory_space<vmem>>, %arg7: memref<1x128xf32, #tpu.memory_space<vmem>>, %arg8: memref<4x128xbf16, #tpu.memory_space<vmem>>, %arg9: memref<1x128xf32, #tpu.memory_space<vmem>>, %arg10: memref<1x128xf32, #tpu.memory_space<vmem>>, %arg11: memref<1x8x8x128xf32, #tpu.memory_space<vmem>>, %arg12: memref<20x10x8xbf16, #tpu.memory_space<vmem>>, %arg13: memref<10x10x128xbf16, #tpu.memory_space<vmem>>) attributes {dimension_semantics = [#tpu.dimension_semantics<parallel>], iteration_bounds = array<i64: 2>, scalar_prefetch = 0 : i64, scratch_operands = 2 : i64, tpu.core_type = #tpu.core_type<tc>, window_params = [{transform_indices = @transform_0, window_bounds = array<i64: 1, 16, 8, 8>}, {pipeline_mode = #tpu.pipeline_mode<synchronous>, transform_indices = @transform_1, window_bounds = array<i64: 3, 3, 4, 128>}, {pipeline_mode = #tpu.pipeline_mode<synchronous>, transform_indices = @transform_2, window_bounds = array<i64: 1, 128>}, {pipeline_mode = #tpu.pipeline_mode<synchronous>, transform_indices = @transform_3, window_bounds = array<i64: 1, 128>}, {pipeline_mode = #tpu.pipeline_mode<synchronous>, transform_indices = @transform_4, window_bounds = array<i64: 3, 3, 128, 128>}, {pipeline_mode = #tpu.pipeline_mode<synchronous>, transform_indices = @transform_5, window_bounds = array<i64: 1, 128>}, {pipeline_mode = #tpu.pipeline_mode<synchronous>, transform_indices = @transform_6, window_bounds = array<i64: 1, 128>}, {pipeline_mode = #tpu.pipeline_mode<synchronous>, transform_indices = @transform_7, window_bounds = array<i64: 4, 128>}, {pipeline_mode = #tpu.pipeline_mode<synchronous>, transform_indices = @transform_8, window_bounds = array<i64: 1, 128>}, {pipeline_mode = #tpu.pipeline_mode<synchronous>, transform_indices = @transform_9, window_bounds = array<i64: 1, 128>}, {transform_indices = @transform_10, window_bounds = array<i64: 1, 8, 8, 128>}]} {
    %cst = arith.constant 0.000000e+00 : bf16
    %0 = vector.broadcast %cst : bf16 to vector<1x10x8xbf16>
    %c0 = arith.constant 0 : index
    %c0_0 = arith.constant 0 : index
    %c0_1 = arith.constant 0 : index
    %1 = vector.load %arg12[%c0, %c0_0, %c0_1] : memref<20x10x8xbf16, #tpu.memory_space<vmem>>, vector<1x10x8xbf16>
    tpu.vector_store %arg12[%c0, %c0_0, %c0_1], %0 {strides = array<i32>} : memref<20x10x8xbf16, #tpu.memory_space<vmem>>, vector<1x10x8xbf16>,
    %cst_2 = arith.constant 0.000000e+00 : bf16
    %2 = vector.broadcast %cst_2 : bf16 to vector<1x10x8xbf16>
    %c9 = arith.constant 9 : index
    %c0_3 = arith.constant 0 : index
    %c0_4 = arith.constant 0 : index
    %3 = vector.load %arg12[%c9, %c0_3, %c0_4] : memref<20x10x8xbf16, #tpu.memory_space<vmem>>, vector<1x10x8xbf16>
    tpu.vector_store %arg12[%c9, %c0_3, %c0_4], %2 {strides = array<i32>} : memref<20x10x8xbf16, #tpu.memory_space<vmem>>, vector<1x10x8xbf16>,
    %cst_5 = arith.constant 0.000000e+00 : bf16
    %4 = vector.broadcast %cst_5 : bf16 to vector<1x10x8xbf16>
    %c10 = arith.constant 10 : index
    %c0_6 = arith.constant 0 : index
    %c0_7 = arith.constant 0 : index
    %5 = vector.load %arg12[%c10, %c0_6, %c0_7] : memref<20x10x8xbf16, #tpu.memory_space<vmem>>, vector<1x10x8xbf16>
    tpu.vector_store %arg12[%c10, %c0_6, %c0_7], %4 {strides = array<i32>} : memref<20x10x8xbf16, #tpu.memory_space<vmem>>, vector<1x10x8xbf16>,
    %cst_8 = arith.constant 0.000000e+00 : bf16
    %6 = vector.broadcast %cst_8 : bf16 to vector<1x10x8xbf16>
    %c19 = arith.constant 19 : index
    %c0_9 = arith.constant 0 : index
    %c0_10 = arith.constant 0 : index
    %7 = vector.load %arg12[%c19, %c0_9, %c0_10] : memref<20x10x8xbf16, #tpu.memory_space<vmem>>, vector<1x10x8xbf16>
    tpu.vector_store %arg12[%c19, %c0_9, %c0_10], %6 {strides = array<i32>} : memref<20x10x8xbf16, #tpu.memory_space<vmem>>, vector<1x10x8xbf16>,
    %cst_11 = arith.constant 0.000000e+00 : bf16
    %8 = vector.broadcast %cst_11 : bf16 to vector<20x1x8xbf16>
    %c0_12 = arith.constant 0 : index
    %c0_13 = arith.constant 0 : index
    %c0_14 = arith.constant 0 : index
    %9 = vector.load %arg12[%c0_12, %c0_13, %c0_14] : memref<20x10x8xbf16, #tpu.memory_space<vmem>>, vector<20x1x8xbf16>
    tpu.vector_store %arg12[%c0_12, %c0_13, %c0_14], %8 {strides = array<i32>} : memref<20x10x8xbf16, #tpu.memory_space<vmem>>, vector<20x1x8xbf16>,
    %cst_15 = arith.constant 0.000000e+00 : bf16
    %10 = vector.broadcast %cst_15 : bf16 to vector<20x1x8xbf16>
    %c0_16 = arith.constant 0 : index
    %c9_17 = arith.constant 9 : index
    %c0_18 = arith.constant 0 : index
    %11 = vector.load %arg12[%c0_16, %c9_17, %c0_18] : memref<20x10x8xbf16, #tpu.memory_space<vmem>>, vector<20x1x8xbf16>
    tpu.vector_store %arg12[%c0_16, %c9_17, %c0_18], %10 {strides = array<i32>} : memref<20x10x8xbf16, #tpu.memory_space<vmem>>, vector<20x1x8xbf16>,
    %cst_19 = arith.constant 0.000000e+00 : bf16
    %12 = vector.broadcast %cst_19 : bf16 to vector<1x10x128xbf16>
    %c0_20 = arith.constant 0 : index
    %c0_21 = arith.constant 0 : index
    %c0_22 = arith.constant 0 : index
    %13 = vector.load %arg13[%c0_20, %c0_21, %c0_22] : memref<10x10x128xbf16, #tpu.memory_space<vmem>>, vector<1x10x128xbf16>
    tpu.vector_store %arg13[%c0_20, %c0_21, %c0_22], %12 {strides = array<i32>} : memref<10x10x128xbf16, #tpu.memory_space<vmem>>, vector<1x10x128xbf16>,
    %cst_23 = arith.constant 0.000000e+00 : bf16
    %14 = vector.broadcast %cst_23 : bf16 to vector<1x10x128xbf16>
    %c9_24 = arith.constant 9 : index
    %c0_25 = arith.constant 0 : index
    %c0_26 = arith.constant 0 : index
    %15 = vector.load %arg13[%c9_24, %c0_25, %c0_26] : memref<10x10x128xbf16, #tpu.memory_space<vmem>>, vector<1x10x128xbf16>
    tpu.vector_store %arg13[%c9_24, %c0_25, %c0_26], %14 {strides = array<i32>} : memref<10x10x128xbf16, #tpu.memory_space<vmem>>, vector<1x10x128xbf16>,
    %cst_27 = arith.constant 0.000000e+00 : bf16
    %16 = vector.broadcast %cst_27 : bf16 to vector<10x1x128xbf16>
    %c0_28 = arith.constant 0 : index
    %c0_29 = arith.constant 0 : index
    %c0_30 = arith.constant 0 : index
    %17 = vector.load %arg13[%c0_28, %c0_29, %c0_30] : memref<10x10x128xbf16, #tpu.memory_space<vmem>>, vector<10x1x128xbf16>
    tpu.vector_store %arg13[%c0_28, %c0_29, %c0_30], %16 {strides = array<i32>} : memref<10x10x128xbf16, #tpu.memory_space<vmem>>, vector<10x1x128xbf16>,
    %cst_31 = arith.constant 0.000000e+00 : bf16
    %18 = vector.broadcast %cst_31 : bf16 to vector<10x1x128xbf16>
    %c0_32 = arith.constant 0 : index
    %c9_33 = arith.constant 9 : index
    %c0_34 = arith.constant 0 : index
    %19 = vector.load %arg13[%c0_32, %c9_33, %c0_34] : memref<10x10x128xbf16, #tpu.memory_space<vmem>>, vector<10x1x128xbf16>
    tpu.vector_store %arg13[%c0_32, %c9_33, %c0_34], %18 {strides = array<i32>} : memref<10x10x128xbf16, #tpu.memory_space<vmem>>, vector<10x1x128xbf16>,
    %c0_35 = arith.constant 0 : index
    %c0_36 = arith.constant 0 : index
    %c0_37 = arith.constant 0 : index
    %c0_38 = arith.constant 0 : index
    %20 = vector.load %arg1[%c0_35, %c0_36, %c0_37, %c0_38] : memref<1x16x8x8xbf16, #tpu.memory_space<vmem>>, vector<1x16x8x8xbf16>
    %21 = vector.shape_cast %20 : vector<1x16x8x8xbf16> to vector<16x8x8xbf16>
    %22 = vector.shape_cast %21 : vector<16x8x8xbf16> to vector<8x2x8x8xbf16>
    %23 = vector.extract_strided_slice %22 {offsets = [0, 0, 0, 0], sizes = [8, 1, 8, 8], strides = [1, 1, 1, 1]} : vector<8x2x8x8xbf16> to vector<8x1x8x8xbf16>
    %24 = vector.shape_cast %23 : vector<8x1x8x8xbf16> to vector<8x8x8xbf16>
    %c1 = arith.constant 1 : index
    %c1_39 = arith.constant 1 : index
    %c0_40 = arith.constant 0 : index
    %25 = vector.load %arg12[%c1, %c1_39, %c0_40] : memref<20x10x8xbf16, #tpu.memory_space<vmem>>, vector<8x8x8xbf16>
    tpu.vector_store %arg12[%c1, %c1_39, %c0_40], %24 {strides = array<i32>} : memref<20x10x8xbf16, #tpu.memory_space<vmem>>, vector<8x8x8xbf16>,
    %26 = vector.extract_strided_slice %22 {offsets = [0, 1, 0, 0], sizes = [8, 1, 8, 8], strides = [1, 1, 1, 1]} : vector<8x2x8x8xbf16> to vector<8x1x8x8xbf16>
    %27 = vector.shape_cast %26 : vector<8x1x8x8xbf16> to vector<8x8x8xbf16>
    %c11 = arith.constant 11 : index
    %c1_41 = arith.constant 1 : index
    %c0_42 = arith.constant 0 : index
    %28 = vector.load %arg12[%c11, %c1_41, %c0_42] : memref<20x10x8xbf16, #tpu.memory_space<vmem>>, vector<8x8x8xbf16>
    tpu.vector_store %arg12[%c11, %c1_41, %c0_42], %27 {strides = array<i32>} : memref<20x10x8xbf16, #tpu.memory_space<vmem>>, vector<8x8x8xbf16>,
    %c0_43 = arith.constant 0 : index
    %c0_44 = arith.constant 0 : index
    %c0_45 = arith.constant 0 : index
    %29 = vector.load %arg12[%c0_43, %c0_44, %c0_45] : memref<20x10x8xbf16, #tpu.memory_space<vmem>>, vector<20x10x8xbf16>
    %cst_46 = arith.constant 0.000000e+00 : f32
    %30 = vector.broadcast %cst_46 : f32 to vector<64x128xf32>
    %31 = vector.extract_strided_slice %29 {offsets = [10, 0, 4], sizes = [8, 8, 4], strides = [1, 1, 1]} : vector<20x10x8xbf16> to vector<8x8x4xbf16>
    %32 = vector.shape_cast %31 : vector<8x8x4xbf16> to vector<64x4xbf16>
    %c0_47 = arith.constant 0 : index
    %c0_48 = arith.constant 0 : index
    %c0_49 = arith.constant 0 : index
    %c0_50 = arith.constant 0 : index
    %33 = vector.load %arg2[%c0_47, %c0_48, %c0_49, %c0_50] : memref<3x3x4x128xbf16, #tpu.memory_space<vmem>>, vector<1x1x4x128xbf16>
    %34 = vector.shape_cast %33 : vector<1x1x4x128xbf16> to vector<4x128xbf16>
    %cst_51 = arith.constant dense<0.000000e+00> : vector<64x128xf32>
    %35 = tpu.matmul %32, %34, %cst_51 {dimension_numbers = #tpu.dot_dimension_numbers<[1], [0], [0], [1], [0, 0, 1, 1], [], []>} : vector<64x4xbf16>, vector<4x128xbf16>, vector<64x128xf32> -> vector<64x128xf32>
    %36 = arith.addf %30, %35 : vector<64x128xf32>
    %37 = vector.extract_strided_slice %29 {offsets = [10, 1, 0], sizes = [8, 8, 4], strides = [1, 1, 1]} : vector<20x10x8xbf16> to vector<8x8x4xbf16>
    %38 = vector.shape_cast %37 : vector<8x8x4xbf16> to vector<64x4xbf16>
    %c0_52 = arith.constant 0 : index
    %c1_53 = arith.constant 1 : index
    %c0_54 = arith.constant 0 : index
    %c0_55 = arith.constant 0 : index
    %39 = vector.load %arg2[%c0_52, %c1_53, %c0_54, %c0_55] : memref<3x3x4x128xbf16, #tpu.memory_space<vmem>>, vector<1x1x4x128xbf16>
    %40 = vector.shape_cast %39 : vector<1x1x4x128xbf16> to vector<4x128xbf16>
    %cst_56 = arith.constant dense<0.000000e+00> : vector<64x128xf32>
    %41 = tpu.matmul %38, %40, %cst_56 {dimension_numbers = #tpu.dot_dimension_numbers<[1], [0], [0], [1], [0, 0, 1, 1], [], []>} : vector<64x4xbf16>, vector<4x128xbf16>, vector<64x128xf32> -> vector<64x128xf32>
    %42 = arith.addf %36, %41 : vector<64x128xf32>
    %43 = vector.extract_strided_slice %29 {offsets = [10, 1, 4], sizes = [8, 8, 4], strides = [1, 1, 1]} : vector<20x10x8xbf16> to vector<8x8x4xbf16>
    %44 = vector.shape_cast %43 : vector<8x8x4xbf16> to vector<64x4xbf16>
    %c0_57 = arith.constant 0 : index
    %c2 = arith.constant 2 : index
    %c0_58 = arith.constant 0 : index
    %c0_59 = arith.constant 0 : index
    %45 = vector.load %arg2[%c0_57, %c2, %c0_58, %c0_59] : memref<3x3x4x128xbf16, #tpu.memory_space<vmem>>, vector<1x1x4x128xbf16>
    %46 = vector.shape_cast %45 : vector<1x1x4x128xbf16> to vector<4x128xbf16>
    %cst_60 = arith.constant dense<0.000000e+00> : vector<64x128xf32>
    %47 = tpu.matmul %44, %46, %cst_60 {dimension_numbers = #tpu.dot_dimension_numbers<[1], [0], [0], [1], [0, 0, 1, 1], [], []>} : vector<64x4xbf16>, vector<4x128xbf16>, vector<64x128xf32> -> vector<64x128xf32>
    %48 = arith.addf %42, %47 : vector<64x128xf32>
    %49 = vector.extract_strided_slice %29 {offsets = [1, 0, 4], sizes = [8, 8, 4], strides = [1, 1, 1]} : vector<20x10x8xbf16> to vector<8x8x4xbf16>
    %50 = vector.shape_cast %49 : vector<8x8x4xbf16> to vector<64x4xbf16>
    %c1_61 = arith.constant 1 : index
    %c0_62 = arith.constant 0 : index
    %c0_63 = arith.constant 0 : index
    %c0_64 = arith.constant 0 : index
    %51 = vector.load %arg2[%c1_61, %c0_62, %c0_63, %c0_64] : memref<3x3x4x128xbf16, #tpu.memory_space<vmem>>, vector<1x1x4x128xbf16>
    %52 = vector.shape_cast %51 : vector<1x1x4x128xbf16> to vector<4x128xbf16>
    %cst_65 = arith.constant dense<0.000000e+00> : vector<64x128xf32>
    %53 = tpu.matmul %50, %52, %cst_65 {dimension_numbers = #tpu.dot_dimension_numbers<[1], [0], [0], [1], [0, 0, 1, 1], [], []>} : vector<64x4xbf16>, vector<4x128xbf16>, vector<64x128xf32> -> vector<64x128xf32>
    %54 = arith.addf %48, %53 : vector<64x128xf32>
    %55 = vector.extract_strided_slice %29 {offsets = [1, 1, 0], sizes = [8, 8, 4], strides = [1, 1, 1]} : vector<20x10x8xbf16> to vector<8x8x4xbf16>
    %56 = vector.shape_cast %55 : vector<8x8x4xbf16> to vector<64x4xbf16>
    %c1_66 = arith.constant 1 : index
    %c1_67 = arith.constant 1 : index
    %c0_68 = arith.constant 0 : index
    %c0_69 = arith.constant 0 : index
    %57 = vector.load %arg2[%c1_66, %c1_67, %c0_68, %c0_69] : memref<3x3x4x128xbf16, #tpu.memory_space<vmem>>, vector<1x1x4x128xbf16>
    %58 = vector.shape_cast %57 : vector<1x1x4x128xbf16> to vector<4x128xbf16>
    %cst_70 = arith.constant dense<0.000000e+00> : vector<64x128xf32>
    %59 = tpu.matmul %56, %58, %cst_70 {dimension_numbers = #tpu.dot_dimension_numbers<[1], [0], [0], [1], [0, 0, 1, 1], [], []>} : vector<64x4xbf16>, vector<4x128xbf16>, vector<64x128xf32> -> vector<64x128xf32>
    %60 = arith.addf %54, %59 : vector<64x128xf32>
    %61 = vector.extract_strided_slice %29 {offsets = [1, 1, 4], sizes = [8, 8, 4], strides = [1, 1, 1]} : vector<20x10x8xbf16> to vector<8x8x4xbf16>
    %62 = vector.shape_cast %61 : vector<8x8x4xbf16> to vector<64x4xbf16>
    %c1_71 = arith.constant 1 : index
    %c2_72 = arith.constant 2 : index
    %c0_73 = arith.constant 0 : index
    %c0_74 = arith.constant 0 : index
    %63 = vector.load %arg2[%c1_71, %c2_72, %c0_73, %c0_74] : memref<3x3x4x128xbf16, #tpu.memory_space<vmem>>, vector<1x1x4x128xbf16>
    %64 = vector.shape_cast %63 : vector<1x1x4x128xbf16> to vector<4x128xbf16>
    %cst_75 = arith.constant dense<0.000000e+00> : vector<64x128xf32>
    %65 = tpu.matmul %62, %64, %cst_75 {dimension_numbers = #tpu.dot_dimension_numbers<[1], [0], [0], [1], [0, 0, 1, 1], [], []>} : vector<64x4xbf16>, vector<4x128xbf16>, vector<64x128xf32> -> vector<64x128xf32>
    %66 = arith.addf %60, %65 : vector<64x128xf32>
    %67 = vector.extract_strided_slice %29 {offsets = [11, 0, 4], sizes = [8, 8, 4], strides = [1, 1, 1]} : vector<20x10x8xbf16> to vector<8x8x4xbf16>
    %68 = vector.shape_cast %67 : vector<8x8x4xbf16> to vector<64x4xbf16>
    %c2_76 = arith.constant 2 : index
    %c0_77 = arith.constant 0 : index
    %c0_78 = arith.constant 0 : index
    %c0_79 = arith.constant 0 : index
    %69 = vector.load %arg2[%c2_76, %c0_77, %c0_78, %c0_79] : memref<3x3x4x128xbf16, #tpu.memory_space<vmem>>, vector<1x1x4x128xbf16>
    %70 = vector.shape_cast %69 : vector<1x1x4x128xbf16> to vector<4x128xbf16>
    %cst_80 = arith.constant dense<0.000000e+00> : vector<64x128xf32>
    %71 = tpu.matmul %68, %70, %cst_80 {dimension_numbers = #tpu.dot_dimension_numbers<[1], [0], [0], [1], [0, 0, 1, 1], [], []>} : vector<64x4xbf16>, vector<4x128xbf16>, vector<64x128xf32> -> vector<64x128xf32>
    %72 = arith.addf %66, %71 : vector<64x128xf32>
    %73 = vector.extract_strided_slice %29 {offsets = [11, 1, 0], sizes = [8, 8, 4], strides = [1, 1, 1]} : vector<20x10x8xbf16> to vector<8x8x4xbf16>
    %74 = vector.shape_cast %73 : vector<8x8x4xbf16> to vector<64x4xbf16>
    %c2_81 = arith.constant 2 : index
    %c1_82 = arith.constant 1 : index
    %c0_83 = arith.constant 0 : index
    %c0_84 = arith.constant 0 : index
    %75 = vector.load %arg2[%c2_81, %c1_82, %c0_83, %c0_84] : memref<3x3x4x128xbf16, #tpu.memory_space<vmem>>, vector<1x1x4x128xbf16>
    %76 = vector.shape_cast %75 : vector<1x1x4x128xbf16> to vector<4x128xbf16>
    %cst_85 = arith.constant dense<0.000000e+00> : vector<64x128xf32>
    %77 = tpu.matmul %74, %76, %cst_85 {dimension_numbers = #tpu.dot_dimension_numbers<[1], [0], [0], [1], [0, 0, 1, 1], [], []>} : vector<64x4xbf16>, vector<4x128xbf16>, vector<64x128xf32> -> vector<64x128xf32>
    %78 = arith.addf %72, %77 : vector<64x128xf32>
    %79 = vector.extract_strided_slice %29 {offsets = [11, 1, 4], sizes = [8, 8, 4], strides = [1, 1, 1]} : vector<20x10x8xbf16> to vector<8x8x4xbf16>
    %80 = vector.shape_cast %79 : vector<8x8x4xbf16> to vector<64x4xbf16>
    %c2_86 = arith.constant 2 : index
    %c2_87 = arith.constant 2 : index
    %c0_88 = arith.constant 0 : index
    %c0_89 = arith.constant 0 : index
    %81 = vector.load %arg2[%c2_86, %c2_87, %c0_88, %c0_89] : memref<3x3x4x128xbf16, #tpu.memory_space<vmem>>, vector<1x1x4x128xbf16>
    %82 = vector.shape_cast %81 : vector<1x1x4x128xbf16> to vector<4x128xbf16>
    %cst_90 = arith.constant dense<0.000000e+00> : vector<64x128xf32>
    %83 = tpu.matmul %80, %82, %cst_90 {dimension_numbers = #tpu.dot_dimension_numbers<[1], [0], [0], [1], [0, 0, 1, 1], [], []>} : vector<64x4xbf16>, vector<4x128xbf16>, vector<64x128xf32> -> vector<64x128xf32>
    %84 = arith.addf %78, %83 : vector<64x128xf32>
    %c0_91 = arith.constant 0 : index
    %c0_92 = arith.constant 0 : index
    %85 = vector.load %arg3[%c0_91, %c0_92] : memref<1x128xf32, #tpu.memory_space<vmem>>, vector<1x128xf32>
    %86 = vector.broadcast %85 : vector<1x128xf32> to vector<64x128xf32>
    %87 = arith.mulf %84, %86 : vector<64x128xf32>
    %c0_93 = arith.constant 0 : index
    %c0_94 = arith.constant 0 : index
    %88 = vector.load %arg4[%c0_93, %c0_94] : memref<1x128xf32, #tpu.memory_space<vmem>>, vector<1x128xf32>
    %89 = vector.broadcast %88 : vector<1x128xf32> to vector<64x128xf32>
    %90 = arith.addf %87, %89 : vector<64x128xf32>
    %cst_95 = arith.constant 0.000000e+00 : f32
    %91 = vector.broadcast %cst_95 : f32 to vector<64x128xf32>
    %92 = arith.maximumf %90, %91 : vector<64x128xf32>
    %93 = vector.shape_cast %92 : vector<64x128xf32> to vector<8x8x128xf32>
    %94 = arith.truncf %93 : vector<8x8x128xf32> to vector<8x8x128xbf16>
    %c1_96 = arith.constant 1 : index
    %c1_97 = arith.constant 1 : index
    %c0_98 = arith.constant 0 : index
    %95 = vector.load %arg13[%c1_96, %c1_97, %c0_98] : memref<10x10x128xbf16, #tpu.memory_space<vmem>>, vector<8x8x128xbf16>
    tpu.vector_store %arg13[%c1_96, %c1_97, %c0_98], %94 {strides = array<i32>} : memref<10x10x128xbf16, #tpu.memory_space<vmem>>, vector<8x8x128xbf16>,
    %cst_99 = arith.constant 0.000000e+00 : f32
    %96 = vector.broadcast %cst_99 : f32 to vector<64x128xf32>
    %c0_100 = arith.constant 0 : index
    %c0_101 = arith.constant 0 : index
    %c0_102 = arith.constant 0 : index
    %97 = vector.load %arg13[%c0_100, %c0_101, %c0_102] : memref<10x10x128xbf16, #tpu.memory_space<vmem>>, vector<8x8x128xbf16>
    %98 = vector.shape_cast %97 : vector<8x8x128xbf16> to vector<64x128xbf16>
    %c0_103 = arith.constant 0 : index
    %c0_104 = arith.constant 0 : index
    %c0_105 = arith.constant 0 : index
    %c0_106 = arith.constant 0 : index
    %99 = vector.load %arg5[%c0_103, %c0_104, %c0_105, %c0_106] : memref<3x3x128x128xbf16, #tpu.memory_space<vmem>>, vector<1x1x128x128xbf16>
    %100 = vector.shape_cast %99 : vector<1x1x128x128xbf16> to vector<128x128xbf16>
    %cst_107 = arith.constant dense<0.000000e+00> : vector<64x128xf32>
    %101 = tpu.matmul %98, %100, %cst_107 {dimension_numbers = #tpu.dot_dimension_numbers<[1], [0], [0], [1], [0, 0, 1, 1], [], []>} : vector<64x128xbf16>, vector<128x128xbf16>, vector<64x128xf32> -> vector<64x128xf32>
    %102 = arith.addf %96, %101 : vector<64x128xf32>
    %c0_108 = arith.constant 0 : index
    %c1_109 = arith.constant 1 : index
    %c0_110 = arith.constant 0 : index
    %103 = vector.load %arg13[%c0_108, %c1_109, %c0_110] : memref<10x10x128xbf16, #tpu.memory_space<vmem>>, vector<8x8x128xbf16>
    %104 = vector.shape_cast %103 : vector<8x8x128xbf16> to vector<64x128xbf16>
    %c0_111 = arith.constant 0 : index
    %c1_112 = arith.constant 1 : index
    %c0_113 = arith.constant 0 : index
    %c0_114 = arith.constant 0 : index
    %105 = vector.load %arg5[%c0_111, %c1_112, %c0_113, %c0_114] : memref<3x3x128x128xbf16, #tpu.memory_space<vmem>>, vector<1x1x128x128xbf16>
    %106 = vector.shape_cast %105 : vector<1x1x128x128xbf16> to vector<128x128xbf16>
    %cst_115 = arith.constant dense<0.000000e+00> : vector<64x128xf32>
    %107 = tpu.matmul %104, %106, %cst_115 {dimension_numbers = #tpu.dot_dimension_numbers<[1], [0], [0], [1], [0, 0, 1, 1], [], []>} : vector<64x128xbf16>, vector<128x128xbf16>, vector<64x128xf32> -> vector<64x128xf32>
    %108 = arith.addf %102, %107 : vector<64x128xf32>
    %c0_116 = arith.constant 0 : index
    %c2_117 = arith.constant 2 : index
    %c0_118 = arith.constant 0 : index
    %109 = vector.load %arg13[%c0_116, %c2_117, %c0_118] : memref<10x10x128xbf16, #tpu.memory_space<vmem>>, vector<8x8x128xbf16>
    %110 = vector.shape_cast %109 : vector<8x8x128xbf16> to vector<64x128xbf16>
    %c0_119 = arith.constant 0 : index
    %c2_120 = arith.constant 2 : index
    %c0_121 = arith.constant 0 : index
    %c0_122 = arith.constant 0 : index
    %111 = vector.load %arg5[%c0_119, %c2_120, %c0_121, %c0_122] : memref<3x3x128x128xbf16, #tpu.memory_space<vmem>>, vector<1x1x128x128xbf16>
    %112 = vector.shape_cast %111 : vector<1x1x128x128xbf16> to vector<128x128xbf16>
    %cst_123 = arith.constant dense<0.000000e+00> : vector<64x128xf32>
    %113 = tpu.matmul %110, %112, %cst_123 {dimension_numbers = #tpu.dot_dimension_numbers<[1], [0], [0], [1], [0, 0, 1, 1], [], []>} : vector<64x128xbf16>, vector<128x128xbf16>, vector<64x128xf32> -> vector<64x128xf32>
    %114 = arith.addf %108, %113 : vector<64x128xf32>
    %c1_124 = arith.constant 1 : index
    %c0_125 = arith.constant 0 : index
    %c0_126 = arith.constant 0 : index
    %115 = vector.load %arg13[%c1_124, %c0_125, %c0_126] : memref<10x10x128xbf16, #tpu.memory_space<vmem>>, vector<8x8x128xbf16>
    %116 = vector.shape_cast %115 : vector<8x8x128xbf16> to vector<64x128xbf16>
    %c1_127 = arith.constant 1 : index
    %c0_128 = arith.constant 0 : index
    %c0_129 = arith.constant 0 : index
    %c0_130 = arith.constant 0 : index
    %117 = vector.load %arg5[%c1_127, %c0_128, %c0_129, %c0_130] : memref<3x3x128x128xbf16, #tpu.memory_space<vmem>>, vector<1x1x128x128xbf16>
    %118 = vector.shape_cast %117 : vector<1x1x128x128xbf16> to vector<128x128xbf16>
    %cst_131 = arith.constant dense<0.000000e+00> : vector<64x128xf32>
    %119 = tpu.matmul %116, %118, %cst_131 {dimension_numbers = #tpu.dot_dimension_numbers<[1], [0], [0], [1], [0, 0, 1, 1], [], []>} : vector<64x128xbf16>, vector<128x128xbf16>, vector<64x128xf32> -> vector<64x128xf32>
    %120 = arith.addf %114, %119 : vector<64x128xf32>
    %c1_132 = arith.constant 1 : index
    %c1_133 = arith.constant 1 : index
    %c0_134 = arith.constant 0 : index
    %121 = vector.load %arg13[%c1_132, %c1_133, %c0_134] : memref<10x10x128xbf16, #tpu.memory_space<vmem>>, vector<8x8x128xbf16>
    %122 = vector.shape_cast %121 : vector<8x8x128xbf16> to vector<64x128xbf16>
    %c1_135 = arith.constant 1 : index
    %c1_136 = arith.constant 1 : index
    %c0_137 = arith.constant 0 : index
    %c0_138 = arith.constant 0 : index
    %123 = vector.load %arg5[%c1_135, %c1_136, %c0_137, %c0_138] : memref<3x3x128x128xbf16, #tpu.memory_space<vmem>>, vector<1x1x128x128xbf16>
    %124 = vector.shape_cast %123 : vector<1x1x128x128xbf16> to vector<128x128xbf16>
    %cst_139 = arith.constant dense<0.000000e+00> : vector<64x128xf32>
    %125 = tpu.matmul %122, %124, %cst_139 {dimension_numbers = #tpu.dot_dimension_numbers<[1], [0], [0], [1], [0, 0, 1, 1], [], []>} : vector<64x128xbf16>, vector<128x128xbf16>, vector<64x128xf32> -> vector<64x128xf32>
    %126 = arith.addf %120, %125 : vector<64x128xf32>
    %c1_140 = arith.constant 1 : index
    %c2_141 = arith.constant 2 : index
    %c0_142 = arith.constant 0 : index
    %127 = vector.load %arg13[%c1_140, %c2_141, %c0_142] : memref<10x10x128xbf16, #tpu.memory_space<vmem>>, vector<8x8x128xbf16>
    %128 = vector.shape_cast %127 : vector<8x8x128xbf16> to vector<64x128xbf16>
    %c1_143 = arith.constant 1 : index
    %c2_144 = arith.constant 2 : index
    %c0_145 = arith.constant 0 : index
    %c0_146 = arith.constant 0 : index
    %129 = vector.load %arg5[%c1_143, %c2_144, %c0_145, %c0_146] : memref<3x3x128x128xbf16, #tpu.memory_space<vmem>>, vector<1x1x128x128xbf16>
    %130 = vector.shape_cast %129 : vector<1x1x128x128xbf16> to vector<128x128xbf16>
    %cst_147 = arith.constant dense<0.000000e+00> : vector<64x128xf32>
    %131 = tpu.matmul %128, %130, %cst_147 {dimension_numbers = #tpu.dot_dimension_numbers<[1], [0], [0], [1], [0, 0, 1, 1], [], []>} : vector<64x128xbf16>, vector<128x128xbf16>, vector<64x128xf32> -> vector<64x128xf32>
    %132 = arith.addf %126, %131 : vector<64x128xf32>
    %c2_148 = arith.constant 2 : index
    %c0_149 = arith.constant 0 : index
    %c0_150 = arith.constant 0 : index
    %133 = vector.load %arg13[%c2_148, %c0_149, %c0_150] : memref<10x10x128xbf16, #tpu.memory_space<vmem>>, vector<8x8x128xbf16>
    %134 = vector.shape_cast %133 : vector<8x8x128xbf16> to vector<64x128xbf16>
    %c2_151 = arith.constant 2 : index
    %c0_152 = arith.constant 0 : index
    %c0_153 = arith.constant 0 : index
    %c0_154 = arith.constant 0 : index
    %135 = vector.load %arg5[%c2_151, %c0_152, %c0_153, %c0_154] : memref<3x3x128x128xbf16, #tpu.memory_space<vmem>>, vector<1x1x128x128xbf16>
    %136 = vector.shape_cast %135 : vector<1x1x128x128xbf16> to vector<128x128xbf16>
    %cst_155 = arith.constant dense<0.000000e+00> : vector<64x128xf32>
    %137 = tpu.matmul %134, %136, %cst_155 {dimension_numbers = #tpu.dot_dimension_numbers<[1], [0], [0], [1], [0, 0, 1, 1], [], []>} : vector<64x128xbf16>, vector<128x128xbf16>, vector<64x128xf32> -> vector<64x128xf32>
    %138 = arith.addf %132, %137 : vector<64x128xf32>
    %c2_156 = arith.constant 2 : index
    %c1_157 = arith.constant 1 : index
    %c0_158 = arith.constant 0 : index
    %139 = vector.load %arg13[%c2_156, %c1_157, %c0_158] : memref<10x10x128xbf16, #tpu.memory_space<vmem>>, vector<8x8x128xbf16>
    %140 = vector.shape_cast %139 : vector<8x8x128xbf16> to vector<64x128xbf16>
    %c2_159 = arith.constant 2 : index
    %c1_160 = arith.constant 1 : index
    %c0_161 = arith.constant 0 : index
    %c0_162 = arith.constant 0 : index
    %141 = vector.load %arg5[%c2_159, %c1_160, %c0_161, %c0_162] : memref<3x3x128x128xbf16, #tpu.memory_space<vmem>>, vector<1x1x128x128xbf16>
    %142 = vector.shape_cast %141 : vector<1x1x128x128xbf16> to vector<128x128xbf16>
    %cst_163 = arith.constant dense<0.000000e+00> : vector<64x128xf32>
    %143 = tpu.matmul %140, %142, %cst_163 {dimension_numbers = #tpu.dot_dimension_numbers<[1], [0], [0], [1], [0, 0, 1, 1], [], []>} : vector<64x128xbf16>, vector<128x128xbf16>, vector<64x128xf32> -> vector<64x128xf32>
    %144 = arith.addf %138, %143 : vector<64x128xf32>
    %c2_164 = arith.constant 2 : index
    %c2_165 = arith.constant 2 : index
    %c0_166 = arith.constant 0 : index
    %145 = vector.load %arg13[%c2_164, %c2_165, %c0_166] : memref<10x10x128xbf16, #tpu.memory_space<vmem>>, vector<8x8x128xbf16>
    %146 = vector.shape_cast %145 : vector<8x8x128xbf16> to vector<64x128xbf16>
    %c2_167 = arith.constant 2 : index
    %c2_168 = arith.constant 2 : index
    %c0_169 = arith.constant 0 : index
    %c0_170 = arith.constant 0 : index
    %147 = vector.load %arg5[%c2_167, %c2_168, %c0_169, %c0_170] : memref<3x3x128x128xbf16, #tpu.memory_space<vmem>>, vector<1x1x128x128xbf16>
    %148 = vector.shape_cast %147 : vector<1x1x128x128xbf16> to vector<128x128xbf16>
    %cst_171 = arith.constant dense<0.000000e+00> : vector<64x128xf32>
    %149 = tpu.matmul %146, %148, %cst_171 {dimension_numbers = #tpu.dot_dimension_numbers<[1], [0], [0], [1], [0, 0, 1, 1], [], []>} : vector<64x128xbf16>, vector<128x128xbf16>, vector<64x128xf32> -> vector<64x128xf32>
    %150 = arith.addf %144, %149 : vector<64x128xf32>
    %c0_172 = arith.constant 0 : index
    %c0_173 = arith.constant 0 : index
    %151 = vector.load %arg6[%c0_172, %c0_173] : memref<1x128xf32, #tpu.memory_space<vmem>>, vector<1x128xf32>
    %152 = vector.broadcast %151 : vector<1x128xf32> to vector<64x128xf32>
    %153 = arith.mulf %150, %152 : vector<64x128xf32>
    %c0_174 = arith.constant 0 : index
    %c0_175 = arith.constant 0 : index
    %154 = vector.load %arg7[%c0_174, %c0_175] : memref<1x128xf32, #tpu.memory_space<vmem>>, vector<1x128xf32>
    %155 = vector.broadcast %154 : vector<1x128xf32> to vector<64x128xf32>
    %156 = arith.addf %153, %155 : vector<64x128xf32>
    %157 = vector.extract_strided_slice %29 {offsets = [1, 1, 0], sizes = [8, 8, 4], strides = [1, 1, 1]} : vector<20x10x8xbf16> to vector<8x8x4xbf16>
    %158 = vector.shape_cast %157 : vector<8x8x4xbf16> to vector<64x4xbf16>
    %c0_176 = arith.constant 0 : index
    %c0_177 = arith.constant 0 : index
    %159 = vector.load %arg8[%c0_176, %c0_177] : memref<4x128xbf16, #tpu.memory_space<vmem>>, vector<4x128xbf16>
    %cst_178 = arith.constant dense<0.000000e+00> : vector<64x128xf32>
    %160 = tpu.matmul %158, %159, %cst_178 {dimension_numbers = #tpu.dot_dimension_numbers<[1], [0], [0], [1], [0, 0, 1, 1], [], []>} : vector<64x4xbf16>, vector<4x128xbf16>, vector<64x128xf32> -> vector<64x128xf32>
    %c0_179 = arith.constant 0 : index
    %c0_180 = arith.constant 0 : index
    %161 = vector.load %arg9[%c0_179, %c0_180] : memref<1x128xf32, #tpu.memory_space<vmem>>, vector<1x128xf32>
    %162 = vector.broadcast %161 : vector<1x128xf32> to vector<64x128xf32>
    %163 = arith.mulf %160, %162 : vector<64x128xf32>
    %c0_181 = arith.constant 0 : index
    %c0_182 = arith.constant 0 : index
    %164 = vector.load %arg10[%c0_181, %c0_182] : memref<1x128xf32, #tpu.memory_space<vmem>>, vector<1x128xf32>
    %165 = vector.broadcast %164 : vector<1x128xf32> to vector<64x128xf32>
    %166 = arith.addf %163, %165 : vector<64x128xf32>
    %167 = arith.addf %156, %166 : vector<64x128xf32>
    %cst_183 = arith.constant 0.000000e+00 : f32
    %168 = vector.broadcast %cst_183 : f32 to vector<64x128xf32>
    %169 = arith.maximumf %167, %168 : vector<64x128xf32>
    %170 = vector.shape_cast %169 : vector<64x128xf32> to vector<8x8x128xf32>
    %c0_184 = arith.constant 0 : index
    %c0_185 = arith.constant 0 : index
    %c0_186 = arith.constant 0 : index
    %c0_187 = arith.constant 0 : index
    %171 = vector.load %arg11[%c0_184, %c0_185, %c0_186, %c0_187] : memref<1x8x8x128xf32, #tpu.memory_space<vmem>>, vector<1x8x8x128xf32>
    %172 = vector.shape_cast %171 : vector<1x8x8x128xf32> to vector<8x8x128xf32>
    %173 = vector.shape_cast %170 : vector<8x8x128xf32> to vector<1x8x8x128xf32>
    tpu.vector_store %arg11[%c0_184, %c0_185, %c0_186, %c0_187], %173 {strides = array<i32>} : memref<1x8x8x128xf32, #tpu.memory_space<vmem>>, vector<1x8x8x128xf32>,
    return
  }
  func.func @transform_0(%arg0: i32) -> (i32, i32, i32, i32) {
    %c0_i32 = arith.constant 0 : i32
    %c0_i32_0 = arith.constant 0 : i32
    %c0_i32_1 = arith.constant 0 : i32
    %c0_i32_2 = arith.constant 0 : i32
    return %arg0, %c0_i32, %c0_i32_0, %c0_i32_1 : i32, i32, i32, i32
  }
  func.func @transform_1(%arg0: i32) -> (i32, i32, i32, i32) {
    %c0_i32 = arith.constant 0 : i32
    %c0_i32_0 = arith.constant 0 : i32
    %c0_i32_1 = arith.constant 0 : i32
    %c0_i32_2 = arith.constant 0 : i32
    %c0_i32_3 = arith.constant 0 : i32
    return %c0_i32, %c0_i32_0, %c0_i32_1, %c0_i32_2 : i32, i32, i32, i32
  }
  func.func @transform_2(%arg0: i32) -> (i32, i32) {
    %c0_i32 = arith.constant 0 : i32
    %c0_i32_0 = arith.constant 0 : i32
    %c0_i32_1 = arith.constant 0 : i32
    return %c0_i32, %c0_i32_0 : i32, i32
  }
  func.func @transform_3(%arg0: i32) -> (i32, i32) {
    %c0_i32 = arith.constant 0 : i32
    %c0_i32_0 = arith.constant 0 : i32
    %c0_i32_1 = arith.constant 0 : i32
    return %c0_i32, %c0_i32_0 : i32, i32
  }
  func.func @transform_4(%arg0: i32) -> (i32, i32, i32, i32) {
    %c0_i32 = arith.constant 0 : i32
    %c0_i32_0 = arith.constant 0 : i32
    %c0_i32_1 = arith.constant 0 : i32
    %c0_i32_2 = arith.constant 0 : i32
    %c0_i32_3 = arith.constant 0 : i32
    return %c0_i32, %c0_i32_0, %c0_i32_1, %c0_i32_2 : i32, i32, i32, i32
  }
  func.func @transform_5(%arg0: i32) -> (i32, i32) {
    %c0_i32 = arith.constant 0 : i32
    %c0_i32_0 = arith.constant 0 : i32
    %c0_i32_1 = arith.constant 0 : i32
    return %c0_i32, %c0_i32_0 : i32, i32
  }
  func.func @transform_6(%arg0: i32) -> (i32, i32) {
    %c0_i32 = arith.constant 0 : i32
    %c0_i32_0 = arith.constant 0 : i32
    %c0_i32_1 = arith.constant 0 : i32
    return %c0_i32, %c0_i32_0 : i32, i32
  }
  func.func @transform_7(%arg0: i32) -> (i32, i32) {
    %c0_i32 = arith.constant 0 : i32
    %c0_i32_0 = arith.constant 0 : i32
    %c0_i32_1 = arith.constant 0 : i32
    return %c0_i32, %c0_i32_0 : i32, i32
  }
  func.func @transform_8(%arg0: i32) -> (i32, i32) {
    %c0_i32 = arith.constant 0 : i32
    %c0_i32_0 = arith.constant 0 : i32
    %c0_i32_1 = arith.constant 0 : i32
    return %c0_i32, %c0_i32_0 : i32, i32
  }
  func.func @transform_9(%arg0: i32) -> (i32, i32) {
    %c0_i32 = arith.constant 0 : i32
    %c0_i32_0 = arith.constant 0 : i32
    %c0_i32_1 = arith.constant 0 : i32
    return %c0_i32, %c0_i32_0 : i32, i32
  }
  func.func @transform_10(%arg0: i32) -> (i32, i32, i32, i32) {
    %c0_i32 = arith.constant 0 : i32
    %c0_i32_0 = arith.constant 0 : i32
    %c0_i32_1 = arith.constant 0 : i32
    %c0_i32_2 = arith.constant 0 : i32
    return %arg0, %c0_i32, %c0_i32_0, %c0_i32_1 : i32, i32, i32, i32
  }
}

</mosaic_0001>

<bundles_post_ra>
// kernel: tpu_custom_call.1
= control target key start
LH: loop header
LB: loop body
LE: loop exit
PB: predicated region body
PF: predicated region fallthrough
CT: control target
= control target key end

     0   :  { %15 = vsyncpa [#allocation5], 0  ;;  %s6791_s0 = inlined_call_operand.vmem [shape: bf16[2,16,8,8], index: 0, kind: input, shape index: {}]   ;;  %s6792_s1 = inlined_call_operand.vmem [shape: bf16[3,3,4,128], index: 1, kind: input, shape index: {}]   ;;  %s6793_s2 = inlined_call_operand.vmem [shape: f32[1,128], index: 2, kind: input, shape index: {}]   ;;  %s6794_s3 = inlined_call_operand.vmem [shape: f32[1,128], index: 3, kind: input, shape index: {}]   ;;  %s6795_s4 = inlined_call_operand.hbm [shape: bf16[3,3,128,128], index: 4, kind: input, shape index: {}]   ;;  %s6796_s5 = inlined_call_operand.vmem [shape: f32[1,128], index: 5, kind: input, shape index: {}]   ;;  %s6797_s6 = inlined_call_operand.vmem [shape: f32[1,128], index: 6, kind: input, shape index: {}]   ;;  %s6798_s7 = inlined_call_operand.vmem [shape: bf16[4,128], index: 7, kind: input, shape index: {}]   ;;  %s6799_s8 = inlined_call_operand.vmem [shape: f32[1,128], index: 8, kind: input, shape index: {}]   ;;  %s6800_s9 = inlined_call_operand.vmem [shape: f32[1,128], index: 9, kind: input, shape index: {}]   ;;  %s6801_s10 = inlined_call_operand.hbm [shape: f32[2,8,8,128], index: 10, kind: output, shape index: {}]  }
   0x1   :  { %16 = vsyncpa [#allocation6], 0 }
   0x2   :  { %18 = vsyncpa [#allocation6 + $0x1], 0  ;;  %s5617_s13 = smov 0   ;;  %s5619_s14 = smov 0  }
   0x3   :  { %s5621_s15 = smov 0   ;;  %s5623_s16 = smov 0  }
   0x4 LB: > { %s5638_s17 = sadd.s32 4294967295, %s5552_s16   ;;  %s4456_s18 = sadd.s32 4294967294, %s5552_s16   ;;  %s5552_s16 = sphi %s5623_s16, %s6833_s16   ;;  %s5548_s15 = sphi %s5621_s15, %s6832_s15   ;;  %s5544_s14 = sphi %s5619_s14, %s6831_s14   ;;  %s5540_s13 = sphi %s5617_s13, %s6830_s13  }
   0x5   : > { %s5642_s19 = sadd.s32 1, %s5552_s16   ;;  %s246_s20 = sadd.s32 1, %s5548_s15 }
   0x6   : > { %s243_s21 = ssub.s32 %s5552_s16, %s5642_s19  ;;  %p256_p0 = scmp.ne.s32.totalorder %s5548_s15, %s5544_s14 }
   0x7   : > { %p244_p1 = scmp.eq.s32.totalorder %s243_s21, 0  ;;  %p257_p2 = scmp.eq.s32.totalorder %s5638_s17, 1 }
   0x8   : > { %p262_p3 = scmp.ne.s32.totalorder %s5544_s14, %s5540_s13  ;;  %p263_p4 = scmp.eq.s32.totalorder %s4456_s18, 1 }
   0x9   : > { %s5653_s22 = scalar_select %p244_p1, %s5548_s15, %s246_s20  }
   0xa   : > { %p5655_p5 = por %p257_p2, %p256_p0  ;;  %p5659_p6 = por %p263_p4, %p262_p3 }
   0xb   : > { %p4457_p7 = scmp.ge.s32.totalorder %s5552_s16, 1  ;;  %p270_p8 = scmp.lt.s32.totalorder %s5552_s16, 3 }
   0xc   : > { %s6805_s23 = scalar_select %p5655_p5, 1, 0 }
   0xd   : > { %s6806_s24 = scalar_select %p5659_p6, 1, 0 }
   0xe   : > { %p6802_p9 = scmp.eq.s32.totalorder %s5638_s17, 0  ;;  %p5666_p10 = pnand %p4457_p7, %p270_p8 }
   0xf   : > { %s5554_s26 = smov [#allocation4]   ;;  %s5458_s11 = scalar_lea.hbm %s6795_s4, 9216 }
  0x10   : > { %s6807_s25 = scalar_select %p5666_p10, 1, 0 }
  0x11   : > { %s291_s27 = sshll.u32 %s5554_s26, 4  ;;  %p5316_p11 = pneg %p5666_p10  ;;  %s292_s27 = int_to_ptr.vmem [resolvable:$true] %s291_s27 }
  0x12   : > { %p5459_p13 = scmp.ne.s32.totalorder %s6795_s4, %s5458_s11  ;;  %p5465_p3 = scmp.lt.u32.totalorder %s5458_s11, %s6795_s4 }
  0x13   : > { %p5674_p12 = pnand %p6802_p9, %p5316_p11 }
  0x15   : > { %p5460_p0 = pneg %p5674_p12 }
  0x17   : > { %p5461_p1 = pnand %p5460_p0, %p5459_p13 }
  0x19   : > { %p5462_p2 = pneg %p5461_p1 }
  0x1b   : > { %p5467_p4 = pnand %p5465_p3, %p5462_p2 }
  0x1d   : > { %5470 = shalt.err (!%p5467_p4)
}
  0x1e   : > { %s5471_s26 = scalar_lea.vmem %s292_s27, 9216  ;;  %p5479_p9 = scmp.lt.s32.totalorder %s292_s27, %s292_s27 }
  0x1f   : > { %p5472_p7 = scmp.ne.s32.totalorder %s292_s27, %s5471_s26  ;;  %p5480_p6 = scmp.lt.s32.totalorder %s5471_s26, %s5471_s26 }
  0x21   : > { %p5474_p8 = pnand %p5472_p7, %p5460_p0  ;;  %p5481_p5 = por %p5480_p6, %p5479_p9 }
  0x23   : > { %p5475_p11 = pneg %p5474_p8 }
  0x25   : > { %p5482_p10 = pnand %p5481_p5, %p5475_p11 }
  0x27   : > { %5485 = shalt.err (!%p5482_p10)
}
  0x28   : > { %s5555_s29 = smov 64   ;;  %s5556_s30 = smov 4  }
  0x29   : > { %5319 = dma.hbm_to_vmem [thread:$0]  (!%p5674_p12), %s6795_s4, 9216, %s292_s27, [#allocation5], %s5555_s29, %s5555_s29, %s5556_s30  }
  0x2a   : > { %p6809_p13 = scmp.ne.s32.totalorder %s6807_s25, 0 }
  0x2b   : > { %p6810_p1 = scmp.eq.s32.totalorder (!%p6809_p13), %s5638_s17, 0 }
  0x2c   : > { %330 = sbr.rel (%p6809_p13) target bundleno = 1023 (0x3ff), region = 60 }
  0x33   : > { %5531 = dma.done.wait (%p6810_p1), [#allocation5], 9216   ;;  %p6811_p0 = pmov %p6810_p1 }
  0x34   : > { %p368_p5 = scmp.lt.s32.totalorder %s5638_s17, 1  ;;  %vm374_vm0 = vcmask 60416   ;;  %vm376_vm1 = vcmask 57344   ;;  %v5557_v0 = vmov 0   ;;  %vm388_vm2 = vsmask.f32 256 }
  0x35   : > { %5533 = vsyncadd (%p6811_p0), [#allocation5], 4294958080  ;;  %382 = vst.msk [vmem:[#allocation2 + $0x50] sm:$0xf] %vm374_vm0, %v5557_v0  ;;  %vm450_vm4 = vsmask.f32 7938 }
  0x36   : > { %385 = vst.msk [vmem:[#allocation2 + $0x98] sm:$0xf] %vm374_vm0, %v5557_v0  ;;  %375 = vst.msk [vmem:[#allocation2] sm:$0xf] %vm374_vm0, %v5557_v0  ;;  %s369_s25 = scalar_select %p368_p5, %s5638_s17, 1  ;;  %vm1020_vm10 = vcmask 31744  }
  0x37   : > { %386 = vst.msk [vmem:[#allocation2 + $0x9c] sm:$0x1] %vm376_vm1, %v5557_v0  ;;  %377 = vst.msk [vmem:[#allocation2 + $0x4] sm:$0x1] %vm376_vm1, %v5557_v0  ;;  %v423_v2 = vld [vmem:[#allocation2 + $0x58] sm:$0x1] }
  0x38   : > { %379 = vst.msk [vmem:[#allocation2 + $0x48] sm:$0xf] %vm374_vm0, %v5557_v0  ;;  %512 = vst [vmem:[#allocation3] sm:$0xf] %v5557_v0  ;;  %s4688_s27 = sshll.u32 %s369_s25, 6  ;;  %s5558_s21 = smov 124  }
  0x39   : > { %380 = vst.msk [vmem:[#allocation2 + $0x4c] sm:$0x1] %vm376_vm1, %v5557_v0  ;;  %383 = vst.msk [vmem:[#allocation2 + $0x54] sm:$0x1] %vm376_vm1, %v5557_v0  ;;  %s5715_s20 = scalar_lea.vmem %s6791_s0, %s4688_s27  ;;  %v426_v4 = vld [vmem:[#allocation2 + $0x60] sm:$0x1] }
  0x3a   : > { %513 = vst [vmem:[#allocation3 + $0x4] sm:$0x1] %v5557_v0  ;;  %515 = vst [vmem:[#allocation3 + $0x48] sm:$0xf] %v5557_v0  ;;  %v581_v3 = vld [vmem:[%s5715_s20 + $0x4] sm:$0xf] }
  0x3b   : > { %516 = vst [vmem:[#allocation3 + $0x4c] sm:$0x1] %v5557_v0  ;;  %vm5719_vm3 = vmand %vm376_vm1, %vm388_vm2  ;;  %v728_v8 = vshrl.u32 %v581_v3, 16  ;;  %v731_v13 = vshll.u32 %v581_v3, 16  ;;  %v429_v25 = vld [vmem:[#allocation2 + $0x68] sm:$0x1] }
  0x3c   : > { %v420_v5 = vld [vmem:[#allocation2 + $0x50] sm:$0x1]  ;;  %v424_v6 = vsel %vm5719_vm3, 0, %v423_v2  ;;  %vm5732_vm5 = vmand %vm376_vm1, %vm450_vm4  ;;  %v427_v14 = vsel %vm5719_vm3, 0, %v426_v4  ;;  %v430_v27 = vsel %vm5719_vm3, 0, %v429_v25  ;;  %vm1033_vm11 = vcmask 1041408  }
  0x3d   : > { %v447_v7 = vld [vmem:[#allocation2 + $0x98] sm:$0x1]  ;;  %v421_v9 = vsel %vm5719_vm3, 0, %v420_v5  ;;  %425 = vst [vmem:[#allocation2 + $0x58] sm:$0x1] %v424_v6  ;;  %v5740_v16 = vrot.slane %v728_v8, 7  ;;  %vm5757_vm6 = vmand %vm374_vm0, %vm450_vm4 }
  0x3e   : > { %v448_v10 = vsel %vm5719_vm3, 0, %v447_v7  ;;  %v509_v12 = vld [vmem:[#allocation2 + $0x9c] sm:$0x1]  ;;  %422 = vst [vmem:[#allocation2 + $0x50] sm:$0x1] %v421_v9  ;;  %vm517_vm12 = vcmask 1040384  }
  0x3f   : > { %449 = vst [vmem:[#allocation2 + $0x98] sm:$0x1] %v448_v10  ;;  %v510_v15 = vsel %vm5732_vm5, 0, %v509_v12  ;;  %v390_v17 = vld [vmem:[#allocation2] sm:$0x1]  ;;  %v733_v26 = vor.u32 %v731_v13, %v5740_v16  ;;  %v734_v36 = vrot.slane %v5740_v16, 4  ;;  %vm6239_vm13 = vmand %vm517_vm12, %vm388_vm2 }
  0x40   : > { %v417_v18 = vld [vmem:[#allocation2 + $0x48] sm:$0x1]  ;;  %428 = vst [vmem:[#allocation2 + $0x60] sm:$0x1] %v427_v14  ;;  %511 = vst [vmem:[#allocation2 + $0x9c] sm:$0x1] %v510_v15 }
  0x41   : > { %v391_v19 = vsel %vm5719_vm3, 0, %v390_v17  ;;  %v418_v20 = vsel %vm5719_vm3, 0, %v417_v18  ;;  %v452_v21 = vld [vmem:[#allocation2 + $0x4] sm:$0x1]  ;;  %v479_v22 = vld [vmem:[#allocation2 + $0x4c] sm:$0x1]  ;;  %vm6247_vm14 = vmand %vm517_vm12, %vm450_vm4 }
  0x42   : > { %392 = vst [vmem:[#allocation2] sm:$0x1] %v391_v19  ;;  %419 = vst [vmem:[#allocation2 + $0x48] sm:$0x1] %v418_v20  ;;  %v453_v23 = vsel %vm5732_vm5, 0, %v452_v21  ;;  %v480_v24 = vsel %vm5732_vm5, 0, %v479_v22 }
  0x43   : > { %454 = vst [vmem:[#allocation2 + $0x4] sm:$0x1] %v453_v23  ;;  %481 = vst [vmem:[#allocation2 + $0x4c] sm:$0x1] %v480_v24  ;;  %v583_v28 = vld [vmem:[%s5715_s20 + $0xc] sm:$0xf] }
  0x44   : > { %v585_v29 = vld [vmem:[%s5715_s20 + $0x14] sm:$0xf]  ;;  %431 = vst [vmem:[#allocation2 + $0x68] sm:$0x1] %v430_v27  ;;  %v736_v31 = vshrl.u32 %v583_v28, 16  ;;  %v739_v32 = vshll.u32 %v583_v28, 16 }
  0x45   : > { %v744_v33 = vshrl.u32 %v585_v29, 16  ;;  %v747_v34 = vshll.u32 %v585_v29, 16  ;;  %v432_v35 = vld [vmem:[#allocation2 + $0x70] sm:$0x1]  ;;  %v435_v38 = vld [vmem:[#allocation2 + $0x78] sm:$0x1] }
  0x46   : > { %v433_v37 = vsel %vm5719_vm3, 0, %v432_v35  ;;  %v587_v39 = vld [vmem:[%s5715_s20 + $0x1c] sm:$0xf]  ;;  %v808_v40 = vld [vmem:[#allocation2 + $0x58] sm:$0xf]  ;;  %v5765_v41 = vrot.slane %v736_v31, 7 }
  0x47   : > { %v5767_v42 = vrot.slane %v744_v33, 7  ;;  %434 = vst [vmem:[#allocation2 + $0x70] sm:$0x1] %v433_v37  ;;  %v436_v43 = vsel %vm5719_vm3, 0, %v435_v38  ;;  %v752_v44 = vshrl.u32 %v587_v39, 16  ;;  %v809_v45 = vsel %vm5757_vm6, %v733_v26, %v808_v40  ;;  %s365_s11 = sand.u32 1, %s5544_s14  }
  0x48   : > { %v5773_v46 = vld [vmem:[#allocation2 + $0x50] sm:$0xf]  ;;  %v814_v47 = vld [vmem:[#allocation2 + $0x60] sm:$0xf]  ;;  %437 = vst [vmem:[#allocation2 + $0x78] sm:$0x1] %v436_v43  ;;  %v741_v51 = vor.u32 %v739_v32, %v5765_v41 }
  0x49   : > { %v589_v48 = vld [vmem:[%s5715_s20 + $0x24] sm:$0xf]  ;;  %810 = vst [vmem:[#allocation2 + $0x58] sm:$0xf] %v809_v45  ;;  %v895_v49 = vshrl.u32 %v5773_v46, 16  ;;  %v898_v50 = vshll.u32 %v5773_v46, 16  ;;  %v749_v52 = vor.u32 %v747_v34, %v5767_v42 }
  0x4a   : > { %v438_v53 = vld [vmem:[#allocation2 + $0x80] sm:$0x1]  ;;  %v441_v54 = vld [vmem:[#allocation2 + $0x88] sm:$0x1]  ;;  %v5780_v55 = vrot.slane %v752_v44, 7  ;;  %v755_v56 = vshll.u32 %v587_v39, 16  ;;  %v815_v62 = vsel %vm5757_vm6, %v741_v51, %v814_v47 }
  0x4b   : > { %v760_v57 = vshrl.u32 %v589_v48, 16  ;;  %v763_v58 = vshll.u32 %v589_v48, 16  ;;  %v591_v59 = vld [vmem:[%s5715_s20 + $0x2c] sm:$0xf]  ;;  %v897_v60 = vrot.slane %v895_v49, 4  ;;  %v900_v61 = vrot.slane %v898_v50, 5 }
  0x4c   : > { %v439_v63 = vsel %vm5719_vm3, 0, %v438_v53  ;;  %v593_v0 = vld [vmem:[%s5715_s20 + $0x34] sm:$0xf]  ;;  %816 = vst [vmem:[#allocation2 + $0x60] sm:$0xf] %v815_v62  ;;  %v757_v3 = vor.u32 %v755_v56, %v5780_v55  ;;  %v758_v4 = vrot.slane %v5780_v55, 4 }
  0x4d   : > { %v820_v2 = vld [vmem:[#allocation2 + $0x68] sm:$0xf]  ;;  %v5790_v5 = vrot.slane %v760_v57, 7  ;;  %440 = vst [vmem:[#allocation2 + $0x80] sm:$0x1] %v439_v63  ;;  %v442_v6 = vsel %vm5719_vm3, 0, %v441_v54  ;;  %v901_v13 = vor.u32 %v900_v61, %v897_v60 }
  0x4e   : > { %v821_v7 = vsel %vm5757_vm6, %v749_v52, %v820_v2  ;;  %443 = vst [vmem:[#allocation2 + $0x88] sm:$0x1] %v442_v6  ;;  %v768_v8 = vshrl.u32 %v591_v59, 16  ;;  %v771_v9 = vshll.u32 %v591_v59, 16  ;;  %v482_v10 = vld [vmem:[#allocation2 + $0x54] sm:$0x1] }
  0x4f   : > { %v485_v12 = vld [vmem:[#allocation2 + $0x5c] sm:$0x1]  ;;  %822 = vst [vmem:[#allocation2 + $0x68] sm:$0xf] %v821_v7  ;;  %v765_v14 = vor.u32 %v763_v58, %v5790_v5  ;;  %v826_v15 = vld [vmem:[#allocation2 + $0x70] sm:$0xf] }
  0x50   : > { %v776_v17 = vshrl.u32 %v593_v0, 16  ;;  %v779_v18 = vshll.u32 %v593_v0, 16  ;;  %v766_v19 = vrot.slane %v5790_v5, 4  ;;  %v827_v20 = vsel %vm5757_vm6, %v757_v3, %v826_v15  ;;  %v832_v21 = vld [vmem:[#allocation2 + $0x78] sm:$0xf]  ;;  %s4462_s26 = sshll.u32 %s365_s11, 6 }
  0x51   : > { %v5800_v22 = vrot.slane %v768_v8, 7  ;;  %v483_v23 = vsel %vm5732_vm5, 0, %v482_v10  ;;  %v5804_v24 = vld [vmem:[#allocation2 + $0x58] sm:$0xf]  ;;  %828 = vst [vmem:[#allocation2 + $0x70] sm:$0xf] %v827_v20  ;;  %v833_v25 = vsel %vm5757_vm6, %v765_v14, %v832_v21 }
  0x52   : > { %v5808_v26 = vrot.slane %v776_v17, 7  ;;  %484 = vst [vmem:[#allocation2 + $0x54] sm:$0x1] %v483_v23  ;;  %v486_v27 = vsel %vm5732_vm5, 0, %v485_v12  ;;  %v488_v28 = vld [vmem:[#allocation2 + $0x64] sm:$0x1]  ;;  %v4474_v32 = vcombine.low %v5773_v46, %v5804_v24 }
  0x53   : > { %v909_v29 = vshrl.u32 %v5804_v24, 16  ;;  %v912_v31 = vshll.u32 %v5804_v24, 16  ;;  %834 = vst [vmem:[#allocation2 + $0x78] sm:$0xf] %v833_v25  ;;  %v773_v33 = vor.u32 %v771_v9, %v5800_v22  ;;  %487 = vst [vmem:[#allocation2 + $0x5c] sm:$0x1] %v486_v27 }
  0x54   : > { %vm891_vm7 = vsmask.f32 3328  ;;  %vm892_vm8 = vsmask.f32 7440  ;;  %v491_v34 = vld [vmem:[#allocation2 + $0x6c] sm:$0x1]  ;;  %v781_v35 = vor.u32 %v779_v18, %v5808_v26  ;;  %1122 = vrot.lane.b32.xlu0 %v4474_v32, %s5558_s21 }
  0x55   : > { %v489_v37 = vsel %vm5732_vm5, 0, %v488_v28  ;;  %v492_v38 = vsel %vm5732_vm5, 0, %v491_v34  ;;  %v494_v39 = vld [vmem:[#allocation2 + $0x74] sm:$0x1]  ;;  %v497_v40 = vld [vmem:[#allocation2 + $0x7c] sm:$0x1]  ;;  %vm5871_vm9 = vmor %vm891_vm7, %vm892_vm8 }
  0x56   : > { %v911_v43 = vrot.slane %v909_v29, 4  ;;  %v5823_v44 = vrot.slane %v901_v13, 4  ;;  %v5825_v45 = vld [vmem:[#allocation2 + $0x60] sm:$0xf]  ;;  %490 = vst [vmem:[#allocation2 + $0x64] sm:$0x1] %v489_v37 }
  0x57   : > { %v838_v46 = vld [vmem:[#allocation2 + $0x80] sm:$0xf]  ;;  %493 = vst [vmem:[#allocation2 + $0x6c] sm:$0x1] %v492_v38  ;;  %v914_v47 = vrot.slane %v912_v31, 5  ;;  %v923_v48 = vshrl.u32 %v5825_v45, 16  ;;  %v4511_v2 = vcombine.low %v5804_v24, %v5825_v45 }
  0x58   : > { %v926_v49 = vshll.u32 %v5825_v45, 16  ;;  %v839_v50 = vsel %vm5757_vm6, %v773_v33, %v838_v46  ;;  %v844_v51 = vld [vmem:[#allocation2 + $0x88] sm:$0xf]  ;;  %v742_v54 = vrot.slane %v5765_v41, 4  ;;  %v495_v56 = vsel %vm5732_vm5, 0, %v494_v39  ;;  %s6725_s29 = scalar_lea.vmem [#allocation7], %s4462_s26 }
  0x59   : > { %v5831_v52 = vld [vmem:[#allocation2 + $0x68] sm:$0xf]  ;;  %840 = vst [vmem:[#allocation2 + $0x80] sm:$0xf] %v839_v50  ;;  %v845_v53 = vsel %vm5757_vm6, %v781_v35, %v844_v51  ;;  %v498_v57 = vsel %vm5732_vm5, 0, %v497_v40  ;;  %v750_v60 = vrot.slane %v5767_v42, 4  ;;  %v915_v8 = vor.u32 %v914_v47, %v911_v43 }
  0x5a   : > { %v937_v58 = vshrl.u32 %v5831_v52, 16  ;;  %v4475_v59 = vcombine.low %v5825_v45, %v5831_v52  ;;  %846 = vst [vmem:[#allocation2 + $0x88] sm:$0xf] %v845_v53  ;;  %v925_v61 = vrot.slane %v923_v48, 4  ;;  %496 = vst [vmem:[#allocation2 + $0x74] sm:$0x1] %v495_v56 }
  0x5b   : > { %499 = vst [vmem:[#allocation2 + $0x7c] sm:$0x1] %v498_v57  ;;  %v940_v62 = vshll.u32 %v5831_v52, 16  ;;  %v5845_v41 = vld [vmem:[#allocation2 + $0x70] sm:$0xf]  ;;  %v928_v0 = vrot.slane %v926_v49, 5 }
  0x5c   : > { %v873_v63 = vld [vmem:[#allocation2 + $0x54] sm:$0x1]  ;;  %1124 = vrot.lane.b32.xlu0 %v4475_v59, %s5558_s21  ;;  %v5850_v3 = vld [vmem:[#allocation2 + $0x78] sm:$0xf]  ;;  %v951_v6 = vshrl.u32 %v5845_v41, 16  ;;  %v954_v42 = vshll.u32 %v5845_v41, 16  ;;  %v4512_v9 = vcombine.low %v5831_v52, %v5845_v41 }
  0x5d   : > { %v811_v7 = vld [vmem:[#allocation2 + $0x5c] sm:$0x1]  ;;  %v965_v10 = vshrl.u32 %v5850_v3, 16  ;;  %v968_v12 = vshll.u32 %v5850_v3, 16  ;;  %v4476_v13 = vcombine.low %v5845_v41, %v5850_v3  ;;  %v904_v18 = vshll.u32 %v873_v63, 16  ;;  %s4697_s30 = sshll.u32 %s5638_s17, 10 }
  0x5e   : > { %v812_v14 = vsel %vm5719_vm3, %v734_v36, %v811_v7  ;;  %v953_v15 = vrot.slane %v951_v6, 4  ;;  %v956_v17 = vrot.slane %v954_v42, 5  ;;  %v817_v20 = vld [vmem:[#allocation2 + $0x64] sm:$0x1]  ;;  %v929_v21 = vor.u32 %v928_v0, %v925_v61  ;;  %v823_v28 = vld [vmem:[#allocation2 + $0x6c] sm:$0x1]  ;;  %s6741_s27 = scalar_lea.hbm %s6801_s10, %s4697_s30 }
  0x5f   : > { %813 = vst [vmem:[#allocation2 + $0x5c] sm:$0x1] %v812_v14  ;;  %v967_v23 = vrot.slane %v965_v10, 4  ;;  %v970_v25 = vrot.slane %v968_v12, 5  ;;  %1126 = vrot.lane.b32.xlu1 %v4476_v13, %s5558_s21  ;;  %v818_v27 = vsel %vm5719_vm3, %v742_v54, %v817_v20  ;;  %v939_v29 = vrot.slane %v937_v58, 4  ;;  %v5455_v36 = vld [vmem:[#allocation4 + $0x228] sm:$0xff]  }
  0x60   : > { %v500_v31 = vld [vmem:[#allocation2 + $0x84] sm:$0x1]  ;;  %v503_v16 = vld [vmem:[#allocation2 + $0x8c] sm:$0x1]  ;;  %v5867_v32 = vld [vmem:[#allocation2 + $0x80] sm:$0xf]  ;;  %v824_v35 = vsel %vm5719_vm3, %v750_v60, %v823_v28  ;;  %v957_v46 = vor.u32 %v956_v17, %v953_v15 }
  0x61   : > { %v5875_v33 = vrot.slane %v904_v18, 5  ;;  %v5877_v34 = vrot.slane %v915_v8, 4  ;;  %819 = vst [vmem:[#allocation2 + $0x64] sm:$0x1] %v818_v27  ;;  %v942_v37 = vrot.slane %v940_v62, 5  ;;  %v979_v39 = vshrl.u32 %v5867_v32, 16 }
  0x62   : > { %v5881_v38 = vld [vmem:[#allocation2 + $0x88] sm:$0xf]  ;;  %v982_v40 = vshll.u32 %v5867_v32, 16  ;;  %825 = vst [vmem:[#allocation2 + $0x6c] sm:$0x1] %v824_v35  ;;  %v971_v47 = vor.u32 %v970_v25, %v967_v23  ;;  %v930_v51 = vrot.slane %v929_v21, 4 }
  0x63   : > { %v829_v43 = vld [vmem:[#allocation2 + $0x74] sm:$0x1]  ;;  %v993_v48 = vshrl.u32 %v5881_v38, 16  ;;  %v996_v49 = vshll.u32 %v5881_v38, 16  ;;  %v4477_v50 = vcombine.low %v5867_v32, %v5881_v38  ;;  %v835_v53 = vld [vmem:[#allocation2 + $0x7c] sm:$0x1]  ;;  %v907_v54 = vsel %vm5871_vm9, %v5823_v44, %v5875_v33 }
  0x64   : > { %v943_v56 = vor.u32 %v942_v37, %v939_v29  ;;  %v830_v57 = vsel %vm5719_vm3, %v758_v4, %v829_v43  ;;  %v836_v58 = vsel %vm5719_vm3, %v766_v19, %v835_v53  ;;  %v393_v59 = vld [vmem:[#allocation2 + $0x8] sm:$0x1]  ;;  %v396_v60 = vld [vmem:[#allocation2 + $0x10] sm:$0x1]  ;;  %v580_v61 = vld [vmem:[%s5715_s20] sm:$0xf] }
  0x65   : > { %1128 = vrot.lane.b32.xlu1 %v4477_v50, %s5558_s21  ;;  %831 = vst [vmem:[#allocation2 + $0x74] sm:$0x1] %v830_v57  ;;  %837 = vst [vmem:[#allocation2 + $0x7c] sm:$0x1] %v836_v58  ;;  %v5903_v62 = vrot.slane %v957_v46, 4  ;;  %v5905_v44 = vrot.slane %v971_v47, 4 }
  0x66   : > { %v501_v55 = vsel %vm5732_vm5, 0, %v500_v31  ;;  %v504_v4 = vsel %vm5732_vm5, 0, %v503_v16  ;;  %v582_v5 = vld [vmem:[%s5715_s20 + $0x8] sm:$0xf]  ;;  %v875_v63 = vld [vmem:[#allocation2 + $0x5c] sm:$0x1] }
  0x67   : > { %v944_v19 = vrot.slane %v943_v56, 4  ;;  %502 = vst [vmem:[#allocation2 + $0x84] sm:$0x1] %v501_v55  ;;  %505 = vst [vmem:[#allocation2 + $0x8c] sm:$0x1] %v504_v4  ;;  %v774_v0 = vrot.slane %v5800_v22, 4 }
  0x68   : > { %v981_v6 = vrot.slane %v979_v39, 4  ;;  %v984_v42 = vrot.slane %v982_v40, 5  ;;  %v918_v7 = vshll.u32 %v875_v63, 16  ;;  %v5913_v8 = vrot.slane %v993_v48, 4  ;;  %v399_v13 = vld [vmem:[#allocation2 + $0x18] sm:$0x1] }
  0x69   : > { %v5915_v10 = vrot.slane %v996_v49, 5  ;;  %v394_v12 = vsel %vm5719_vm3, 0, %v393_v59  ;;  %v877_v14 = vld [vmem:[#allocation2 + $0x64] sm:$0x1]  ;;  %v397_v17 = vsel %vm5719_vm3, 0, %v396_v60  ;;  %v597_v18 = vshrl.u32 %v580_v61, 16 }
  0x6a   : > { %v985_v15 = vor.u32 %v984_v42, %v981_v6  ;;  %395 = vst [vmem:[#allocation2 + $0x8] sm:$0x1] %v394_v12  ;;  %v600_v22 = vshll.u32 %v580_v61, 16  ;;  %v920_v20 = vrot.slane %v918_v7, 5  ;;  %v879_v21 = vld [vmem:[#allocation2 + $0x6c] sm:$0x1] }
  0x6b   : > { %v932_v23 = vshll.u32 %v877_v14, 16  ;;  %v782_v25 = vrot.slane %v5808_v26, 4  ;;  %398 = vst [vmem:[#allocation2 + $0x10] sm:$0x1] %v397_v17  ;;  %v605_v27 = vshrl.u32 %v582_v5, 16  ;;  %v946_v29 = vshll.u32 %v879_v21, 16 }
  0x6c   : > { %v402_v28 = vld [vmem:[#allocation2 + $0x20] sm:$0x1]  ;;  %v999_v31 = vor.u32 %v5915_v10, %v5913_v8  ;;  %v5924_v16 = vrot.slane %v597_v18, 7  ;;  %v608_v33 = vshll.u32 %v582_v5, 16  ;;  %v584_v35 = vld [vmem:[%s5715_s20 + $0x10] sm:$0xf]  ;;  %v5930_v37 = vsel %vm5871_vm9, %v5877_v34, %v920_v20 }
  0x6d   : > { %v934_v39 = vrot.slane %v932_v23, 5  ;;  %v5932_v40 = vrot.slane %v985_v15, 4  ;;  %v5934_v26 = vrot.slane %v605_v27, 7  ;;  %v586_v43 = vld [vmem:[%s5715_s20 + $0x18] sm:$0xf]  ;;  %v4466_v46 = vcombine.low %v907_v54, %v5930_v37  ;;  %s4382_s12 = sshll.u32 %s6725_s29, 4  ;;  %s6743_s12 = int_to_ptr.vmem [resolvable:$true] %s4382_s12 }
  0x6e   : > { %v948_v47 = vrot.slane %v946_v29, 5  ;;  %v881_v48 = vld [vmem:[#allocation2 + $0x74] sm:$0x1]  ;;  %v883_v49 = vld [vmem:[#allocation2 + $0x7c] sm:$0x1]  ;;  %v602_v50 = vor.u32 %v600_v22, %v5924_v16  ;;  %v400_v53 = vsel %vm5719_vm3, 0, %v399_v13 }
  0x6f   : > { %v5943_v34 = vsel %vm5871_vm9, %v930_v51, %v934_v39  ;;  %v960_v56 = vshll.u32 %v881_v48, 16  ;;  %v974_v57 = vshll.u32 %v883_v49, 16  ;;  %v841_v58 = vld [vmem:[#allocation2 + $0x84] sm:$0x1]  ;;  %v847_v59 = vld [vmem:[#allocation2 + $0x8c] sm:$0x1]  ;;  %v610_v60 = vor.u32 %v608_v33, %v5934_v26  ;;  %1212 = vrot.lane.b32.xlu0 %v4466_v46, %s5558_s21  ;;  %4858 = vmatprep.mubr.msk.bf16.mxu0 %vm1020_vm10, %v4466_v46 }
  0x70   : > { %401 = vst [vmem:[#allocation2 + $0x18] sm:$0x1] %v400_v53  ;;  %v405_v54 = vld [vmem:[#allocation2 + $0x28] sm:$0x1]  ;;  %v5949_v61 = vsel %vm5871_vm9, %v944_v19, %v948_v47  ;;  %v842_v55 = vsel %vm5719_vm3, %v774_v0, %v841_v58  ;;  %v848_v51 = vsel %vm5719_vm3, %v782_v25, %v847_v59  ;;  %v403_v4 = vsel %vm5719_vm3, 0, %v402_v28  ;;  %s6750_s17 = scalar_lea.sflag [#allocation6], %s365_s11 }
  0x71   : > { %v408_v5 = vld [vmem:[#allocation2 + $0x30] sm:$0x1]  ;;  %v588_v63 = vld [vmem:[%s5715_s20 + $0x20] sm:$0xf]  ;;  %v5961_v6 = vcombine.low %v5943_v34, %v5949_v61  ;;  %v962_v42 = vrot.slane %v960_v56, 5  ;;  %v976_v19 = vrot.slane %v974_v57, 5 }
  0x72   : > { %843 = vst [vmem:[#allocation2 + $0x84] sm:$0x1] %v842_v55  ;;  %849 = vst [vmem:[#allocation2 + $0x8c] sm:$0x1] %v848_v51  ;;  %v679_v0 = vld [vmem:[#allocation2 + $0x8] sm:$0xf] }
  0x73   : > { %404 = vst [vmem:[#allocation2 + $0x20] sm:$0x1] %v403_v4  ;;  %v613_v7 = vshrl.u32 %v584_v35, 16  ;;  %v680_v12 = vsel %vm5757_vm6, %v602_v50, %v679_v0  ;;  %v685_v13 = vld [vmem:[#allocation2 + $0x10] sm:$0xf]  ;;  %v616_v14 = vshll.u32 %v584_v35, 16  ;;  %1214 = vrot.lane.b32.xlu1 %v5961_v6, %s5558_s21  ;;  %v5970_v18 = vsel %vm5871_vm9, %v5903_v62, %v962_v42 }
  0x74   : > { %v621_v15 = vshrl.u32 %v586_v43, 16  ;;  %v624_v17 = vshll.u32 %v586_v43, 16  ;;  %v5975_v22 = vsel %vm5871_vm9, %v5905_v44, %v976_v19  ;;  %681 = vst [vmem:[#allocation2 + $0x8] sm:$0xf] %v680_v12  ;;  %v686_v20 = vsel %vm5757_vm6, %v610_v60, %v685_v13  ;;  %v590_v23 = vld [vmem:[%s5715_s20 + $0x28] sm:$0xf] }
  0x75   : > { %v5979_v21 = vrot.slane %v613_v7, 7  ;;  %v411_v25 = vld [vmem:[#allocation2 + $0x38] sm:$0x1]  ;;  %v5984_v27 = vcombine.low %v5970_v18, %v5975_v22  ;;  %687 = vst [vmem:[#allocation2 + $0x10] sm:$0xf] %v686_v20  ;;  %v406_v44 = vsel %vm5719_vm3, 0, %v405_v54  ;;  %v4513_v4 = vcombine.low %v5850_v3, %v5867_v32 }
  0x76   : > { %v5986_v62 = vrot.slane %v621_v15, 7  ;;  %v409_v28 = vsel %vm5719_vm3, 0, %v408_v5  ;;  %v414_v29 = vld [vmem:[#allocation2 + $0x40] sm:$0x1]  ;;  %407 = vst [vmem:[#allocation2 + $0x28] sm:$0x1] %v406_v44  ;;  %v6219_v32 = vcombine.low %v5949_v61, %v5970_v18 }
  0x77   : > { %v618_v33 = vor.u32 %v616_v14, %v5979_v21  ;;  %410 = vst [vmem:[#allocation2 + $0x30] sm:$0x1] %v409_v28  ;;  %v629_v35 = vshrl.u32 %v588_v63, 16  ;;  %v632_v39 = vshll.u32 %v588_v63, 16  ;;  %v637_v43 = vshrl.u32 %v590_v23, 16  ;;  %1216 = vrot.lane.b32.xlu0 %v5984_v27, %s5558_s21  ;;  %v5374_v61 = vld [vmem:[#allocation4 + $0x80] sm:$0xff]  }
  0x78   : > { %v592_v46 = vld [vmem:[%s5715_s20 + $0x30] sm:$0xf]  ;;  %v626_v47 = vor.u32 %v624_v17, %v5986_v62  ;;  %v691_v48 = vld [vmem:[#allocation2 + $0x18] sm:$0xf]  ;;  %v640_v49 = vshll.u32 %v590_v23, 16  ;;  %v412_v50 = vsel %vm5719_vm3, 0, %v411_v25  ;;  %4994 = vmatprep.subr.bf16.mxu1 %v5374_v61 }
  0x79   : > { %v415_v53 = vsel %vm5719_vm3, 0, %v414_v29  ;;  %v692_v56 = vsel %vm5757_vm6, %v618_v33, %v691_v48  ;;  %v6003_v57 = vrot.slane %v629_v35, 7  ;;  %v6005_v58 = vrot.slane %v637_v43, 7  ;;  %413 = vst [vmem:[#allocation2 + $0x38] sm:$0x1] %v412_v50  ;;  %4995 = vmatpush3.bf16.msra.mxu1 %v5374_v61  ;;  %s5486_s28 = scalar_lea.vmem %s6743_s12, 1024 }
  0x7a   : > { %416 = vst [vmem:[#allocation2 + $0x40] sm:$0x1] %v415_v53  ;;  %v594_v59 = vld [vmem:[%s5715_s20 + $0x38] sm:$0xf]  ;;  %v645_v60 = vshrl.u32 %v592_v46, 16  ;;  %v1000_v63 = vrot.slane %v999_v31, 4  ;;  %p5487_p6 = scmp.ne.s32.totalorder %s6743_s12, %s5486_s28 }
  0x7b   : > { %v885_v54 = vld [vmem:[#allocation2 + $0x84] sm:$0x1]  ;;  %v887_v55 = vld [vmem:[#allocation2 + $0x8c] sm:$0x1]  ;;  %693 = vst [vmem:[#allocation2 + $0x18] sm:$0xf] %v692_v56  ;;  %v634_v7 = vor.u32 %v632_v39, %v6003_v57  ;;  %v642_v20 = vor.u32 %v640_v49, %v6005_v58 }
  0x7c   : > { %v697_v51 = vld [vmem:[#allocation2 + $0x20] sm:$0xf]  ;;  %v988_v5 = vshll.u32 %v885_v54, 16  ;;  %v1002_v42 = vshll.u32 %v887_v55, 16  ;;  %v856_v0 = vld [vmem:[#allocation2 + $0x8] sm:$0xf] }
  0x7d   : > { %v698_v19 = vsel %vm5757_vm6, %v626_v47, %v697_v51  ;;  %v6016_v12 = vrot.slane %v645_v60, 7  ;;  %v648_v13 = vshll.u32 %v592_v46, 16  ;;  %v858_v17 = vld [vmem:[#allocation2 + $0x10] sm:$0xf]  ;;  %v653_v23 = vshrl.u32 %v594_v59, 16  ;;  %p6828_p9 = scmp.ne.s32.totalorder %s6805_s23, 0 }
  0x7e   : > { %699 = vst [vmem:[#allocation2 + $0x20] sm:$0xf] %v698_v19  ;;  %v990_v14 = vrot.slane %v988_v5, 5  ;;  %v1004_v15 = vrot.slane %v1002_v42, 5  ;;  %v4488_v25 = vcombine.low %v856_v0, %v858_v17  ;;  %v1427_v8 = vshrl.u32 %v856_v0, 16 }
  0x7f   : > { %v1430_v10 = vshll.u32 %v856_v0, 16  ;;  %v703_v31 = vld [vmem:[#allocation2 + $0x28] sm:$0xf]  ;;  %v709_v44 = vld [vmem:[#allocation2 + $0x30] sm:$0xf]  ;;  %v650_v28 = vor.u32 %v648_v13, %v6016_v12  ;;  %v1441_v46 = vshrl.u32 %v858_v17, 16  ;;  %p5488_p10 = pnand %p5487_p6, %p6828_p9 }
  0x80   : > { %v6023_v29 = vsel %vm5871_vm9, %v5932_v40, %v990_v14  ;;  %v6027_v33 = vsel %vm5871_vm9, %v1000_v63, %v1004_v15  ;;  %v455_v35 = vld [vmem:[#allocation2 + $0xc] sm:$0x1]  ;;  %v458_v39 = vld [vmem:[#allocation2 + $0x14] sm:$0x1]  ;;  %v1444_v47 = vshll.u32 %v858_v17, 16  ;;  %1330 = vrot.lane.b32.xlu0 %v4488_v25, %s5558_s21  ;;  %v704_v48 = vsel %vm5757_vm6, %v634_v7, %v703_v31 }
  0x81   : > { %v6031_v43 = vcombine.low %v6023_v29, %v6027_v33  ;;  %v715_v49 = vld [vmem:[#allocation2 + $0x38] sm:$0xf]  ;;  %705 = vst [vmem:[#allocation2 + $0x28] sm:$0xf] %v704_v48  ;;  %v710_v50 = vsel %vm5757_vm6, %v642_v20, %v709_v44  ;;  %v6038_v53 = vrot.slane %v653_v23, 7  ;;  %v656_v56 = vshll.u32 %v594_v59, 16  ;;  %p5489_p12 = pneg %p5488_p10 }
  0x82   : > { %v860_v40 = vld [vmem:[#allocation2 + $0x18] sm:$0xf]  ;;  %v716_v60 = vsel %vm5757_vm6, %v650_v28, %v715_v49  ;;  %v6044_v54 = vrot.slane %v1427_v8, 4  ;;  %v6046_v55 = vrot.slane %v1430_v10, 5  ;;  %711 = vst [vmem:[#allocation2 + $0x30] sm:$0xf] %v710_v50 }
  0x83   : > { %1218 = vrot.lane.b32.xlu1 %v6031_v43, %s5558_s21  ;;  %717 = vst [vmem:[#allocation2 + $0x38] sm:$0xf] %v716_v60  ;;  %v721_v51 = vld [vmem:[#allocation2 + $0x40] sm:$0xf]  ;;  %v456_v5 = vsel %vm5732_vm5, 0, %v455_v35  ;;  %v459_v63 = vsel %vm5732_vm5, 0, %v458_v39  ;;  %v658_v42 = vor.u32 %v656_v56, %v6038_v53 }
  0x84   : > { %457 = vst [vmem:[#allocation2 + $0xc] sm:$0x1] %v456_v5  ;;  %460 = vst [vmem:[#allocation2 + $0x14] sm:$0x1] %v459_v63  ;;  %v461_v19 = vld [vmem:[#allocation2 + $0x1c] sm:$0x1] }
  0x85   : > { %v862_v59 = vld [vmem:[#allocation2 + $0x20] sm:$0xf]  ;;  %v464_v0 = vld [vmem:[#allocation2 + $0x24] sm:$0x1]  ;;  %v1455_v13 = vshrl.u32 %v860_v40, 16  ;;  %v1458_v14 = vshll.u32 %v860_v40, 16  ;;  %v722_v20 = vsel %vm5757_vm6, %v658_v42, %v721_v51 }
  0x86   : > { %v4489_v7 = vcombine.low %v860_v40, %v862_v59  ;;  %v1443_v15 = vrot.slane %v1441_v46, 4  ;;  %v1469_v17 = vshrl.u32 %v862_v59, 16  ;;  %v467_v23 = vld [vmem:[#allocation2 + $0x2c] sm:$0x1]  ;;  %v470_v25 = vld [vmem:[#allocation2 + $0x34] sm:$0x1]  ;;  %v1433_v46 = vor.u32 %v6046_v55, %v6044_v54 }
  0x87   : > { %v1446_v8 = vrot.slane %v1444_v47, 5  ;;  %v1472_v10 = vshll.u32 %v862_v59, 16  ;;  %723 = vst [vmem:[#allocation2 + $0x40] sm:$0xf] %v722_v20  ;;  %v462_v31 = vsel %vm5732_vm5, 0, %v461_v19  ;;  %v465_v44 = vsel %vm5732_vm5, 0, %v464_v0 }
  0x88   : > { %1332 = vrot.lane.b32.xlu1 %v4489_v7, %s5558_s21  ;;  %v6063_v28 = vld [vmem:[%s6792_s1 + $0x2] sm:$0x3]  ;;  %v603_v35 = vrot.slane %v5924_v16, 4  ;;  %v611_v39 = vrot.slane %v5934_v26, 4  ;;  %463 = vst [vmem:[#allocation2 + $0x1c] sm:$0x1] %v462_v31 }
  0x89   : > { %466 = vst [vmem:[#allocation2 + $0x24] sm:$0x1] %v465_v44  ;;  %5300 = vmatprep.subr.msk.bf16.mxu0 %vm1033_vm11, %v6063_v28  ;;  %v1457_v47 = vrot.slane %v1455_v13, 4  ;;  %v1460_v48 = vrot.slane %v1458_v14, 5  ;;  %v864_v49 = vld [vmem:[#allocation2 + $0x28] sm:$0xf]  ;;  %v1447_v42 = vor.u32 %v1446_v8, %v1443_v15 }
  0x8a   : > { %v468_v40 = vsel %vm5732_vm5, 0, %v467_v23  ;;  %v471_v50 = vsel %vm5732_vm5, 0, %v470_v25  ;;  %v6075_v16 = vrot.slane %v1469_v17, 4  ;;  %v866_v26 = vld [vmem:[#allocation2 + $0x30] sm:$0xf]  ;;  %v1483_v56 = vshrl.u32 %v864_v49, 16 }
  0x8b   : > { %v1486_v60 = vshll.u32 %v864_v49, 16  ;;  %v619_v54 = vrot.slane %v5979_v21, 4  ;;  %469 = vst [vmem:[#allocation2 + $0x2c] sm:$0x1] %v468_v40  ;;  %472 = vst [vmem:[#allocation2 + $0x34] sm:$0x1] %v471_v50  ;;  %v4490_v51 = vcombine.low %v864_v49, %v866_v26  ;;  %v1461_v31 = vor.u32 %v1460_v48, %v1457_v47 }
  0x8c   : > { %v1474_v55 = vrot.slane %v1472_v10, 5  ;;  %v1497_v5 = vshrl.u32 %v866_v26, 16  ;;  %v868_v63 = vld [vmem:[#allocation2 + $0x38] sm:$0xf]  ;;  %v682_v59 = vld [vmem:[#allocation2 + $0xc] sm:$0x1] }
  0x8d   : > { %v473_v19 = vld [vmem:[#allocation2 + $0x3c] sm:$0x1]  ;;  %v1500_v0 = vshll.u32 %v866_v26, 16  ;;  %v1511_v7 = vshrl.u32 %v868_v63, 16  ;;  %v683_v13 = vsel %vm5719_vm3, %v603_v35, %v682_v59  ;;  %v688_v14 = vld [vmem:[#allocation2 + $0x14] sm:$0x1]  ;;  %1334 = vrot.lane.b32.xlu0 %v4490_v51, %s5558_s21 }
  0x8e   : > { %v627_v17 = vrot.slane %v5986_v62, 4  ;;  %v1485_v20 = vrot.slane %v1483_v56, 4  ;;  %v1488_v23 = vrot.slane %v1486_v60, 5  ;;  %v1514_v21 = vshll.u32 %v868_v63, 16  ;;  %684 = vst [vmem:[#allocation2 + $0xc] sm:$0x1] %v683_v13 }
  0x8f   : > { %v689_v25 = vsel %vm5719_vm3, %v611_v39, %v688_v14  ;;  %v476_v10 = vld [vmem:[#allocation2 + $0x44] sm:$0x1]  ;;  %v870_v15 = vld [vmem:[#allocation2 + $0x40] sm:$0xf]  ;;  %v6084_v8 = vrot.slane %v1433_v46, 4  ;;  %v635_v44 = vrot.slane %v6003_v57, 4  ;;  %v1475_v39 = vor.u32 %v1474_v55, %v6075_v16 }
  0x90   : > { %690 = vst [vmem:[#allocation2 + $0x14] sm:$0x1] %v689_v25  ;;  %v643_v62 = vrot.slane %v6005_v58, 4  ;;  %v6088_v35 = vrot.slane %v1497_v5, 4  ;;  %v4491_v49 = vcombine.low %v868_v63, %v870_v15  ;;  %v6090_v40 = vrot.slane %v1447_v42, 4 }
  0x91   : > { %v694_v50 = vld [vmem:[#allocation2 + $0x1c] sm:$0x1]  ;;  %v700_v26 = vld [vmem:[#allocation2 + $0x24] sm:$0x1]  ;;  %v6093_v56 = vrot.slane %v1500_v0, 5  ;;  %v474_v57 = vsel %vm5732_vm5, 0, %v473_v19  ;;  %v1489_v5 = vor.u32 %v1488_v23, %v1485_v20 }
  0x92   : > { %v695_v46 = vsel %vm5719_vm3, %v619_v54, %v694_v50  ;;  %v701_v47 = vsel %vm5719_vm3, %v627_v17, %v700_v26  ;;  %v444_v58 = vld [vmem:[#allocation2 + $0x90] sm:$0x1]  ;;  %v595_v48 = vld [vmem:[%s5715_s20 + $0x3c] sm:$0xf]  ;;  %v6102_v60 = vrot.slane %v1511_v7, 4  ;;  %v6104_v51 = vrot.slane %v1514_v21, 5  ;;  %1336 = vrot.lane.b32.xlu1 %v4491_v49, %s5558_s21 }
  0x93   : > { %696 = vst [vmem:[#allocation2 + $0x1c] sm:$0x1] %v695_v46  ;;  %702 = vst [vmem:[#allocation2 + $0x24] sm:$0x1] %v701_v47  ;;  %v706_v16 = vld [vmem:[#allocation2 + $0x2c] sm:$0x1] }
  0x94   : > { %v712_v55 = vld [vmem:[#allocation2 + $0x34] sm:$0x1]  ;;  %475 = vst [vmem:[#allocation2 + $0x3c] sm:$0x1] %v474_v57  ;;  %v6107_v54 = vrot.slane %v1461_v31, 4  ;;  %v707_v63 = vsel %vm5719_vm3, %v635_v44, %v706_v16  ;;  %v477_v42 = vsel %vm5732_vm5, 0, %v476_v10  ;;  %v1503_v16 = vor.u32 %v6093_v56, %v6088_v35 }
  0x95   : > { %v713_v59 = vsel %vm5719_vm3, %v643_v62, %v712_v55  ;;  %v890_v19 = vld [vmem:[%s6792_s1] sm:$0x3]  ;;  %v1525_v0 = vshrl.u32 %v870_v15, 16  ;;  %v1528_v7 = vshll.u32 %v870_v15, 16  ;;  %708 = vst [vmem:[#allocation2 + $0x2c] sm:$0x1] %v707_v63 }
  0x96   : > { %714 = vst [vmem:[#allocation2 + $0x34] sm:$0x1] %v713_v59  ;;  %478 = vst [vmem:[#allocation2 + $0x44] sm:$0x1] %v477_v42  ;;  %v506_v13 = vld [vmem:[#allocation2 + $0x94] sm:$0x1] }
  0x97   : > { %v857_v14 = vld [vmem:[#allocation2 + $0xc] sm:$0x1]  ;;  %v1476_v17 = vrot.slane %v1475_v39, 4  ;;  %v445_v20 = vsel %vm5719_vm3, 0, %v444_v58  ;;  %v784_v23 = vshrl.u32 %v595_v48, 16  ;;  %v1035_v21 = vsel %vm1033_vm11, %v6063_v28, 0 }
  0x98   : > { %v859_v25 = vld [vmem:[#allocation2 + $0x14] sm:$0x1]  ;;  %v1436_v10 = vshll.u32 %v857_v14, 16  ;;  %v6122_v31 = vrot.slane %v1489_v5, 4  ;;  %v651_v44 = vrot.slane %v6016_v12, 4  ;;  %v787_v15 = vshll.u32 %v595_v48, 16  ;;  %4857 = vmatpush3.bf16.msra.mxu0 %v1035_v21 }
  0x99   : > { %446 = vst [vmem:[#allocation2 + $0x90] sm:$0x1] %v445_v20  ;;  %v1450_v62 = vshll.u32 %v859_v25, 16  ;;  %v786_v49 = vrot.slane %v784_v23, 7  ;;  %5301 = vmatprep.subr.msk.bf16.mxu0 %vm1033_vm11, %v890_v19  ;;  %v1143_v50 = vsel %vm1033_vm11, %v890_v19, 0  ;;  %v507_v26 = vsel %vm5732_vm5, 0, %v506_v13 }
  0x9a   : > { %v1527_v39 = vrot.slane %v1525_v0, 4  ;;  %v1530_v28 = vrot.slane %v1528_v7, 5  ;;  %v1438_v46 = vrot.slane %v1436_v10, 5  ;;  %v659_v47 = vrot.slane %v6038_v53, 4  ;;  %v6133_v12 = vld [vmem:[%s6792_s1 + $0x4] sm:$0x3] }
  0x9b   : > { %508 = vst [vmem:[#allocation2 + $0x94] sm:$0x1] %v507_v26  ;;  %v1452_v57 = vrot.slane %v1450_v62, 5  ;;  %v861_v58 = vld [vmem:[#allocation2 + $0x1c] sm:$0x1]  ;;  %4859 = vmatmul.mubr.msk.bf16.vlgmr.msra.gmra.mrb[0].mxu0 %vm1020_vm10, %v5961_v6  ;;  %v790_v11 = vrot.slane %v786_v49, 4  ;;  %v789_v59 = vor.u32 %v787_v15, %v786_v49 }
  0x9c   : > { %v863_v48 = vld [vmem:[#allocation2 + $0x24] sm:$0x1]  ;;  %v1439_v53 = vsel %vm5871_vm9, %v6084_v8, %v1438_v46  ;;  %v1464_v55 = vshll.u32 %v861_v58, 16  ;;  %v718_v63 = vld [vmem:[#allocation2 + $0x3c] sm:$0x1]  ;;  %4867 = vmatpush3.bf16.msra.mxu0 %v1143_v50  ;;  %4862 = vmatprep.mubr.msk.bf16.mxu0 %vm1020_vm10, %v5984_v27  ;;  %v1517_v8 = vor.u32 %v6104_v51, %v6102_v60  ;;  %v1504_v14 = vrot.slane %v1503_v16, 4 }
  0x9d   : > { %v1478_v5 = vshll.u32 %v863_v48, 16  ;;  %v1453_v35 = vsel %vm5871_vm9, %v6090_v40, %v1452_v57  ;;  %v865_v56 = vld [vmem:[#allocation2 + $0x2c] sm:$0x1]  ;;  %v867_v42 = vld [vmem:[#allocation2 + $0x34] sm:$0x1]  ;;  %v719_v6 = vsel %vm5719_vm3, %v651_v44, %v718_v63  ;;  %5302 = vmatprep.subr.msk.bf16.mxu0 %vm1033_vm11, %v6133_v12  ;;  %v1531_v50 = vor.u32 %v1530_v28, %v1527_v39  ;;  %s5559_s20 = smov [#allocation7]  }
  0x9e   : > { %v724_v19 = vld [vmem:[#allocation2 + $0x44] sm:$0x1]  ;;  %v6153_v0 = vcombine.low %v1439_v53, %v1453_v35  ;;  %v1466_v7 = vrot.slane %v1464_v55, 5  ;;  %v1492_v13 = vshll.u32 %v865_v56, 16  ;;  %720 = vst [vmem:[#allocation2 + $0x3c] sm:$0x1] %v719_v6  ;;  %v6199_v35 = vcombine.low %v5930_v37, %v5943_v34 }
  0x9f   : > { %v1480_v27 = vrot.slane %v1478_v5, 5  ;;  %v1506_v40 = vshll.u32 %v867_v42, 16  ;;  %v725_v20 = vsel %vm5719_vm3, %v659_v47, %v724_v19  ;;  %v1518_v15 = vrot.slane %v1517_v8, 4  ;;  %v4487_v34 = vld [vmem:[%s6792_s1 + $0x6] sm:$0x3] }
  0xa0   : > { %v850_v23 = vld [vmem:[#allocation2 + $0x90] sm:$0xf]  ;;  %1642 = vrot.lane.b32.xlu0 %v6153_v0, %s5558_s21  ;;  %v1467_v60 = vsel %vm5871_vm9, %v6107_v54, %v1466_v7  ;;  %v1494_v21 = vrot.slane %v1492_v13, 5  ;;  %726 = vst [vmem:[#allocation2 + $0x44] sm:$0x1] %v725_v20  ;;  %v1532_v39 = vrot.slane %v1531_v50, 4 }
  0xa1   : > { %v1481_v51 = vsel %vm5871_vm9, %v1476_v17, %v1480_v27  ;;  %v851_v25 = vsel %vm5757_vm6, %v789_v59, %v850_v23  ;;  %v1508_v44 = vrot.slane %v1506_v40, 5  ;;  %v528_v18 = vld [vmem:[#allocation3 + $0x18] sm:$0x1]  ;;  %v1351_v19 = vsel %vm1033_vm11, %v4487_v34, 0  ;;  %v4496_v7 = vld [vmem:[%s6792_s1 + $0x8] sm:$0x3] }
  0xa2   : > { %v6166_v10 = vcombine.low %v1467_v60, %v1481_v51  ;;  %852 = vst [vmem:[#allocation2 + $0x90] sm:$0xf] %v851_v25  ;;  %v853_v62 = vld [vmem:[#allocation2 + $0x94] sm:$0x1]  ;;  %v1495_v49 = vsel %vm5871_vm9, %v6122_v31, %v1494_v21  ;;  %v1565_v20 = vsel %vm1033_vm11, %v4496_v7, 0  ;;  %vm2200_vm15 = vcmask 1043456  }
  0xa3   : > { %v854_v54 = vsel %vm5719_vm3, %v790_v11, %v853_v62  ;;  %v1509_v30 = vsel %vm5871_vm9, %v1504_v14, %v1508_v44  ;;  %4863 = vmatmul.mubr.msk.bf16.gmra.mrb[4].mxu0 %vm1020_vm10, %v6031_v43  ;;  %v4505_v23 = vld [vmem:[%s6792_s1 + $0xa] sm:$0x3]  ;;  %v4510_v25 = vld [vmem:[%s6792_s1 + $0xc] sm:$0x3]  ;;  %v4519_v50 = vld [vmem:[%s6792_s1 + $0xe] sm:$0x3] }
  0xa4   : > { %1644 = vrot.lane.b32.xlu1 %v6166_v10, %s5558_s21  ;;  %855 = vst [vmem:[#allocation2 + $0x94] sm:$0x1] %v854_v54  ;;  %v6179_v17 = vcombine.low %v1495_v49, %v1509_v30  ;;  %v1663_v21 = vsel %vm1033_vm11, %v4505_v23, 0  ;;  %v1767_v62 = vsel %vm1033_vm11, %v4510_v25, 0  ;;  %vm2701_vm0 = vcmask 1042432   ;;  %vm6398_vm2 = vmand %vm2200_vm15, %vm450_vm4 }
  0xa5   : > { %v869_v26 = vld [vmem:[#allocation2 + $0x3c] sm:$0x1]  ;;  %vm2702_vm1 = vcmask 1046532  }
  0xa6   : > { %1646 = vrot.lane.b32.xlu0 %v6179_v17, %s5558_s21  ;;  %v1520_v31 = vshll.u32 %v869_v26, 16  ;;  %vm6423_vm3 = vmor %vm2701_vm0, %vm2702_vm1 }
  0xa7   : > { %v871_v1 = vld [vmem:[#allocation2 + $0x44] sm:$0x1] }
  0xa8   : > { %v1522_v28 = vrot.slane %v1520_v31, 5  ;;  %v1534_v46 = vshll.u32 %v871_v1, 16  ;;  %v1876_v31 = vsel %vm1033_vm11, %v4519_v50, 0  ;;  %v4528_v1 = vld [vmem:[%s6792_s1 + $0x10] sm:$0x3] }
  0xa9   : > { %v888_v47 = vld [vmem:[#allocation2 + $0x90] sm:$0xf] }
  0xaa   : > { %v1843_v57 = vshrl.u32 %v888_v47, 16  ;;  %v1846_v58 = vshll.u32 %v888_v47, 16  ;;  %v1523_v48 = vsel %vm5871_vm9, %v1518_v15, %v1522_v28  ;;  %v1536_v16 = vrot.slane %v1534_v46, 5  ;;  %1746 = vrot.lane.b32.xlu0 %v4511_v2, %s5558_s21 }
  0xab   : > { %v889_v43 = vld [vmem:[#allocation2 + $0x94] sm:$0x1]  ;;  %v6207_v2 = vcombine.low %v5975_v22, %v6023_v29  ;;  %v4514_v3 = vcombine.low %v5881_v38, %v888_v47  ;;  %v559_v22 = vld [vmem:[#allocation3 + $0x1c] sm:$0x1]  ;;  %v1974_v46 = vsel %vm1033_vm11, %v4528_v1, 0 }
  0xac   : > { %v1845_v11 = vrot.slane %v1843_v57, 4  ;;  %v1848_v53 = vrot.slane %v1846_v58, 5  ;;  %v1537_v55 = vsel %vm5871_vm9, %v1532_v39, %v1536_v16  ;;  %v1852_v59 = vshll.u32 %v889_v43, 16  ;;  %v5375_v16 = vld [vmem:[#allocation4 + $0x88] sm:$0xff]   ;;  %v5376_v43 = vld [vmem:[#allocation4 + $0x40] sm:$0xff]  }
  0xad   : > { %v6191_v5 = vcombine.low %v1523_v48, %v1537_v55  ;;  %v560_v56 = vsel %vm6247_vm14, 0, %v559_v22  ;;  %4996 = vmatprep.subr.bf16.mxu1 %v5375_v16  ;;  %v553_v55 = vld [vmem:[#allocation3 + $0xc] sm:$0x1] }
  0xae   : > { %v1849_v63 = vor.u32 %v1848_v53, %v1845_v11  ;;  %1750 = vrot.lane.b32.xlu0 %v4513_v4, %s5558_s21  ;;  %v1854_v45 = vrot.slane %v1852_v59, 5  ;;  %561 = vst [vmem:[#allocation3 + $0x1c] sm:$0x1] %v560_v56  ;;  %4997 = vmatpush3.bf16.msra.mxu1 %v5375_v16  ;;  %v5377_v11 = vld [vmem:[#allocation4 + $0x90] sm:$0xff]   ;;  %v522_v53 = vld [vmem:[#allocation3 + $0x8] sm:$0x1] }
  0xaf   : > { %1648 = vrot.lane.b32.xlu1 %v6191_v5, %s5558_s21  ;;  %v554_v59 = vsel %vm6247_vm14, 0, %v553_v55  ;;  %4998 = vmatprep.subr.bf16.mxu1 %v5377_v11  ;;  %v543_v56 = vld [vmem:[#allocation3 + $0x40] sm:$0x1] }
  0xb0   : > { %v1850_v24 = vrot.slane %v1849_v63, 4  ;;  %v523_v63 = vsel %vm6239_vm13, 0, %v522_v53  ;;  %555 = vst [vmem:[#allocation3 + $0xc] sm:$0x1] %v554_v59 }
  0xb1   : > { %524 = vst [vmem:[#allocation3 + $0x8] sm:$0x1] %v523_v63 }
  0xb2   : > { %1953 = vrot.lane.b32.xlu0 %v6199_v35, %s5558_s21  ;;  %v1855_v37 = vsel %vm5871_vm9, %v1850_v24, %v1854_v45  ;;  %v562_v24 = vld [vmem:[#allocation3 + $0x24] sm:$0x1]  ;;  %4999 = vmatpush3.bf16.msra.mxu1 %v5377_v11 }
  0xb3   : > { %1748 = vrot.lane.b32.xlu1 %v4512_v9, %s5558_s21  ;;  %v6226_v52 = vcombine.low %v6027_v33, %v1855_v37  ;;  %v1233_v9 = vsel %vm1033_vm11, %v6133_v12, 0  ;;  %v529_v33 = vsel %vm6239_vm13, 0, %v528_v18  ;;  %v534_v18 = vld [vmem:[#allocation3 + $0x28] sm:$0x1] }
  0xb4   : > { %530 = vst [vmem:[#allocation3 + $0x18] sm:$0x1] %v529_v33  ;;  %v535_v22 = vsel %vm6239_vm13, 0, %v534_v18  ;;  %v565_v33 = vld [vmem:[#allocation3 + $0x2c] sm:$0x1] }
  0xb5   : > { %536 = vst [vmem:[#allocation3 + $0x28] sm:$0x1] %v535_v22 }
  0xb6   : > { %1957 = vrot.lane.b32.xlu0 %v6207_v2, %s5558_s21 }
  0xb7   : > { %1752 = vrot.lane.b32.xlu1 %v4514_v3, %s5558_s21  ;;  %v525_v3 = vld [vmem:[#allocation3 + $0x10] sm:$0x1] }
  0xb8   : > { %v526_v37 = vsel %vm6239_vm13, 0, %v525_v3 }
  0xb9   : > { %527 = vst [vmem:[#allocation3 + $0x10] sm:$0x1] %v526_v37 }
  0xbb   : > { %1955 = vrot.lane.b32.xlu1 %v6219_v32, %s5558_s21 }
  0xbf   : > { %1959 = vrot.lane.b32.xlu1 %v6226_v52, %s5558_s21  ;;  %s5490_s21 = sshll.u32 %s5559_s20, 4  ;;  %s5491_s21 = int_to_ptr.vmem [resolvable:$false] %s5490_s21 }
  0xc0   : > { %s5492_s26 = scalar_lea.vmem %s5491_s21, 2048  ;;  %p5493_p2 = scmp.lt.s32.totalorder %s6743_s12, %s5491_s21 }
  0xc1   : > { %p5494_p3 = scmp.lt.s32.totalorder %s5492_s26, %s5486_s28 }
  0xc3   : > { %p5495_p4 = por %p5494_p3, %p5493_p2 }
  0xc5   : > { %p5496_p7 = pnand %p5495_p4, %p5489_p12 }
  0xc6   : > { %v1123_v41 = vpop.permute.xlu0 %1122 }
  0xc7   : > { %4868 = vmatprep.mubr.msk.bf16.mxu0 %vm1020_vm10, %v1123_v41  ;;  %v5378_v41 = vld [vmem:[#allocation4 + $0x48] sm:$0xff]  }
  0xce   : > { %v1125_v38 = vpop.permute.xlu0 %1124 }
  0xcf   : > { %4869 = vmatmul.mubr.msk.bf16.vlgmr.msra.gmra.mrb[0].mxu0 %vm1020_vm10, %v1125_v38 }
  0xd0   : > { %4877 = vmatpush3.bf16.msra.mxu0 %v1233_v9  ;;  %v540_v9 = vld [vmem:[#allocation3 + $0x38] sm:$0x1] }
  0xd1   : > { %v1127_v4 = vpop.permute.xlu1 %1126  ;;  %5303 = vmatprep.subr.msk.bf16.mxu0 %vm1033_vm11, %v4487_v34  ;;  %v541_v38 = vsel %vm6239_vm13, 0, %v540_v9  ;;  %v571_v34 = vld [vmem:[#allocation3 + $0x3c] sm:$0x1] }
  0xd2   : > { %4872 = vmatprep.mubr.msk.bf16.mxu0 %vm1020_vm10, %v1127_v4  ;;  %542 = vst [vmem:[#allocation3 + $0x38] sm:$0x1] %v541_v38  ;;  %v572_v61 = vsel %vm6247_vm14, 0, %v571_v34  ;;  %v5379_v4 = vld [vmem:[#allocation4 + $0x98] sm:$0xff]  }
  0xd3   : > { %573 = vst [vmem:[#allocation3 + $0x3c] sm:$0x1] %v572_v61  ;;  %5000 = vmatprep.subr.bf16.mxu1 %v5379_v4 }
  0xd4   : > { %5001 = vmatpush3.bf16.msra.mxu1 %v5379_v4 }
  0xd7   : > { %v1129_v42 = vpop.permute.xlu1 %1128 }
  0xd8   : > { %4873 = vmatmul.mubr.msk.bf16.gmra.mrb[4].mxu0 %vm1020_vm10, %v1129_v42  ;;  %v574_v42 = vld [vmem:[#allocation3 + $0x44] sm:$0x1] }
  0xe1   : > { %v1213_v6 = vpop.permute.xlu0 %1212 }
  0xe2   : > { %4878 = vmatprep.mubr.msk.bf16.mxu0 %vm1020_vm10, %v1213_v6  ;;  %v566_v6 = vsel %vm6247_vm14, 0, %v565_v33 }
  0xe3   : > { %567 = vst [vmem:[#allocation3 + $0x2c] sm:$0x1] %v566_v6 }
  0xe5   : > { %v1215_v8 = vpop.permute.xlu1 %1214 }
  0xe6   : > { %4879 = vmatmul.mubr.msk.bf16.vlgmr.msra.gmra.mrb[0].mxu0 %vm1020_vm10, %v1215_v8  ;;  %v575_v8 = vsel %vm6247_vm14, 0, %v574_v42 }
  0xe7   : > { %4887 = vmatpush3.bf16.msra.mxu0 %v1351_v19  ;;  %v544_v19 = vsel %vm6239_vm13, 0, %v543_v56  ;;  %576 = vst [vmem:[#allocation3 + $0x44] sm:$0x1] %v575_v8 }
  0xe8   : > { %5304 = vmatprep.subr.msk.bf16.mxu0 %vm1033_vm11, %v4496_v7  ;;  %v5380_v7 = vld [vmem:[#allocation4 + $0x50] sm:$0xff]   ;;  %545 = vst [vmem:[#allocation3 + $0x40] sm:$0x1] %v544_v19 }
  0xe9   : > { %v1217_v27 = vpop.permute.xlu0 %1216 }
  0xea   : > { %4882 = vmatprep.mubr.msk.bf16.mxu0 %vm1020_vm10, %v1217_v27  ;;  %v5381_v27 = vld [vmem:[#allocation4 + $0xa0] sm:$0xff]  }
  0xeb   : > { %5002 = vmatprep.subr.bf16.mxu1 %v5381_v27 }
  0xec   : > { %5003 = vmatpush3.bf16.msra.mxu1 %v5381_v27 }
  0xf2   : > { %v1331_v13 = vpop.permute.xlu0 %1330 }
  0xf5   : > { %v1219_v14 = vpop.permute.xlu1 %1218 }
  0xf6   : > { %4883 = vmatmul.mubr.msk.bf16.gmra.mrb[4].mxu0 %vm1020_vm10, %v1219_v14  ;;  %v519_v14 = vld [vmem:[#allocation3] sm:$0x1] }
  0xf7   : > { %4888 = vmatprep.mubr.msk.bf16.mxu0 %vm1020_vm10, %v1331_v13  ;;  %v5382_v13 = vld [vmem:[#allocation4 + $0x58] sm:$0xff]  }
  0xfa   : > { %v1333_v40 = vpop.permute.xlu1 %1332 }
  0xfe   : > { %4889 = vmatmul.mubr.msk.bf16.vlgmr.msra.gmra.mrb[0].mxu0 %vm1020_vm10, %v1333_v40  ;;  %v550_v40 = vld [vmem:[#allocation3 + $0x4] sm:$0x1] }
  0xff   : > { %4897 = vmatpush3.bf16.msra.mxu0 %v1565_v20  ;;  %v1335_v60 = vpop.permute.xlu0 %1334  ;;  %v537_v20 = vld [vmem:[#allocation3 + $0x30] sm:$0x1] }
 0x100   : > { %4892 = vmatprep.mubr.msk.bf16.mxu0 %vm1020_vm10, %v1335_v60  ;;  %5305 = vmatprep.subr.msk.bf16.mxu0 %vm1033_vm11, %v4505_v23  ;;  %v568_v23 = vld [vmem:[#allocation3 + $0x34] sm:$0x1]  ;;  %v538_v60 = vsel %vm6239_vm13, 0, %v537_v20 }
 0x101   : > { %539 = vst [vmem:[#allocation3 + $0x30] sm:$0x1] %v538_v60 }
 0x104   : > { %v1337_v51 = vpop.permute.xlu1 %1336 }
 0x106   : > { %4893 = vmatmul.mubr.msk.bf16.gmra.mrb[4].mxu0 %vm1020_vm10, %v1337_v51  ;;  %v569_v51 = vsel %vm6247_vm14, 0, %v568_v23 }
 0x107   : > { %4898 = vmatprep.mubr.msk.bf16.mxu0 %vm1020_vm10, %v6153_v0  ;;  %570 = vst [vmem:[#allocation3 + $0x34] sm:$0x1] %v569_v51 }
 0x10e   : > { %4899 = vmatmul.mubr.msk.bf16.vlgmr.msra.gmra.mrb[0].mxu0 %vm1020_vm10, %v6166_v10 }
 0x10f   : > { %4907 = vmatpush3.bf16.msra.mxu0 %v1663_v21  ;;  %4902 = vmatprep.mubr.msk.bf16.mxu0 %vm1020_vm10, %v6179_v17  ;;  %v5383_v21 = vld [vmem:[#allocation4 + $0xa8] sm:$0xff]  }
 0x110   : > { %5306 = vmatprep.subr.msk.bf16.mxu0 %vm1033_vm11, %v4510_v25  ;;  %v520_v25 = vsel %vm6239_vm13, 0, %v519_v14  ;;  %5004 = vmatprep.subr.bf16.mxu1 %v5383_v21  ;;  %v2214_v14 = vld [vmem:[#allocation3 + $0x18] sm:$0xf] }
 0x111   : > { %521 = vst [vmem:[#allocation3] sm:$0x1] %v520_v25  ;;  %5005 = vmatpush3.bf16.msra.mxu1 %v5383_v21 }
 0x112   : > { %v1643_v44 = vpop.permute.xlu0 %1642 }
 0x116   : > { %4903 = vmatmul.mubr.msk.bf16.gmra.mrb[4].mxu0 %vm1020_vm10, %v6191_v5  ;;  %v1645_v15 = vpop.permute.xlu1 %1644 }
 0x117   : > { %4908 = vmatprep.mubr.msk.bf16.mxu0 %vm1020_vm10, %v1643_v44  ;;  %v551_v44 = vsel %vm6247_vm14, 0, %v550_v40  ;;  %v2217_v40 = vld [vmem:[#allocation3 + $0x1c] sm:$0x1] }
 0x118   : > { %v1647_v49 = vpop.permute.xlu0 %1646  ;;  %552 = vst [vmem:[#allocation3 + $0x4] sm:$0x1] %v551_v44  ;;  %v2202_v44 = vld [vmem:[#allocation3 + $0x8] sm:$0xf] }
 0x11c   : > { %v1747_v30 = vpop.permute.xlu0 %1746 }
 0x11e   : > { %4909 = vmatmul.mubr.msk.bf16.vlgmr.msra.gmra.mrb[0].mxu0 %vm1020_vm10, %v1645_v15  ;;  %v5384_v15 = vld [vmem:[#allocation4 + $0x60] sm:$0xff]  }
 0x11f   : > { %4917 = vmatpush3.bf16.msra.mxu0 %v1767_v62  ;;  %4912 = vmatprep.mubr.msk.bf16.mxu0 %vm1020_vm10, %v1647_v49  ;;  %v5385_v62 = vld [vmem:[#allocation4 + $0xb0] sm:$0xff]   ;;  %v5386_v49 = vld [vmem:[#allocation4 + $0x68] sm:$0xff]  }
 0x120   : > { %5307 = vmatprep.subr.msk.bf16.mxu0 %vm1033_vm11, %v4519_v50  ;;  %v1751_v39 = vpop.permute.xlu0 %1750  ;;  %5006 = vmatprep.subr.bf16.mxu1 %v5385_v62  ;;  %v5387_v50 = vld [vmem:[#allocation4 + $0xb8] sm:$0xff]  }
 0x121   : > { %v1649_v54 = vpop.permute.xlu1 %1648  ;;  %5007 = vmatpush3.bf16.msra.mxu1 %v5385_v62 }
 0x122   : > { %5008 = vmatprep.subr.bf16.mxu1 %v5387_v50 }
 0x124   : > { %v1954_v47 = vpop.permute.xlu0 %1953 }
 0x125   : > { %v1749_v26 = vpop.permute.xlu1 %1748  ;;  %5009 = vmatpush3.bf16.msra.mxu1 %v5387_v50 }
 0x126   : > { %4913 = vmatmul.mubr.msk.bf16.gmra.mrb[4].mxu0 %vm1020_vm10, %v1649_v54  ;;  %v5388_v54 = vld [vmem:[#allocation4 + $0x70] sm:$0xff]  }
 0x127   : > { %4918 = vmatprep.mubr.msk.bf16.mxu0 %vm1020_vm10, %v1747_v30  ;;  %v6348_v30 = vld [vmem:[#allocation4 + $0xc0] sm:$0xff]  }
 0x128   : > { %v1958_v58 = vpop.permute.xlu0 %1957  ;;  %5018 = vmatprep.subr.bf16.mxu1 %v6348_v30 }
 0x129   : > { %v1753_v28 = vpop.permute.xlu1 %1752 }
 0x12d   : > { %v1956_v57 = vpop.permute.xlu1 %1955 }
 0x12e   : > { %4919 = vmatmul.mubr.msk.bf16.vlgmr.msra.gmra.mrb[0].mxu0 %vm1020_vm10, %v1749_v26  ;;  %v5390_v26 = vld [vmem:[#allocation4 + $0x78] sm:$0xff]  }
 0x12f   : > { %4927 = vmatpush3.bf16.msra.mxu0 %v1876_v31  ;;  %4922 = vmatprep.mubr.msk.bf16.mxu0 %vm1020_vm10, %v1751_v39  ;;  %v6351_v31 = vld [vmem:[#allocation4] sm:$0xff]   ;;  %v546_v39 = vld [vmem:[#allocation3 + $0x48] sm:$0x1] }
 0x130   : > { %5308 = vmatprep.subr.msk.bf16.mxu0 %vm1033_vm11, %v4528_v1  ;;  %v547_v1 = vsel %vm6239_vm13, 0, %v546_v39  ;;  %v2205_v39 = vld [vmem:[#allocation3 + $0xc] sm:$0x1] }
 0x131   : > { %v1960_v48 = vpop.permute.xlu1 %1959  ;;  %548 = vst [vmem:[#allocation3 + $0x48] sm:$0x1] %v547_v1 }
 0x136   : > { %4923 = vmatmul.mubr.msk.bf16.gmra.mrb[4].mxu0 %vm1020_vm10, %v1753_v28  ;;  %v577_v28 = vld [vmem:[#allocation3 + $0x4c] sm:$0x1] }
 0x137   : > { %4928 = vmatprep.mubr.msk.bf16.mxu0 %vm1020_vm10, %v6199_v35  ;;  %v531_v35 = vld [vmem:[#allocation3 + $0x20] sm:$0x1] }
 0x138   : > { %v532_v45 = vsel %vm6239_vm13, 0, %v531_v35 }
 0x139   : > { %533 = vst [vmem:[#allocation3 + $0x20] sm:$0x1] %v532_v45 }
 0x13e   : > { %4929 = vmatmul.mubr.msk.bf16.vlgmr.msra.gmra.mrb[0].mxu0 %vm1020_vm10, %v6219_v32  ;;  %v556_v32 = vld [vmem:[#allocation3 + $0x14] sm:$0x1] }
 0x13f   : > { %4937 = vmatpush3.bf16.msra.mxu0 %v1974_v46  ;;  %4932 = vmatprep.mubr.msk.bf16.mxu0 %vm1020_vm10, %v6207_v2  ;;  %v563_v2 = vsel %vm6247_vm14, 0, %v562_v24  ;;  %v578_v46 = vsel %vm6247_vm14, 0, %v577_v28 }
 0x140   : > { %4946 = vmatprep.subr.bf16.mxu0 %v5376_v43  ;;  %564 = vst [vmem:[#allocation3 + $0x24] sm:$0x1] %v563_v2  ;;  %579 = vst [vmem:[#allocation3 + $0x4c] sm:$0x1] %v578_v46  ;;  %v6378_v2 = vld [vmem:[#allocation3] sm:$0xe] }
 0x141   : > { %v4567_v22 = vrot.slane %v6378_v2, 9 }
 0x146   : > { %4933 = vmatmul.mubr.msk.bf16.gmra.mrb[4].mxu0 %vm1020_vm10, %v6226_v52  ;;  %v557_v52 = vsel %vm6247_vm14, 0, %v556_v32 }
 0x147   : > { %4938 = vmatprep.mubr.msk.bf16.mxu0 %vm1020_vm10, %v1954_v47  ;;  %558 = vst [vmem:[#allocation3 + $0x14] sm:$0x1] %v557_v52  ;;  %v6358_v47 = vld [vmem:[#allocation3] sm:$0xf] }
 0x148   : > { %v2283_v16 = vshrl.u32 %v6358_v47, 16 }
 0x14a   : > { %v6380_v3 = vrot.slane %v2283_v16, 4 }
 0x14e   : > { %4939 = vmatmul.mubr.msk.bf16.vlgmr.msra.gmra.mrb[0].mxu0 %vm1020_vm10, %v1956_v57  ;;  %v6363_v57 = vld [vmem:[%s6793_s2] ss:$0 sm:$0xff] }
 0x14f   : > { %4942 = vmatprep.mubr.msk.bf16.mxu0 %vm1020_vm10, %v1958_v58  ;;  %4947 = vmatpush3.bf16.msra.mxu0 %v5376_v43  ;;  %v2286_v43 = vshll.u32 %v6358_v47, 16 }
 0x150   : > { %4948 = vmatprep.subr.bf16.mxu0 %v5378_v41 }
 0x151   : > { %v6382_v32 = vrot.slane %v2286_v43, 5 }
 0x153   : > { %4949 = vmatpush3.bf16.msra.mxu0 %v5378_v41  ;;  %v6385_v41 = vld [vmem:[#allocation3 + $0x4] sm:$0x1]  ;;  %v2289_v6 = vor.u32 %v6382_v32, %v6380_v3 }
 0x154   : > { %4950 = vmatprep.subr.bf16.mxu0 %v5380_v7  ;;  %v2292_v18 = vshll.u32 %v6385_v41, 16  ;;  %v2706_v42 = vrot.slane %v6385_v41, 5 }
 0x156   : > { %4943 = vmatmul.mubr.msk.bf16.gmra.mrb[4].mxu0 %vm1020_vm10, %v1960_v48  ;;  %v6368_v48 = vld [vmem:[%s6794_s3] ss:$0 sm:$0xff] }
 0x157   : > { %4951 = vmatpush3.bf16.msra.mxu0 %v5380_v7 }
 0x158   : > { %4952 = vmatprep.subr.bf16.mxu0 %v5382_v13 }
 0x15b   : > { %4953 = vmatpush3.bf16.msra.mxu0 %v5382_v13 }
 0x15c   : > { %4954 = vmatprep.subr.bf16.mxu0 %v5384_v15 }
 0x15f   : > { %4955 = vmatpush3.bf16.msra.mxu0 %v5384_v15 }
 0x160   : > { %4956 = vmatprep.subr.bf16.mxu0 %v5386_v49 }
 0x163   : > { %4957 = vmatpush3.bf16.msra.mxu0 %v5386_v49 }
 0x164   : > { %4958 = vmatprep.subr.bf16.mxu0 %v5388_v54 }
 0x167   : > { %4959 = vmatpush3.bf16.msra.mxu0 %v5388_v54 }
 0x168   : > { %4960 = vmatprep.subr.bf16.mxu0 %v5390_v26 }
 0x16b   : > { %4961 = vmatpush3.bf16.msra.mxu0 %v5390_v26 }
 0x16c   : > { %4970 = vmatprep.subr.bf16.mxu0 %v6351_v31 }
 0x221   : > { %v4940_v58 = vpop.f32.mrb[0].mxu0 }
 0x222   : > { %v2058_v12 = vmul.f32 %v4940_v58, %v6363_v57  ;;  %v2010_v11 = vpop.f32.mrb[1].mxu0 }
 0x223   : > { %v2056_v53 = vmul.f32 %v6363_v57, %v2010_v11  ;;  %v4941_v55 = vpop.f32.mrb[2].mxu0 }
 0x224   : > { %v2073_v63 = vadd.f32 %v6368_v48, %v2058_v12  ;;  %v2059_v59 = vmul.f32 %v4941_v55, %v6363_v57  ;;  %v2013_v35 = vpop.f32.mrb[3].mxu0  ;;  %v2220_v12 = vld [vmem:[#allocation3 + $0x20] sm:$0xf] }
 0x225   : > { %v2071_v24 = vadd.f32 %v6368_v48, %v2056_v53  ;;  %v2057_v45 = vmul.f32 %v6363_v57, %v2013_v35 }
 0x226   : > { %v2081_v37 = vmax.f32 %v2073_v63, 0.0  ;;  %v2074_v52 = vadd.f32 %v6368_v48, %v2059_v59  ;;  %v2223_v63 = vld [vmem:[#allocation3 + $0x24] sm:$0x1] }
 0x227   : > { %v2079_v9 = vmax.f32 %v2071_v24, 0.0  ;;  %v2072_v38 = vadd.f32 %v6368_v48, %v2057_v45 }
 0x228   : > { %v4691_v34 = vpack.c.bf16 %v2081_v37, %v2081_v37  ;;  %v2082_v61 = vmax.f32 %v2074_v52, 0.0 }
 0x229   : > { %v4689_v4 = vpack.c.bf16 %v2079_v9, %v2079_v9  ;;  %v2080_v33 = vmax.f32 %v2072_v38, 0.0  ;;  %v4944_v56 = vpop.f32.mrb[4].mxu0  ;;  %v2208_v9 = vld [vmem:[#allocation3 + $0x10] sm:$0xf]  ;;  %v2211_v38 = vld [vmem:[#allocation3 + $0x14] sm:$0x1] }
 0x22a   : > { %v2136_v19 = vshrl.u32 %v4691_v34, 16  ;;  %v2139_v8 = vshll.u32 %v4691_v34, 16  ;;  %v4692_v7 = vpack.c.bf16 %v2082_v61, %v2082_v61  ;;  %v2062_v27 = vmul.f32 %v4944_v56, %v6363_v57  ;;  %v2026_v13 = vpop.f32.mrb[5].mxu0 }
 0x22b   : > { %v2120_v20 = vshrl.u32 %v4689_v4, 16  ;;  %v2123_v23 = vshll.u32 %v4689_v4, 16  ;;  %v4690_v60 = vpack.c.bf16 %v2080_v33, %v2080_v33  ;;  %v2060_v51 = vmul.f32 %v6363_v57, %v2026_v13  ;;  %v4945_v21 = vpop.f32.mrb[6].mxu0 }
 0x22c   : > { %v2138_v25 = vrot.slane %v2136_v19, 7  ;;  %v2144_v15 = vshrl.u32 %v4692_v7, 16  ;;  %v2147_v62 = vshll.u32 %v4692_v7, 16  ;;  %v2077_v49 = vadd.f32 %v6368_v48, %v2062_v27  ;;  %v2029_v50 = vpop.f32.mrb[7].mxu0 }
 0x22d   : > { %v2122_v26 = vrot.slane %v2120_v20, 7  ;;  %v2128_v1 = vshrl.u32 %v4690_v60, 16  ;;  %v2131_v28 = vshll.u32 %v4690_v60, 16  ;;  %v2075_v46 = vadd.f32 %v6368_v48, %v2060_v51  ;;  %v2238_v51 = vld [vmem:[#allocation3 + $0x38] sm:$0xf] }
 0x22e   : > { %v2141_v58 = vor.u32 %v2139_v8, %v2138_v25  ;;  %v2142_v16 = vrot.slane %v2138_v25, 4  ;;  %v2146_v43 = vrot.slane %v2144_v15, 7  ;;  %v2085_v11 = vmax.f32 %v2077_v49, 0.0  ;;  %v2241_v49 = vld [vmem:[#allocation3 + $0x3c] sm:$0x1] }
 0x22f   : > { %v2125_v53 = vor.u32 %v2123_v23, %v2122_v26  ;;  %v2126_v55 = vrot.slane %v2122_v26, 4  ;;  %v2130_v59 = vrot.slane %v2128_v1, 7  ;;  %v2083_v35 = vmax.f32 %v2075_v46, 0.0  ;;  %v2229_v1 = vld [vmem:[#allocation3 + $0x2c] sm:$0x1] }
 0x230   : > { %v2215_v24 = vsel %vm6398_vm2, %v2141_v58, %v2214_v14  ;;  %v2218_v45 = vsel %vm6239_vm13, %v2142_v16, %v2217_v40  ;;  %v2149_v37 = vor.u32 %v2147_v62, %v2146_v43  ;;  %v2150_v52 = vrot.slane %v2146_v43, 4 }
 0x231   : > { %2216 = vst [vmem:[#allocation3 + $0x18] sm:$0xf] %v2215_v24  ;;  %2219 = vst [vmem:[#allocation3 + $0x1c] sm:$0x1] %v2218_v45  ;;  %v2203_v34 = vsel %vm6398_vm2, %v2125_v53, %v2202_v44  ;;  %v2206_v61 = vsel %vm6239_vm13, %v2126_v55, %v2205_v39  ;;  %v2133_v4 = vor.u32 %v2131_v28, %v2130_v59  ;;  %v2134_v33 = vrot.slane %v2130_v59, 4 }
 0x232   : > { %2204 = vst [vmem:[#allocation3 + $0x8] sm:$0xf] %v2203_v34  ;;  %2207 = vst [vmem:[#allocation3 + $0xc] sm:$0x1] %v2206_v61  ;;  %v2221_v56 = vsel %vm6398_vm2, %v2149_v37, %v2220_v12  ;;  %v2224_v19 = vsel %vm6239_vm13, %v2150_v52, %v2223_v63  ;;  %v4695_v8 = vpack.c.bf16 %v2085_v11, %v2085_v11  ;;  %v2226_v39 = vld [vmem:[#allocation3 + $0x28] sm:$0xf] }
 0x233   : > { %v4693_v7 = vpack.c.bf16 %v2083_v35, %v2083_v35  ;;  %2222 = vst [vmem:[#allocation3 + $0x20] sm:$0xf] %v2221_v56  ;;  %2225 = vst [vmem:[#allocation3 + $0x24] sm:$0x1] %v2224_v19  ;;  %v2209_v27 = vsel %vm6398_vm2, %v2133_v4, %v2208_v9  ;;  %v2212_v13 = vsel %vm6239_vm13, %v2134_v33, %v2211_v38  ;;  %v2244_v52 = vld [vmem:[#allocation3 + $0x40] sm:$0xf] }
 0x234   : > { %v2063_v14 = vmul.f32 %v4945_v21, %v6363_v57  ;;  %v2061_v40 = vmul.f32 %v6363_v57, %v2029_v50  ;;  %2210 = vst [vmem:[#allocation3 + $0x10] sm:$0xf] %v2209_v27  ;;  %2213 = vst [vmem:[#allocation3 + $0x14] sm:$0x1] %v2212_v13  ;;  %v2168_v20 = vshrl.u32 %v4695_v8, 16  ;;  %v6431_v21 = vrot.slane %v2292_v18, 5 }
 0x235   : > { %v2152_v23 = vshrl.u32 %v4693_v7, 16  ;;  %v6436_v57 = vrot.slane %v2289_v6, 4  ;;  %v2171_v62 = vshll.u32 %v4695_v8, 16  ;;  %v2155_v26 = vshll.u32 %v4693_v7, 16  ;;  %v2247_v9 = vld [vmem:[#allocation3 + $0x44] sm:$0x1] }
 0x236   : > { %v2078_v25 = vadd.f32 %v6368_v48, %v2063_v14  ;;  %v2076_v44 = vadd.f32 %v6368_v48, %v2061_v40  ;;  %v2170_v15 = vrot.slane %v2168_v20, 7  ;;  %v6444_v48 = vsel %vm6423_vm3, %v4567_v22, %v2706_v42  ;;  %v2232_v34 = vld [vmem:[#allocation3 + $0x30] sm:$0xf]  ;;  %v2235_v61 = vld [vmem:[#allocation3 + $0x34] sm:$0x1] }
 0x237   : > { %v2154_v50 = vrot.slane %v2152_v23, 7  ;;  %v2295_v2 = vsel %vm5871_vm9, %v6436_v57, %v6431_v21  ;;  %v5394_v57 = vld [vmem:[#allocation4 + $0x8] sm:$0xff]  }
 0x238   : > { %v2086_v28 = vmax.f32 %v2078_v25, 0.0  ;;  %v2084_v46 = vmax.f32 %v2076_v44, 0.0  ;;  %v2173_v3 = vor.u32 %v2171_v62, %v2170_v15  ;;  %v2174_v32 = vrot.slane %v2170_v15, 4  ;;  %v2277_v58 = vld [vmem:[#allocation3 + $0x1c] sm:$0x1] }
 0x239   : > { %v2157_v18 = vor.u32 %v2155_v26, %v2154_v50  ;;  %v2158_v6 = vrot.slane %v2154_v50, 4  ;;  %v2680_v16 = vld [vmem:[#allocation3 + $0x18] sm:$0xe]  ;;  %v2275_v11 = vld [vmem:[#allocation3 + $0xc] sm:$0x1]  ;;  %v2334_v55 = vshll.u32 %v2277_v58, 16 }
 0x23a   : > { %v4696_v43 = vpack.c.bf16 %v2086_v28, %v2086_v28  ;;  %v4694_v12 = vpack.c.bf16 %v2084_v46, %v2084_v46  ;;  %v2678_v53 = vld [vmem:[#allocation3 + $0x8] sm:$0xe]  ;;  %v2239_v41 = vsel %vm6398_vm2, %v2173_v3, %v2238_v51  ;;  %v2242_v22 = vsel %vm6239_vm13, %v2174_v32, %v2241_v49  ;;  %v6476_v28 = vld [vmem:[#allocation3 + $0x18] sm:$0xf]  ;;  %v6478_v46 = vld [vmem:[#allocation3 + $0x24] sm:$0x1] }
 0x23b   : > { %v2227_v42 = vsel %vm6398_vm2, %v2157_v18, %v2226_v39  ;;  %v2230_v63 = vsel %vm6239_vm13, %v2158_v6, %v2229_v1  ;;  %2240 = vst [vmem:[#allocation3 + $0x38] sm:$0xf] %v2239_v41  ;;  %2243 = vst [vmem:[#allocation3 + $0x3c] sm:$0x1] %v2242_v22  ;;  %v6458_v45 = vld [vmem:[#allocation3 + $0x14] sm:$0x1] }
 0x23c   : > { %2228 = vst [vmem:[#allocation3 + $0x28] sm:$0xf] %v2227_v42  ;;  %2231 = vst [vmem:[#allocation3 + $0x2c] sm:$0x1] %v2230_v63  ;;  %v2176_v59 = vshrl.u32 %v4696_v43, 16  ;;  %v2179_v35 = vshll.u32 %v4696_v43, 16 }
 0x23d   : > { %v2160_v24 = vshrl.u32 %v4694_v12, 16  ;;  %v4570_v37 = vrot.slane %v2680_v16, 9  ;;  %v2163_v38 = vshll.u32 %v4694_v12, 16  ;;  %v2306_v4 = vshll.u32 %v2275_v11, 16  ;;  %v2679_v19 = vld [vmem:[#allocation3 + $0x10] sm:$0xe] }
 0x23e   : > { %v4568_v33 = vrot.slane %v2678_v53, 9  ;;  %v2710_v56 = vrot.slane %v2275_v11, 5  ;;  %v2178_v8 = vrot.slane %v2176_v59, 7  ;;  %v2320_v27 = vshll.u32 %v6458_v45, 16  ;;  %v6461_v14 = vld [vmem:[#allocation3 + $0x8] sm:$0xf] }
 0x23f   : > { %v2162_v7 = vrot.slane %v2160_v24, 7  ;;  %v4569_v13 = vrot.slane %v2679_v19, 9  ;;  %v6463_v40 = vrot.slane %v2306_v4, 5  ;;  %v6467_v23 = vrot.slane %v2334_v55, 5  ;;  %v6470_v25 = vld [vmem:[#allocation3 + $0x10] sm:$0xf] }
 0x240   : > { %v2711_v20 = vsel %vm6423_vm3, %v4568_v33, %v2710_v56  ;;  %v2714_v51 = vrot.slane %v6458_v45, 5  ;;  %v2181_v44 = vor.u32 %v2179_v35, %v2178_v8  ;;  %v2182_v15 = vrot.slane %v2178_v8, 4  ;;  %v2681_v6 = vld [vmem:[#allocation3 + $0x20] sm:$0xe]  ;;  %v5391_v53 = vld [vmem:[#allocation4 + $0xc8] sm:$0xff]  }
 0x241   : > { %v2165_v62 = vor.u32 %v2163_v38, %v2162_v7  ;;  %v2166_v49 = vrot.slane %v2162_v7, 4  ;;  %v4575_v50 = vcombine.low %v6444_v48, %v2711_v20  ;;  %v2718_v39 = vrot.slane %v2277_v58, 5  ;;  %v6494_v54 = vld [vmem:[#allocation3 + $0x20] sm:$0xf] }
 0x242   : > { %v2715_v26 = vsel %vm6423_vm3, %v4569_v13, %v2714_v51  ;;  %v2297_v1 = vshrl.u32 %v6461_v14, 16  ;;  %v2245_v3 = vsel %vm6398_vm2, %v2181_v44, %v2244_v52  ;;  %v2248_v32 = vsel %vm6239_vm13, %v2182_v15, %v2247_v9  ;;  %v6500_v45 = vld [vmem:[#allocation3 + $0x3c] sm:$0x1]  ;;  %v5393_v19 = vld [vmem:[#allocation4 + $0xd0] sm:$0xff]  }
 0x243   : > { %v2233_v18 = vsel %vm6398_vm2, %v2165_v62, %v2232_v34  ;;  %v2236_v48 = vsel %vm6239_vm13, %v2166_v49, %v2235_v61  ;;  %2246 = vst [vmem:[#allocation3 + $0x40] sm:$0xf] %v2245_v3  ;;  %2249 = vst [vmem:[#allocation3 + $0x44] sm:$0x1] %v2248_v32  ;;  %5010 = vmatprep.mubr.bf16.mxu1 %v4575_v50  ;;  %v2719_v58 = vsel %vm6423_vm3, %v4570_v37, %v2718_v39  ;;  %v6492_v11 = vld [vmem:[#allocation3 + $0x2c] sm:$0x1] }
 0x244   : > { %2234 = vst [vmem:[#allocation3 + $0x30] sm:$0xf] %v2233_v18  ;;  %2237 = vst [vmem:[#allocation3 + $0x34] sm:$0x1] %v2236_v48  ;;  %v2299_v16 = vrot.slane %v2297_v1, 4  ;;  %v2300_v43 = vshll.u32 %v6461_v14, 16  ;;  %v4576_v29 = vcombine.low %v2715_v26, %v2719_v58 }
 0x245   : > { %v2311_v12 = vshrl.u32 %v6470_v25, 16  ;;  %v2314_v55 = vshll.u32 %v6470_v25, 16  ;;  %v2325_v41 = vshrl.u32 %v6476_v28, 16  ;;  %v2328_v22 = vshll.u32 %v6476_v28, 16  ;;  %v2682_v42 = vld [vmem:[#allocation3 + $0x28] sm:$0xe] }
 0x246   : > { %v2302_v63 = vrot.slane %v2300_v43, 5  ;;  %v4571_v35 = vrot.slane %v2681_v6, 9  ;;  %v2722_v24 = vrot.slane %v6478_v46, 5  ;;  %5011 = vmatmul.mubr.bf16.vlgmr.msra.gmra.mrb[0].mxu1 %v4576_v29  ;;  %v4572_v38 = vrot.slane %v2682_v42, 9  ;;  %v2684_v34 = vld [vmem:[#allocation3 + $0x38] sm:$0xe] }
 0x247   : > { %v2313_v59 = vrot.slane %v2311_v12, 4  ;;  %v2316_v37 = vrot.slane %v2314_v55, 5  ;;  %v2327_v52 = vrot.slane %v2325_v41, 4  ;;  %v2330_v9 = vrot.slane %v2328_v22, 5  ;;  %5019 = vmatpush3.bf16.msra.mxu1 %v6348_v30  ;;  %v6510_v30 = vld [vmem:[#allocation3 + $0x28] sm:$0xf] }
 0x248   : > { %v2322_v61 = vrot.slane %v2320_v27, 5  ;;  %v2303_v4 = vor.u32 %v2302_v63, %v2299_v16  ;;  %v2723_v33 = vsel %vm6423_vm3, %v4571_v35, %v2722_v24  ;;  %v2726_v56 = vrot.slane %v6492_v11, 5  ;;  %5020 = vmatprep.subr.bf16.mxu1 %v5391_v53  ;;  %v6533_v29 = vld [vmem:[#allocation3 + $0x38] sm:$0xf]  ;;  %v5395_v22 = vld [vmem:[#allocation3 + $0x8] ss:$8 sps:$4 sm:$0xff]  }
 0x249   : > { %v2317_v8 = vor.u32 %v2316_v37, %v2313_v59  ;;  %v2331_v7 = vor.u32 %v2330_v9, %v2327_v52  ;;  %v4574_v13 = vrot.slane %v2684_v34, 9  ;;  %v2339_v20 = vshrl.u32 %v6494_v54, 16  ;;  %v5399_v9 = vld [vmem:[#allocation4 + $0xe0] sm:$0xff]  }
 0x24a   : > { %v2304_v51 = vrot.slane %v2303_v4, 4  ;;  %v2727_v44 = vsel %vm6423_vm3, %v4572_v38, %v2726_v56  ;;  %v2734_v27 = vrot.slane %v6500_v45, 5  ;;  %v2342_v15 = vshll.u32 %v6494_v54, 16  ;;  %v5397_v38 = vld [vmem:[#allocation4 + $0x10] sm:$0xff]  }
 0x24b   : > { %v2318_v62 = vrot.slane %v2317_v8, 4  ;;  %v2332_v49 = vrot.slane %v2331_v7, 4  ;;  %v4577_v50 = vcombine.low %v2723_v33, %v2727_v44  ;;  %v2280_v26 = vld [vmem:[#allocation3 + $0x34] sm:$0x1]  ;;  %v2683_v39 = vld [vmem:[#allocation3 + $0x30] sm:$0xe]  ;;  %5021 = vmatpush3.bf16.msra.mxu1 %v5391_v53 }
 0x24c   : > { %v2309_v1 = vsel %vm5871_vm9, %v2304_v51, %v6463_v40  ;;  %v4573_v3 = vrot.slane %v2683_v39, 9  ;;  %v2730_v32 = vrot.slane %v2280_v26, 5  ;;  %v2341_v18 = vrot.slane %v2339_v20, 4  ;;  %5022 = vmatprep.subr.bf16.mxu1 %v5393_v19  ;;  %v6526_v16 = vld [vmem:[#allocation3 + $0x30] sm:$0xf]  ;;  %v5401_v51 = vld [vmem:[#allocation4 + $0xe8] sm:$0xff]  }
 0x24d   : > { %v4543_v48 = vcombine.low %v2295_v2, %v2309_v1  ;;  %v2323_v6 = vsel %vm5871_vm9, %v2318_v62, %v2322_v61  ;;  %v2337_v58 = vsel %vm5871_vm9, %v2332_v49, %v6467_v23  ;;  %5014 = vmatprep.mubr.bf16.mxu1 %v4577_v50  ;;  %v2344_v40 = vrot.slane %v2342_v15, 5  ;;  %v5396_v23 = vld [vmem:[#allocation4 + $0xd8] sm:$0xff]  }
 0x24e   : > { %v4544_v43 = vcombine.low %v2323_v6, %v2337_v58  ;;  %v2731_v12 = vsel %vm6423_vm3, %v4573_v3, %v2730_v32  ;;  %v2735_v21 = vsel %vm6423_vm3, %v4574_v13, %v2734_v27  ;;  %v2353_v2 = vshrl.u32 %v6510_v30, 16  ;;  %v5400_v62 = vld [vmem:[#allocation4 + $0x18] sm:$0xff]   ;;  %v3062_v3 = vld [vmem:[#allocation3 + $0x10] sm:$0xf]  ;;  %v5403_v32 = vld [vmem:[#allocation4 + $0xf0] sm:$0xff]  }
 0x24f   : > { %4962 = vmatprep.mubr.bf16.mxu0 %v4543_v48  ;;  %v4578_v53 = vcombine.low %v2731_v12, %v2735_v21  ;;  %v2345_v55 = vor.u32 %v2344_v40, %v2341_v18  ;;  %v2356_v41 = vshll.u32 %v6510_v30, 16  ;;  %5023 = vmatpush3.bf16.msra.mxu1 %v5393_v19  ;;  %v2367_v63 = vshrl.u32 %v6526_v16, 16  ;;  %v3060_v48 = vld [vmem:[#allocation3 + $0x8] sm:$0xf]  ;;  %v5402_v58 = vld [vmem:[#allocation4 + $0x20] sm:$0xff]  }
 0x250   : > { %4963 = vmatmul.mubr.bf16.vlgmr.msra.gmra.mrb[8].mxu0 %v4544_v43  ;;  %v2355_v42 = vrot.slane %v2353_v2, 4  ;;  %v2370_v59 = vshll.u32 %v6526_v16, 16  ;;  %v2348_v35 = vshll.u32 %v6478_v46, 16  ;;  %v2362_v37 = vshll.u32 %v6492_v11, 16  ;;  %5024 = vmatprep.subr.bf16.mxu1 %v5396_v23  ;;  %v5405_v21 = vld [vmem:[#allocation4 + $0xf8] sm:$0xff]  }
 0x251   : > { %4971 = vmatpush3.bf16.msra.mxu0 %v6351_v31  ;;  %5015 = vmatmul.mubr.bf16.gmra.mrb[4].mxu1 %v4578_v53  ;;  %v2358_v24 = vrot.slane %v2356_v41, 5  ;;  %v2381_v52 = vshrl.u32 %v6533_v29, 16  ;;  %v2369_v34 = vrot.slane %v2367_v63, 4  ;;  %v2376_v4 = vshll.u32 %v2280_v26, 16  ;;  %v5404_v53 = vld [vmem:[#allocation4 + $0x28] sm:$0xff]   ;;  %v5408_v41 = vld [vmem:[#allocation4 + $0x100] sm:$0xff]  }
 0x252   : > { %4972 = vmatprep.subr.bf16.mxu0 %v5394_v57  ;;  %5034 = vmatprep.mubr.bf16.mxu1 %v5395_v22  ;;  %v2372_v61 = vrot.slane %v2370_v59, 5  ;;  %v2384_v33 = vshll.u32 %v6533_v29, 16  ;;  %v2346_v56 = vrot.slane %v2345_v55, 4  ;;  %v2390_v11 = vshll.u32 %v6500_v45, 16  ;;  %v6554_v63 = vld [vmem:[#allocation3 + $0x14] sm:$0x1] }
 0x253   : > { %v2359_v31 = vor.u32 %v2358_v24, %v2355_v42  ;;  %v2383_v19 = vrot.slane %v2381_v52, 4  ;;  %5025 = vmatpush3.bf16.msra.mxu1 %v5396_v23  ;;  %v2350_v7 = vrot.slane %v2348_v35, 5  ;;  %v2364_v20 = vrot.slane %v2362_v37, 5  ;;  %v5407_v59 = vld [vmem:[#allocation3 + $0x18] ss:$8 sps:$4 sm:$0xff]  }
 0x254   : > { %v2373_v46 = vor.u32 %v2372_v61, %v2369_v34  ;;  %v2386_v8 = vrot.slane %v2384_v33, 5  ;;  %5026 = vmatprep.subr.bf16.mxu1 %v5399_v9  ;;  %v2378_v27 = vrot.slane %v2376_v4, 5  ;;  %v2392_v1 = vrot.slane %v2390_v11, 5  ;;  %v6556_v35 = vld [vmem:[#allocation3 + $0xc] sm:$0x1]  ;;  %v5411_v24 = vld [vmem:[#allocation4 + $0x108] sm:$0xff]  }
 0x255   : > { %4973 = vmatpush3.bf16.msra.mxu0 %v5394_v57  ;;  %v2360_v13 = vrot.slane %v2359_v31, 4  ;;  %v2351_v49 = vsel %vm5871_vm9, %v2346_v56, %v2350_v7  ;;  %v3091_v40 = vshrl.u32 %v3062_v3, 16  ;;  %v3094_v43 = vshll.u32 %v3062_v3, 16  ;;  %v5415_v4 = vld [vmem:[#allocation4 + $0x110] sm:$0xff]   ;;  %v5416_v11 = vld [vmem:[#allocation4 + $0x118] sm:$0xff]  }
 0x256   : > { %4974 = vmatprep.subr.bf16.mxu0 %v5397_v38  ;;  %v2374_v44 = vrot.slane %v2373_v46, 4  ;;  %v2387_v15 = vor.u32 %v2386_v8, %v2383_v19  ;;  %v4555_v12 = vcombine.low %v6358_v47, %v6461_v14  ;;  %v3077_v57 = vshrl.u32 %v3060_v48, 16  ;;  %v5406_v47 = vld [vmem:[#allocation4 + $0x30] sm:$0xff]  }
 0x257   : > { %v2365_v50 = vsel %vm5871_vm9, %v2360_v13, %v2364_v20  ;;  %5027 = vmatpush3.bf16.msra.mxu1 %v5399_v9  ;;  %v3080_v2 = vshll.u32 %v3060_v48, 16  ;;  %v3093_v23 = vrot.slane %v3091_v40, 4  ;;  %v3096_v55 = vrot.slane %v3094_v43, 5  ;;  %v5409_v9 = vld [vmem:[#allocation3 + $0x28] ss:$8 sps:$4 sm:$0xff]  }
 0x258   : > { %v4545_v26 = vcombine.low %v2351_v49, %v2365_v50  ;;  %v2379_v45 = vsel %vm5871_vm9, %v2374_v44, %v2378_v27  ;;  %v2388_v39 = vrot.slane %v2387_v15, 4  ;;  %5028 = vmatprep.subr.bf16.mxu1 %v5401_v51  ;;  %v3079_v22 = vrot.slane %v3077_v57, 4  ;;  %v5414_v46 = vld [vmem:[#allocation3 + $0x38] ss:$8 sps:$4 sm:$0xff]   ;;  %v3070_v44 = vld [vmem:[#allocation3 + $0x30] sm:$0xf] }
 0x259   : > { %4975 = vmatpush3.bf16.msra.mxu0 %v5397_v38  ;;  %v3082_v42 = vrot.slane %v3080_v2, 5  ;;  %v3097_v14 = vor.u32 %v3096_v55, %v3093_v23  ;;  %v3100_v52 = vshll.u32 %v6554_v63, 16  ;;  %v5410_v38 = vld [vmem:[#allocation4 + $0x38] sm:$0xff]   ;;  %v3086_v34 = vshll.u32 %v6556_v35, 16  ;;  %v3066_v20 = vld [vmem:[#allocation3 + $0x20] sm:$0xf] }
 0x25a   : > { %4966 = vmatprep.mubr.bf16.mxu0 %v4545_v26  ;;  %v2393_v18 = vsel %vm5871_vm9, %v2388_v39, %v2392_v1  ;;  %4976 = vmatprep.subr.bf16.mxu0 %v5400_v62  ;;  %v4556_v13 = vcombine.low %v6470_v25, %v6476_v28  ;;  %v5418_v27 = vld [vmem:[#allocation4 + $0x120] sm:$0xff]   ;;  %v3064_v15 = vld [vmem:[#allocation3 + $0x18] sm:$0xf]  ;;  %v3122_v49 = vshll.u32 %v3066_v20, 16  ;;  %v3068_v50 = vld [vmem:[#allocation3 + $0x28] sm:$0xf] }
 0x25b   : > { %v4546_v6 = vcombine.low %v2379_v45, %v2393_v18  ;;  %5029 = vmatpush3.bf16.msra.mxu1 %v5401_v51  ;;  %v3083_v37 = vor.u32 %v3082_v42, %v3079_v22  ;;  %v3098_v61 = vrot.slane %v3097_v14, 4  ;;  %v3102_v56 = vrot.slane %v3100_v52, 5  ;;  %v5419_v39 = vld [vmem:[#allocation4 + $0x128] sm:$0xff]   ;;  %v6583_v14 = vld [vmem:[#allocation3 + $0x2c] sm:$0x1] }
 0x25c   : > { %5030 = vmatprep.subr.bf16.mxu1 %v5403_v32  ;;  %v3088_v31 = vrot.slane %v3086_v34, 5  ;;  %v4557_v51 = vcombine.low %v6494_v54, %v6510_v30  ;;  %v3147_v26 = vshrl.u32 %v3070_v44, 16  ;;  %v3150_v45 = vshll.u32 %v3070_v44, 16 }
 0x25d   : > { %4967 = vmatmul.mubr.bf16.gmra.mrb[12].mxu0 %v4546_v6  ;;  %v3084_v33 = vrot.slane %v3083_v37, 4  ;;  %v3103_v19 = vsel %vm5871_vm9, %v3098_v61, %v3102_v56  ;;  %v3105_v25 = vshrl.u32 %v3064_v15, 16  ;;  %v3108_v28 = vshll.u32 %v3064_v15, 16  ;;  %v3074_v6 = vld [vmem:[#allocation3 + $0x40] sm:$0xf]  ;;  %v5421_v37 = vld [vmem:[#allocation4 + $0x138] sm:$0xff]  }
 0x25e   : > { %4986 = vmatprep.mubr.bf16.mxu0 %v4555_v12  ;;  %4977 = vmatpush3.bf16.msra.mxu0 %v5400_v62  ;;  %v3119_v62 = vshrl.u32 %v3066_v20, 16  ;;  %v3133_v1 = vshrl.u32 %v3068_v50, 16  ;;  %v3136_v54 = vshll.u32 %v3068_v50, 16  ;;  %v3124_v3 = vrot.slane %v3122_v49, 5  ;;  %v4245_v12 = vld [vmem:[%s6798_s7] sm:$0x3] }
 0x25f   : > { %4978 = vmatprep.subr.bf16.mxu0 %v5402_v58  ;;  %5031 = vmatpush3.bf16.msra.mxu1 %v5403_v32  ;;  %v3089_v8 = vsel %vm5871_vm9, %v3084_v33, %v3088_v31  ;;  %v4558_v32 = vcombine.low %v6526_v16, %v6533_v29  ;;  %v3149_v18 = vrot.slane %v3147_v26, 4  ;;  %v3152_v48 = vrot.slane %v3150_v45, 5  ;;  %v6575_v16 = vld [vmem:[#allocation3 + $0x34] sm:$0x1]  ;;  %v6595_v49 = vld [vmem:[#allocation3 + $0x3c] sm:$0x1] }
 0x260   : > { %5032 = vmatprep.subr.bf16.mxu1 %v5405_v21  ;;  %v4599_v7 = vcombine.low %v3089_v8, %v3103_v19  ;;  %v3121_v30 = vrot.slane %v3119_v62, 4  ;;  %v3107_v40 = vrot.slane %v3105_v25, 4  ;;  %v3110_v43 = vrot.slane %v3108_v28, 5  ;;  %v5422_v8 = vld [vmem:[#allocation4 + $0x140] sm:$0xff]  }
 0x261   : > { %v3135_v57 = vrot.slane %v3133_v1, 4  ;;  %v3138_v2 = vrot.slane %v3136_v54, 5  ;;  %v3175_v29 = vshrl.u32 %v3074_v6, 16  ;;  %v3178_v55 = vshll.u32 %v3074_v6, 16  ;;  %v3343_v25 = vld [vmem:[#allocation3 + $0x10] sm:$0xe] }
 0x262   : > { %4979 = vmatpush3.bf16.msra.mxu0 %v5402_v58  ;;  %v5420_v58 = vld [vmem:[#allocation4 + $0x130] sm:$0xff]   ;;  %v3125_v23 = vor.u32 %v3124_v3, %v3121_v30  ;;  %v3153_v22 = vor.u32 %v3152_v48, %v3149_v18  ;;  %v3111_v42 = vor.u32 %v3110_v43, %v3107_v40  ;;  %v5423_v1 = vld [vmem:[#allocation4 + $0x148] sm:$0xff]   ;;  %v3170_v30 = vshll.u32 %v6595_v49, 16 }
 0x263   : > { %4980 = vmatprep.subr.bf16.mxu0 %v5404_v53  ;;  %5033 = vmatpush3.bf16.msra.mxu1 %v5405_v21  ;;  %v6573_v21 = vld [vmem:[#allocation3 + $0x24] sm:$0x1]  ;;  %v3139_v52 = vor.u32 %v3138_v2, %v3135_v57  ;;  %v3180_v61 = vrot.slane %v3178_v55, 5  ;;  %v4612_v18 = vrot.slane %v3343_v25, 9  ;;  %v3372_v48 = vrot.slane %v6554_v63, 5  ;;  %v5427_v55 = vld [vmem:[#allocation4 + $0x168] sm:$0xff]  }
 0x264   : > { %5042 = vmatprep.subr.bf16.mxu1 %v5408_v41  ;;  %v3126_v34 = vrot.slane %v3125_v23, 4  ;;  %v3154_v33 = vrot.slane %v3153_v22, 4  ;;  %v3112_v56 = vrot.slane %v3111_v42, 4  ;;  %v5424_v40 = vld [vmem:[#allocation4 + $0x150] sm:$0xff]   ;;  %v3172_v57 = vrot.slane %v3170_v30, 5  ;;  %v5425_v23 = vld [vmem:[#allocation4 + $0x158] sm:$0xff]  }
 0x265   : > { %v3373_v2 = vsel %vm6423_vm3, %v4612_v18, %v3372_v48  ;;  %v5428_v22 = vld [vmem:[#allocation4 + $0x170] sm:$0xff]   ;;  %v5440_v48 = vld [vmem:[#allocation4 + $0x1c0] sm:$0xff]  }
 0x266   : > { %4981 = vmatpush3.bf16.msra.mxu0 %v5404_v53  ;;  %5035 = vmatmul.mubr.bf16.vlgmr.msra.gmra.mrb[0].mxu1 %v5407_v59  ;;  %v3072_v53 = vld [vmem:[#allocation3 + $0x38] sm:$0xf]  ;;  %v3345_v42 = vld [vmem:[#allocation3 + $0x20] sm:$0xe] }
 0x267   : > { %4982 = vmatprep.subr.bf16.mxu0 %v5406_v47  ;;  %5038 = vmatprep.mubr.bf16.mxu1 %v5409_v9  ;;  %v3161_v59 = vshrl.u32 %v3072_v53, 16  ;;  %v3156_v9 = vshll.u32 %v6575_v16, 16  ;;  %v5437_v25 = vld [vmem:[#allocation4 + $0x1b0] sm:$0xff]  }
 0x268   : > { %5043 = vmatpush3.bf16.msra.mxu1 %v5408_v41  ;;  %v6580_v41 = vld [vmem:[#allocation3 + $0x1c] sm:$0x1] }
 0x269   : > { %5044 = vmatprep.subr.bf16.mxu1 %v5411_v24  ;;  %v3163_v19 = vrot.slane %v3161_v59, 4  ;;  %v5429_v59 = vld [vmem:[#allocation4 + $0x178] sm:$0xff]  }
 0x26a   : > { %4983 = vmatpush3.bf16.msra.mxu0 %v5406_v47  ;;  %v3128_v47 = vshll.u32 %v6573_v21, 16 }
 0x26b   : > { %4984 = vmatprep.subr.bf16.mxu0 %v5410_v38 }
 0x26c   : > { %5045 = vmatpush3.bf16.msra.mxu1 %v5411_v24  ;;  %v3164_v24 = vshll.u32 %v3072_v53, 16  ;;  %v3130_v31 = vrot.slane %v3128_v47, 5  ;;  %v3347_v47 = vld [vmem:[#allocation3 + $0x30] sm:$0xe] }
 0x26d   : > { %5046 = vmatprep.subr.bf16.mxu1 %v5415_v4 }
 0x26e   : > { %4985 = vmatpush3.bf16.msra.mxu0 %v5410_v38  ;;  %5039 = vmatmul.mubr.bf16.gmra.mrb[4].mxu1 %v5414_v46  ;;  %v3114_v38 = vshll.u32 %v6580_v41, 16  ;;  %v3166_v46 = vrot.slane %v3164_v24, 5  ;;  %v3344_v24 = vld [vmem:[#allocation3 + $0x18] sm:$0xe] }
 0x26f   : > { %5058 = vmatprep.mubr.bf16.mxu1 %v4599_v7  ;;  %5309 = vmatprep.subr.msk.bf16.mxu0 %vm1033_vm11, %v4245_v12  ;;  %v3158_v7 = vrot.slane %v3156_v9, 5  ;;  %v4616_v9 = vrot.slane %v3347_v47, 9  ;;  %v5443_v47 = vld [vmem:[#allocation3 + $0x40] ss:$8 sps:$4 sm:$0xff]  }
 0x270   : > { %5047 = vmatpush3.bf16.msra.mxu1 %v5415_v4  ;;  %v3142_v4 = vshll.u32 %v6583_v14, 16  ;;  %v3116_v20 = vrot.slane %v3114_v38, 5  ;;  %v3167_v26 = vor.u32 %v3166_v46, %v3163_v19  ;;  %v3388_v38 = vrot.slane %v6575_v16, 5  ;;  %v5431_v46 = vld [vmem:[#allocation4 + $0x188] sm:$0xff]  }
 0x271   : > { %4987 = vmatmul.mubr.bf16.vlgmr.msra.gmra.mrb[8].mxu0 %v4556_v13  ;;  %5048 = vmatprep.subr.bf16.mxu1 %v5416_v11  ;;  %v6588_v13 = vld [vmem:[#allocation3 + $0x44] sm:$0x1]  ;;  %v3159_v62 = vsel %vm5871_vm9, %v3154_v33, %v3158_v7  ;;  %v3384_v33 = vrot.slane %v6583_v14, 5 }
 0x272   : > { %4990 = vmatprep.mubr.bf16.mxu0 %v4557_v51  ;;  %v3131_v51 = vsel %vm5871_vm9, %v3126_v34, %v3130_v31  ;;  %v3144_v15 = vrot.slane %v3142_v4, 5  ;;  %v3117_v50 = vsel %vm5871_vm9, %v3112_v56, %v3116_v20  ;;  %v3184_v45 = vshll.u32 %v6588_v13, 16 }
 0x273   : > { %v4600_v28 = vcombine.low %v3117_v50, %v3131_v51  ;;  %v3168_v6 = vrot.slane %v3167_v26, 4  ;;  %v4613_v34 = vrot.slane %v3344_v24, 9  ;;  %v3389_v31 = vsel %vm6423_vm3, %v4616_v9, %v3388_v38  ;;  %v5434_v50 = vld [vmem:[#allocation4 + $0x198] sm:$0xff]   ;;  %v5433_v26 = vld [vmem:[#allocation3 + $0x10] ss:$8 sps:$4 sm:$0xff]  }
 0x274   : > { %5049 = vmatpush3.bf16.msra.mxu1 %v5416_v11  ;;  %v3140_v11 = vrot.slane %v3139_v52, 4  ;;  %v3346_v52 = vld [vmem:[#allocation3 + $0x28] sm:$0xe]  ;;  %v3396_v7 = vrot.slane %v6588_v13, 5  ;;  %v3392_v51 = vrot.slane %v6595_v49, 5  ;;  %v5435_v13 = vld [vmem:[#allocation4 + $0x1a0] sm:$0xff]  }
 0x275   : > { %5050 = vmatprep.subr.bf16.mxu1 %v5418_v27  ;;  %v4615_v4 = vrot.slane %v3346_v52, 9  ;;  %v5436_v49 = vld [vmem:[#allocation4 + $0x1a8] sm:$0xff]   ;;  %v5445_v24 = vld [vmem:[#allocation4 + $0x1d8] sm:$0xff]   ;;  %v3731_v52 = vld [vmem:[#allocation3 + $0x30] sm:$0xf] }
 0x276   : > { %v5446_v9 = vld [vmem:[#allocation4 + $0x1e0] sm:$0xff]   ;;  %v3727_v38 = vld [vmem:[#allocation3 + $0x20] sm:$0xf] }
 0x278   : > { %5051 = vmatpush3.bf16.msra.mxu1 %v5418_v27  ;;  %v4247_v27 = vsel %vm1033_vm11, %v4245_v12, 0  ;;  %v3368_v12 = vrot.slane %v6556_v35, 5  ;;  %v5426_v35 = vld [vmem:[#allocation4 + $0x160] sm:$0xff]  }
 0x279   : > { %4991 = vmatmul.mubr.bf16.gmra.mrb[12].mxu0 %v4558_v32  ;;  %5052 = vmatprep.subr.bf16.mxu1 %v5419_v39  ;;  %v3342_v32 = vld [vmem:[#allocation3 + $0x8] sm:$0xe] }
 0x27a   : > { %5164 = vmatprep.mubr.msk.bf16.mxu0 %vm1020_vm10, %v6153_v0  ;;  %v3177_v0 = vrot.slane %v3175_v29, 4  ;;  %5163 = vmatpush3.bf16.msra.mxu0 %v4247_v27  ;;  %v4611_v43 = vrot.slane %v3342_v32, 9 }
 0x27c   : > { %5053 = vmatpush3.bf16.msra.mxu1 %v5419_v39  ;;  %v3181_v44 = vor.u32 %v3180_v61, %v3177_v0  ;;  %v3145_v39 = vsel %vm5871_vm9, %v3140_v11, %v3144_v15  ;;  %v3369_v53 = vsel %vm6423_vm3, %v4611_v43, %v3368_v12  ;;  %v3376_v0 = vrot.slane %v6580_v41, 5  ;;  %v5430_v61 = vld [vmem:[#allocation4 + $0x180] sm:$0xff]   ;;  %v6639_v12 = vld [vmem:[#allocation3 + $0x1c] sm:$0x1] }
 0x27d   : > { %5054 = vmatprep.subr.bf16.mxu1 %v5420_v58  ;;  %v4601_v54 = vcombine.low %v3145_v39, %v3159_v62  ;;  %v4619_v29 = vcombine.low %v3369_v53, %v3373_v2  ;;  %v3385_v41 = vsel %vm6423_vm3, %v4615_v4, %v3384_v33  ;;  %v3796_v4 = vshrl.u32 %v3731_v52, 16 }
 0x27e   : > { %v3182_v3 = vrot.slane %v3181_v44, 4  ;;  %v3377_v16 = vsel %vm6423_vm3, %v4613_v34, %v3376_v0  ;;  %v4621_v11 = vcombine.low %v3385_v41, %v3389_v31  ;;  %v5432_v44 = vld [vmem:[#allocation4 + $0x190] sm:$0xff]   ;;  %v3799_v33 = vshll.u32 %v3731_v52, 16  ;;  %v3737_v41 = vld [vmem:[#allocation3 + $0x48] sm:$0xf] }
 0x27f   : > { %v3771_v31 = vshll.u32 %v3727_v38, 16 }
 0x280   : > { %5055 = vmatpush3.bf16.msra.mxu1 %v5420_v58  ;;  %v3186_v58 = vrot.slane %v3184_v45, 5  ;;  %v3723_v45 = vld [vmem:[#allocation3 + $0x10] sm:$0xf] }
 0x281   : > { %5056 = vmatprep.subr.bf16.mxu1 %v5421_v37  ;;  %5165 = vmatmul.mubr.msk.bf16.vlgmr.msra.gmra.mrb[16].mxu0 %vm1020_vm10, %v6166_v10  ;;  %v3740_v39 = vshrl.u32 %v3723_v45, 16 }
 0x282   : > { %5168 = vmatprep.mubr.msk.bf16.mxu0 %vm1020_vm10, %v6179_v17  ;;  %v3187_v10 = vsel %vm5871_vm9, %v3182_v3, %v3186_v58  ;;  %v3173_v17 = vsel %vm5871_vm9, %v3168_v6, %v3172_v57  ;;  %v5439_v57 = vld [vmem:[#allocation3 + $0x20] ss:$8 sps:$4 sm:$0xff]  }
 0x283   : > { %v4602_v63 = vcombine.low %v3173_v17, %v3187_v10  ;;  %v3742_v32 = vrot.slane %v3740_v39, 4  ;;  %v5442_v10 = vld [vmem:[#allocation4 + $0x1c8] sm:$0xff]  }
 0x284   : > { %5057 = vmatpush3.bf16.msra.mxu1 %v5421_v37  ;;  %v4614_v37 = vrot.slane %v3345_v42, 9 }
 0x285   : > { %5066 = vmatprep.subr.bf16.mxu1 %v5422_v8 }
 0x287   : > { %5059 = vmatmul.mubr.bf16.vlgmr.msra.gmra.mrb[0].mxu1 %v4600_v28  ;;  %v3725_v28 = vld [vmem:[#allocation3 + $0x18] sm:$0xf] }
 0x288   : > { %5062 = vmatprep.mubr.bf16.mxu1 %v4601_v54  ;;  %5067 = vmatpush3.bf16.msra.mxu1 %v5422_v8  ;;  %v3348_v8 = vld [vmem:[#allocation3 + $0x38] sm:$0xe]  ;;  %v5438_v54 = vld [vmem:[#allocation4 + $0x1b8] sm:$0xff]   ;;  %v3754_v30 = vshrl.u32 %v3725_v28, 16  ;;  %v3757_v3 = vshll.u32 %v3725_v28, 16 }
 0x289   : > { %5068 = vmatprep.subr.bf16.mxu1 %v5423_v1  ;;  %5169 = vmatmul.mubr.msk.bf16.gmra.mrb[20].mxu0 %vm1020_vm10, %v6191_v5  ;;  %v3380_v5 = vrot.slane %v6573_v21, 5  ;;  %v3349_v21 = vld [vmem:[#allocation3 + $0x40] sm:$0xe]  ;;  %v4617_v20 = vrot.slane %v3348_v8, 9  ;;  %v6651_v28 = vld [vmem:[#allocation3 + $0x24] sm:$0x1] }
 0x28a   : > { %v4618_v14 = vrot.slane %v3349_v21, 9  ;;  %v3756_v6 = vrot.slane %v3754_v30, 4  ;;  %v3759_v58 = vrot.slane %v3757_v3, 5  ;;  %v5447_v21 = vld [vmem:[#allocation4 + $0x1e8] sm:$0xff]   ;;  %v5449_v3 = vld [vmem:[#allocation4 + $0x1f8] sm:$0xff]  }
 0x28b   : > { %v3381_v56 = vsel %vm6423_vm3, %v4614_v37, %v3380_v5  ;;  %v3393_v15 = vsel %vm6423_vm3, %v4617_v20, %v3392_v51  ;;  %v3729_v5 = vld [vmem:[#allocation3 + $0x28] sm:$0xf]  ;;  %v3773_v51 = vrot.slane %v3771_v31, 5  ;;  %v6654_v30 = vld [vmem:[#allocation3 + $0x3c] sm:$0x1] }
 0x28c   : > { %5069 = vmatpush3.bf16.msra.mxu1 %v5423_v1  ;;  %v4620_v19 = vcombine.low %v3377_v16, %v3381_v56  ;;  %v3397_v27 = vsel %vm6423_vm3, %v4618_v14, %v3396_v7  ;;  %v3743_v1 = vshll.u32 %v3723_v45, 16  ;;  %v3760_v17 = vor.u32 %v3759_v58, %v3756_v6  ;;  %v3735_v7 = vld [vmem:[#allocation3 + $0x40] sm:$0xf] }
 0x28d   : > { %5070 = vmatprep.subr.bf16.mxu1 %v5424_v40  ;;  %v4622_v62 = vcombine.low %v3393_v15, %v3397_v27  ;;  %v3782_v34 = vshrl.u32 %v3729_v5, 16  ;;  %v3785_v0 = vshll.u32 %v3729_v5, 16  ;;  %v3768_v56 = vshrl.u32 %v3727_v38, 16  ;;  %v5448_v27 = vld [vmem:[#allocation4 + $0x1f0] sm:$0xff]   ;;  %v6647_v15 = vld [vmem:[#allocation3 + $0x2c] sm:$0x1] }
 0x28e   : > { %v3745_v18 = vrot.slane %v3743_v1, 5  ;;  %v3801_v14 = vrot.slane %v3799_v33, 5  ;;  %v3824_v45 = vshrl.u32 %v3735_v7, 16  ;;  %v3777_v58 = vshll.u32 %v6651_v28, 16 }
 0x28f   : > { %5063 = vmatmul.mubr.bf16.gmra.mrb[4].mxu1 %v4602_v63  ;;  %v5441_v63 = vld [vmem:[#allocation3 + $0x30] ss:$8 sps:$4 sm:$0xff]   ;;  %v3787_v8 = vrot.slane %v3785_v0, 5  ;;  %v3770_v20 = vrot.slane %v3768_v56, 4 }
 0x290   : > { %5071 = vmatpush3.bf16.msra.mxu1 %v5424_v40  ;;  %5082 = vmatprep.mubr.bf16.mxu1 %v4619_v29  ;;  %v6637_v40 = vld [vmem:[#allocation3 + $0x14] sm:$0x1]  ;;  %v3746_v43 = vor.u32 %v3745_v18, %v3742_v32  ;;  %v5444_v29 = vld [vmem:[#allocation4 + $0x1d0] sm:$0xff]  }
 0x291   : > { %5072 = vmatprep.subr.bf16.mxu1 %v5425_v23  ;;  %v3749_v2 = vshll.u32 %v6637_v40, 16  ;;  %v3774_v1 = vor.u32 %v3773_v51, %v3770_v20 }
 0x292   : > { %v3747_v53 = vrot.slane %v3746_v43, 4 }
 0x294   : > { %5073 = vmatpush3.bf16.msra.mxu1 %v5425_v23  ;;  %v3763_v23 = vshll.u32 %v6639_v12, 16 }
 0x295   : > { %5074 = vmatprep.subr.bf16.mxu1 %v5426_v35 }
 0x296   : > { %v3765_v42 = vrot.slane %v3763_v23, 5  ;;  %v6659_v23 = vld [vmem:[#allocation3 + $0x4c] sm:$0x1] }
 0x298   : > { %5075 = vmatpush3.bf16.msra.mxu1 %v5426_v35  ;;  %v3751_v35 = vrot.slane %v3749_v2, 5 }
 0x299   : > { %5076 = vmatprep.subr.bf16.mxu1 %v5427_v55 }
 0x29c   : > { %5077 = vmatpush3.bf16.msra.mxu1 %v5427_v55  ;;  %v3761_v55 = vrot.slane %v3760_v17, 4  ;;  %v3819_v17 = vshll.u32 %v6654_v30, 16 }
 0x29d   : > { %5078 = vmatprep.subr.bf16.mxu1 %v5428_v22 }
 0x29e   : > { %v3821_v52 = vrot.slane %v3819_v17, 5 }
 0x2a0   : > { %5079 = vmatpush3.bf16.msra.mxu1 %v5428_v22  ;;  %v3752_v22 = vsel %vm5871_vm9, %v3747_v53, %v3751_v35 }
 0x2a1   : > { %5080 = vmatprep.subr.bf16.mxu1 %v5429_v59 }
 0x2a4   : > { %5081 = vmatpush3.bf16.msra.mxu1 %v5429_v59  ;;  %v3766_v59 = vsel %vm5871_vm9, %v3761_v55, %v3765_v42 }
 0x2a5   : > { %5090 = vmatprep.subr.bf16.mxu1 %v5430_v61  ;;  %v4643_v37 = vcombine.low %v3752_v22, %v3766_v59  ;;  %v6661_v22 = vld [vmem:[#allocation3 + $0x44] sm:$0x1] }
 0x2a6   : > { %v3833_v38 = vshll.u32 %v6661_v22, 16 }
 0x2a7   : > { %5083 = vmatmul.mubr.bf16.vlgmr.msra.gmra.mrb[0].mxu1 %v4620_v19 }
 0x2a8   : > { %5086 = vmatprep.mubr.bf16.mxu1 %v4621_v11  ;;  %5091 = vmatpush3.bf16.msra.mxu1 %v5430_v61  ;;  %v3733_v61 = vld [vmem:[#allocation3 + $0x38] sm:$0xf]  ;;  %v3798_v11 = vrot.slane %v3796_v4, 4 }
 0x2a9   : > { %5092 = vmatprep.subr.bf16.mxu1 %v5431_v46  ;;  %v3810_v16 = vshrl.u32 %v3733_v61, 16  ;;  %v3813_v19 = vshll.u32 %v3733_v61, 16  ;;  %v5451_v4 = vld [vmem:[#allocation4 + $0x208] sm:$0xff]  }
 0x2aa   : > { %v3802_v39 = vor.u32 %v3801_v14, %v3798_v11  ;;  %v4035_v14 = vrot.slane %v6639_v12, 5  ;;  %v5454_v12 = vld [vmem:[#allocation4 + $0x220] sm:$0xff]  }
 0x2ac   : > { %5093 = vmatpush3.bf16.msra.mxu1 %v5431_v46  ;;  %v3784_v46 = vrot.slane %v3782_v34, 4  ;;  %v3803_v2 = vrot.slane %v3802_v39, 4  ;;  %v4005_v34 = vld [vmem:[#allocation3 + $0x10] sm:$0xe] }
 0x2ad   : > { %5094 = vmatprep.subr.bf16.mxu1 %v5432_v44 }
 0x2af   : > { %5087 = vmatmul.mubr.bf16.gmra.mrb[4].mxu1 %v4622_v62  ;;  %v3812_v62 = vrot.slane %v3810_v16, 4  ;;  %v4006_v16 = vld [vmem:[#allocation3 + $0x18] sm:$0xe] }
 0x2b0   : > { %5095 = vmatpush3.bf16.msra.mxu1 %v5432_v44  ;;  %5106 = vmatprep.mubr.bf16.mxu1 %v5433_v26  ;;  %v3838_v44 = vshrl.u32 %v3737_v41, 16  ;;  %v3841_v26 = vshll.u32 %v3737_v41, 16  ;;  %v4031_v41 = vrot.slane %v6637_v40, 5  ;;  %v4656_v11 = vrot.slane %v4006_v16, 9 }
 0x2b1   : > { %5096 = vmatprep.subr.bf16.mxu1 %v5434_v50 }
 0x2b2   : > { %v3843_v6 = vrot.slane %v3841_v26, 5  ;;  %v4036_v40 = vsel %vm6423_vm3, %v4656_v11, %v4035_v14  ;;  %v4008_v26 = vld [vmem:[#allocation3 + $0x28] sm:$0xe]  ;;  %v4676_v11 = vld [vmem:[%s6797_s6] ss:$0 sm:$0xff] }
 0x2b3   : > { %v4658_v39 = vrot.slane %v4008_v26, 9 }
 0x2b4   : > { %5097 = vmatpush3.bf16.msra.mxu1 %v5434_v50  ;;  %v3815_v50 = vrot.slane %v3813_v19, 5  ;;  %v4655_v19 = vrot.slane %v4005_v34, 9 }
 0x2b5   : > { %5098 = vmatprep.subr.bf16.mxu1 %v5435_v13 }
 0x2b6   : > { %v3816_v18 = vor.u32 %v3815_v50, %v3812_v62  ;;  %v4032_v51 = vsel %vm6423_vm3, %v4655_v19, %v4031_v41  ;;  %v5456_v50 = vld [vmem:[#allocation4 + $0x230] sm:$0xff]  }
 0x2b7   : > { %v4663_v62 = vcombine.low %v4032_v51, %v4036_v40  ;;  %v4675_v19 = vld [vmem:[%s6796_s5] ss:$0 sm:$0xff] }
 0x2b8   : > { %5099 = vmatpush3.bf16.msra.mxu1 %v5435_v13  ;;  %v3788_v13 = vor.u32 %v3787_v8, %v3784_v46  ;;  %v3817_v55 = vrot.slane %v3816_v18, 4  ;;  %v3835_v46 = vrot.slane %v3833_v38, 5  ;;  %v5452_v8 = vld [vmem:[#allocation4 + $0x210] sm:$0xff]  }
 0x2b9   : > { %5100 = vmatprep.subr.bf16.mxu1 %v5436_v49 }
 0x2ba   : > { %v3789_v43 = vrot.slane %v3788_v13, 4  ;;  %v3822_v61 = vsel %vm5871_vm9, %v3817_v55, %v3821_v52  ;;  %v4009_v13 = vld [vmem:[#allocation3 + $0x30] sm:$0xe] }
 0x2bc   : > { %5101 = vmatpush3.bf16.msra.mxu1 %v5436_v49  ;;  %v6649_v49 = vld [vmem:[#allocation3 + $0x34] sm:$0x1] }
 0x2bd   : > { %5102 = vmatprep.subr.bf16.mxu1 %v5437_v25  ;;  %v3805_v32 = vshll.u32 %v6649_v49, 16 }
 0x2bf   : > { %v3807_v35 = vrot.slane %v3805_v32, 5  ;;  %v4047_v32 = vrot.slane %v6649_v49, 5 }
 0x2c0   : > { %5103 = vmatpush3.bf16.msra.mxu1 %v5437_v25  ;;  %v3827_v25 = vshll.u32 %v3735_v7, 16 }
 0x2c1   : > { %5104 = vmatprep.subr.bf16.mxu1 %v5438_v54  ;;  %v3808_v5 = vsel %vm5871_vm9, %v3803_v2, %v3807_v35 }
 0x2c2   : > { %v4645_v33 = vcombine.low %v3808_v5, %v3822_v61 }
 0x2c4   : > { %5105 = vmatpush3.bf16.msra.mxu1 %v5438_v54  ;;  %v3791_v54 = vshll.u32 %v6647_v15, 16 }
 0x2c5   : > { %5114 = vmatprep.subr.bf16.mxu1 %v5440_v48 }
 0x2c6   : > { %v3793_v53 = vrot.slane %v3791_v54, 5  ;;  %v4010_v54 = vld [vmem:[#allocation3 + $0x38] sm:$0xe] }
 0x2c7   : > { %5107 = vmatmul.mubr.bf16.vlgmr.msra.gmra.mrb[0].mxu1 %v5439_v57  ;;  %v3826_v57 = vrot.slane %v3824_v45, 4  ;;  %v5457_v45 = vld [vmem:[#allocation4 + $0x238] sm:$0xff]  }
 0x2c8   : > { %5110 = vmatprep.mubr.bf16.mxu1 %v5441_v63  ;;  %5115 = vmatpush3.bf16.msra.mxu1 %v5440_v48  ;;  %v3840_v48 = vrot.slane %v3838_v44, 4  ;;  %v3775_v63 = vrot.slane %v3774_v1, 4  ;;  %v3794_v59 = vsel %vm5871_vm9, %v3789_v43, %v3793_v53  ;;  %v4043_v1 = vrot.slane %v6647_v15, 5  ;;  %v4011_v15 = vld [vmem:[#allocation3 + $0x40] sm:$0xe] }
 0x2c9   : > { %5116 = vmatprep.subr.bf16.mxu1 %v5442_v10  ;;  %v4661_v53 = vrot.slane %v4011_v15, 9 }
 0x2ca   : > { %v3844_v42 = vor.u32 %v3843_v6, %v3840_v48  ;;  %v4039_v48 = vrot.slane %v6651_v28, 5  ;;  %v4660_v6 = vrot.slane %v4010_v54, 9  ;;  %v4044_v43 = vsel %vm6423_vm3, %v4658_v39, %v4043_v1 }
 0x2cc   : > { %5117 = vmatpush3.bf16.msra.mxu1 %v5442_v10  ;;  %v3829_v10 = vrot.slane %v3827_v25, 5  ;;  %v3845_v31 = vrot.slane %v3844_v42, 4  ;;  %v4007_v25 = vld [vmem:[#allocation3 + $0x20] sm:$0xe] }
 0x2cd   : > { %5118 = vmatprep.subr.bf16.mxu1 %v5444_v29  ;;  %v4657_v18 = vrot.slane %v4007_v25, 9 }
 0x2cf   : > { %5111 = vmatmul.mubr.bf16.gmra.mrb[4].mxu1 %v5443_v47  ;;  %v3779_v47 = vrot.slane %v3777_v58, 5  ;;  %v4051_v58 = vrot.slane %v6654_v30, 5  ;;  %v4040_v49 = vsel %vm6423_vm3, %v4657_v18, %v4039_v48  ;;  %v4055_v30 = vrot.slane %v6661_v22, 5 }
 0x2d0   : > { %5119 = vmatpush3.bf16.msra.mxu1 %v5444_v29  ;;  %5130 = vmatprep.mubr.bf16.mxu1 %v4643_v37  ;;  %v5450_v29 = vld [vmem:[#allocation4 + $0x200] sm:$0xff]   ;;  %v3847_v37 = vshll.u32 %v6659_v23, 16  ;;  %v4664_v2 = vcombine.low %v4040_v49, %v4044_v43 }
 0x2d1   : > { %5120 = vmatprep.subr.bf16.mxu1 %v5445_v24  ;;  %v4052_v28 = vsel %vm6423_vm3, %v4660_v6, %v4051_v58  ;;  %v4056_v35 = vsel %vm6423_vm3, %v4661_v53, %v4055_v30 }
 0x2d4   : > { %5121 = vmatpush3.bf16.msra.mxu1 %v5445_v24  ;;  %v3830_v24 = vor.u32 %v3829_v10, %v3826_v57  ;;  %v4012_v57 = vld [vmem:[#allocation3 + $0x48] sm:$0xe] }
 0x2d5   : > { %5122 = vmatprep.subr.bf16.mxu1 %v5446_v9  ;;  %v4662_v17 = vrot.slane %v4012_v57, 9 }
 0x2d6   : > { %v3831_v56 = vrot.slane %v3830_v24, 4 }
 0x2d8   : > { %5123 = vmatpush3.bf16.msra.mxu1 %v5446_v9  ;;  %v3780_v9 = vsel %vm5871_vm9, %v3775_v63, %v3779_v47  ;;  %v3836_v7 = vsel %vm5871_vm9, %v3831_v56, %v3835_v46  ;;  %v4681_v56 = vld [vmem:[%s6799_s8] ss:$0 sm:$0xff] }
 0x2d9   : > { %5124 = vmatprep.subr.bf16.mxu1 %v5447_v21  ;;  %v4644_v0 = vcombine.low %v3780_v9, %v3794_v59 }
 0x2dc   : > { %5125 = vmatpush3.bf16.msra.mxu1 %v5447_v21  ;;  %v3849_v21 = vrot.slane %v3847_v37, 5 }
 0x2dd   : > { %5126 = vmatprep.subr.bf16.mxu1 %v5448_v27 }
 0x2de   : > { %v3850_v20 = vsel %vm5871_vm9, %v3845_v31, %v3849_v21  ;;  %v6709_v21 = vld [vmem:[%s6800_s9] ss:$0 sm:$0xff] }
 0x2df   : > { %v4646_v44 = vcombine.low %v3836_v7, %v3850_v20 }
 0x2e0   : > { %5127 = vmatpush3.bf16.msra.mxu1 %v5448_v27  ;;  %v5453_v27 = vld [vmem:[#allocation4 + $0x218] sm:$0xff]  }
 0x2e1   : > { %5128 = vmatprep.subr.bf16.mxu1 %v5449_v3 }
 0x2e4   : > { %5129 = vmatpush3.bf16.msra.mxu1 %v5449_v3  ;;  %v4659_v3 = vrot.slane %v4009_v13, 9 }
 0x2e5   : > { %5138 = vmatprep.subr.bf16.mxu1 %v5450_v29 }
 0x2e6   : > { %v4048_v10 = vsel %vm6423_vm3, %v4659_v3, %v4047_v32 }
 0x2e7   : > { %5131 = vmatmul.mubr.bf16.vlgmr.msra.gmra.mrb[0].mxu1 %v4644_v0  ;;  %v4665_v63 = vcombine.low %v4048_v10, %v4052_v28 }
 0x2e8   : > { %5134 = vmatprep.mubr.bf16.mxu1 %v4645_v33  ;;  %5139 = vmatpush3.bf16.msra.mxu1 %v5450_v29  ;;  %v4059_v29 = vrot.slane %v6659_v23, 5 }
 0x2e9   : > { %5140 = vmatprep.subr.bf16.mxu1 %v5451_v4 }
 0x2ea   : > { %v4060_v55 = vsel %vm6423_vm3, %v4662_v17, %v4059_v29 }
 0x2eb   : > { %v4666_v42 = vcombine.low %v4056_v35, %v4060_v55 }
 0x2ec   : > { %5141 = vmatpush3.bf16.msra.mxu1 %v5451_v4 }
 0x2ed   : > { %5142 = vmatprep.subr.bf16.mxu1 %v5452_v8 }
 0x2ef   : > { %5135 = vmatmul.mubr.bf16.gmra.mrb[4].mxu1 %v4646_v44 }
 0x2f0   : > { %5143 = vmatpush3.bf16.msra.mxu1 %v5452_v8  ;;  %5154 = vmatprep.mubr.bf16.mxu1 %v4663_v62 }
 0x2f1   : > { %5144 = vmatprep.subr.bf16.mxu1 %v5453_v27 }
 0x2f4   : > { %5145 = vmatpush3.bf16.msra.mxu1 %v5453_v27 }
 0x2f5   : > { %5146 = vmatprep.subr.bf16.mxu1 %v5454_v12 }
 0x2f8   : > { %5147 = vmatpush3.bf16.msra.mxu1 %v5454_v12 }
 0x2f9   : > { %5148 = vmatprep.subr.bf16.mxu1 %v5455_v36 }
 0x2fc   : > { %5149 = vmatpush3.bf16.msra.mxu1 %v5455_v36 }
 0x2fd   : > { %5150 = vmatprep.subr.bf16.mxu1 %v5456_v50 }
 0x300   : > { %5151 = vmatpush3.bf16.msra.mxu1 %v5456_v50 }
 0x301   : > { %5152 = vmatprep.subr.bf16.mxu1 %v5457_v45 }
 0x304   : > { %5153 = vmatpush3.bf16.msra.mxu1 %v5457_v45 }
 0x307   : > { %5155 = vmatmul.mubr.bf16.vlgmr.msra.gmra.mrb[0].mxu1 %v4664_v2 }
 0x308   : > { %5158 = vmatprep.mubr.bf16.mxu1 %v4665_v63 }
 0x30f   : > { %5159 = vmatmul.mubr.bf16.gmra.mrb[4].mxu1 %v4666_v42 }
 0x344   : > { %v4988_v47 = vpop.f32.mrb[8].mxu0 }
 0x345   : > { %v2646_v59 = vpop.f32.mrb[9].mxu0 }
 0x346   : > { %v4989_v24 = vpop.f32.mrb[10].mxu0 }
 0x347   : > { %v2649_v37 = vpop.f32.mrb[11].mxu0 }
 0x34c   : > { %v4992_v5 = vpop.f32.mrb[12].mxu0 }
 0x34d   : > { %v2662_v52 = vpop.f32.mrb[13].mxu0 }
 0x34e   : > { %v4993_v9 = vpop.f32.mrb[14].mxu0 }
 0x34f   : > { %v6701_v22 = vpop.f32.mrb[15].mxu0 }
 0x354   : > { %v5166_v23 = vpop.f32.mrb[16].mxu0 }
 0x355   : > { %v4283_v38 = vpop.f32.mrb[17].mxu0  ;;  %v4323_v31 = vmul.f32 %v5166_v23, %v4681_v56 }
 0x356   : > { %v5167_v34 = vpop.f32.mrb[18].mxu0  ;;  %v4321_v41 = vmul.f32 %v4681_v56, %v4283_v38 }
 0x357   : > { %v4286_v0 = vpop.f32.mrb[19].mxu0  ;;  %v4338_v20 = vadd.f32 %v6709_v21, %v4323_v31  ;;  %v4324_v44 = vmul.f32 %v5167_v34, %v4681_v56 }
 0x358   : > { %v4336_v62 = vadd.f32 %v6709_v21, %v4321_v41  ;;  %v4322_v36 = vmul.f32 %v4681_v56, %v4286_v0 }
 0x359   : > { %v4339_v54 = vadd.f32 %v6709_v21, %v4324_v44 }
 0x35a   : > { %v4337_v48 = vadd.f32 %v6709_v21, %v4322_v36 }
 0x35c   : > { %v5170_v61 = vpop.f32.mrb[20].mxu0 }
 0x35d   : > { %v4299_v4 = vpop.f32.mrb[21].mxu0  ;;  %v4327_v45 = vmul.f32 %v5170_v61, %v4681_v56 }
 0x35e   : > { %v5171_v60 = vpop.f32.mrb[22].mxu0  ;;  %v4325_v32 = vmul.f32 %v4681_v56, %v4299_v4 }
 0x35f   : > { %v4302_v33 = vpop.f32.mrb[23].mxu0  ;;  %v4342_v10 = vadd.f32 %v6709_v21, %v4327_v45  ;;  %v4328_v63 = vmul.f32 %v5171_v60, %v4681_v56 }
 0x360   : > { %v4340_v35 = vadd.f32 %v6709_v21, %v4325_v32 }
 0x3da   : > { %v5156_v16 = vpop.f32.mrb[0].mxu1 }
 0x3db   : > { %v5172_v46 = vadd.f32 %v5156_v16, %v4988_v47  ;;  %v4176_v8 = vpop.f32.mrb[1].mxu1 }
 0x3dc   : > { %v5173_v14 = vadd.f32 %v4176_v8, %v2646_v59  ;;  %v5157_v7 = vpop.f32.mrb[2].mxu1 }
 0x3dd   : > { %v4224_v51 = vmul.f32 %v5172_v46, %v4675_v19  ;;  %v5174_v40 = vadd.f32 %v5157_v7, %v4989_v24  ;;  %v4179_v27 = vpop.f32.mrb[3].mxu1  ;;  %v4326_v24 = vmul.f32 %v4681_v56, %v4302_v33 }
 0x3de   : > { %v4222_v12 = vmul.f32 %v5173_v14, %v4675_v19  ;;  %v5175_v50 = vadd.f32 %v4179_v27, %v2649_v37 }
 0x3df   : > { %v4239_v26 = vadd.f32 %v4676_v11, %v4224_v51  ;;  %v4225_v13 = vmul.f32 %v5174_v40, %v4675_v19  ;;  %v4341_v4 = vadd.f32 %v6709_v21, %v4326_v24 }
 0x3e0   : > { %v4237_v25 = vadd.f32 %v4676_v11, %v4222_v12  ;;  %v4223_v39 = vmul.f32 %v5175_v50, %v4675_v19 }
 0x3e1   : > { %v4346_v1 = vadd.f32 %v4338_v20, %v4239_v26  ;;  %v4240_v3 = vadd.f32 %v4676_v11, %v4225_v13 }
 0x3e2   : > { %v4344_v18 = vadd.f32 %v4336_v62, %v4237_v25  ;;  %v4238_v6 = vadd.f32 %v4676_v11, %v4223_v39  ;;  %v5160_v58 = vpop.f32.mrb[4].mxu1 }
 0x3e3   : > { %v4354_v43 = vmax.f32 %v4346_v1, 0.0  ;;  %v4347_v57 = vadd.f32 %v4339_v54, %v4240_v3  ;;  %v5176_v15 = vadd.f32 %v5160_v58, %v4992_v5  ;;  %v4192_v49 = vpop.f32.mrb[5].mxu1 }
 0x3e4   : > { %v4352_v2 = vmax.f32 %v4344_v18, 0.0  ;;  %v4345_v28 = vadd.f32 %v4337_v48, %v4238_v6  ;;  %v5177_v17 = vadd.f32 %v4192_v49, %v2662_v52  ;;  %v5161_v53 = vpop.f32.mrb[6].mxu1 }
 0x3e5   : > { %4362 = vst [vmem:[%s6725_s29 + $0x10] sm:$0xff] %v4354_v43  ;;  %v4355_v30 = vmax.f32 %v4347_v57, 0.0  ;;  %v4228_v29 = vmul.f32 %v5176_v15, %v4675_v19  ;;  %v5178_v55 = vadd.f32 %v5161_v53, %v4993_v9  ;;  %v4195_v42 = vpop.f32.mrb[7].mxu1  ;;  %v4343_v9 = vadd.f32 %v6709_v21, %v4328_v63 }
 0x3e6   : > { %4360 = vst [vmem:[%s6725_s29] sm:$0xff] %v4352_v2  ;;  %v4353_v47 = vmax.f32 %v4345_v28, 0.0  ;;  %v4226_v59 = vmul.f32 %v5177_v17, %v4675_v19  ;;  %v5179_v37 = vadd.f32 %v4195_v42, %v6701_v22 }
 0x3e7   : > { %4363 = vst [vmem:[%s6725_s29 + $0x18] sm:$0xff] %v4355_v30  ;;  %v4243_v5 = vadd.f32 %v4676_v11, %v4228_v29  ;;  %v4229_v52 = vmul.f32 %v5178_v55, %v4675_v19 }
 0x3e8   : > { %4361 = vst [vmem:[%s6725_s29 + $0x8] sm:$0xff] %v4353_v47  ;;  %v4241_v23 = vadd.f32 %v4676_v11, %v4226_v59  ;;  %v4227_v38 = vmul.f32 %v5179_v37, %v4675_v19 }
 0x3e9   : > { %v4350_v34 = vadd.f32 %v4342_v10, %v4243_v5  ;;  %v4244_v0 = vadd.f32 %v4676_v11, %v4229_v52 }
 0x3ea   : > { %v4348_v61 = vadd.f32 %v4340_v35, %v4241_v23  ;;  %v4242_v60 = vadd.f32 %v4676_v11, %v4227_v38 }
 0x3eb   : > { %v4358_v22 = vmax.f32 %v4350_v34, 0.0  ;;  %v4351_v33 = vadd.f32 %v4343_v9, %v4244_v0 }
 0x3ec   : > { %v4356_v56 = vmax.f32 %v4348_v61, 0.0  ;;  %v4349_v31 = vadd.f32 %v4341_v4, %v4242_v60 }
 0x3ed   : > { %4366 = vst [vmem:[%s6725_s29 + $0x30] sm:$0xff] %v4358_v22  ;;  %v4359_v16 = vmax.f32 %v4351_v33, 0.0 }
 0x3ee   : > { %4364 = vst [vmem:[%s6725_s29 + $0x20] sm:$0xff] %v4356_v56  ;;  %v4357_v21 = vmax.f32 %v4349_v31, 0.0 }
 0x3ef   : > { %4367 = vst [vmem:[%s6725_s29 + $0x38] sm:$0xff] %v4359_v16 }
 0x3f0   : > { %4365 = vst [vmem:[%s6725_s29 + $0x28] sm:$0xff] %v4357_v21 }
 0x3f1   : > { %5499 = shalt.err (!%p5496_p7)
}
 0x3f2   : > { %s5500_s11 = scalar_lea.hbm %s6741_s27, 1024  ;;  %s5504_s18 = scalar_lea.hbm %s6801_s10, 2048 }
 0x3f3   : > { %p5501_p8 = scmp.ne.s32.totalorder %s6741_s27, %s5500_s11  ;;  %p5505_p1 = scmp.lt.u32.totalorder %s6741_s27, %s6801_s10 }
 0x3f4   : > { %p5506_p0 = scmp.lt.u32.totalorder %s5504_s18, %s5500_s11  ;;  %p5508_p6 = scmp.lt.u32.totalorder %s5500_s11, %s6741_s27 }
 0x3f5   : > { %p5502_p11 = pnand %p5501_p8, %p6828_p9 }
 0x3f6   : > { %p5507_p5 = por %p5506_p0, %p5505_p1 }
 0x3f7   : > { %p5503_p13 = pneg %p5502_p11 }
 0x3f8   : > { %p5509_p10 = por %p5508_p6, %p5507_p5 }
 0x3fa   : > { %p5510_p12 = pnand %p5509_p10, %p5503_p13 }
 0x3fc   : > { %5513 = shalt.err (!%p5510_p12)
}
 0x3fd   : > { %s5560_s28 = smov 128   ;;  %s5561_s21 = smov 8  }
 0x3fe   : > { %5314 = dma.vmem_to_hbm [thread:$0]  (%p6828_p9), %s6743_s12, 1024, %s6741_s27, %s6750_s17, %s5560_s28, %s5560_s28, %s5561_s21  }
 0x3ff PF: > { %p5326_p2 = scmp.ge.s32.totalorder %s5552_s16, 2  ;;  %s4397_s26 = sand.u32 1, %s5540_s13  }
 0x400   : > { %p6829_p3 = scmp.ne.s32.totalorder %s6806_s24, 0  ;;  %s4398_s11 = scalar_lea.sflag [#allocation6], %s4397_s26 }
 0x402   : > { %p5321_p4 = pnand %p5326_p2, %p6829_p3 }
 0x404   : > { %5535 = dma.done.wait (!%p5321_p4), %s4398_s11, 1024  }
 0x405   : > { %5537 = vsyncadd (!%p5321_p4), %s4398_s11, 4294966272  ;;  %p21_p7 = scmp.ge.s32.totalorder %s5642_s19, 4   ;;  %s6830_s13 = smov %s5544_s14 }
 0x406   : > { %s6831_s14 = smov %s5548_s15  ;;  %s6832_s15 = smov %s5653_s22 }
 0x407   : > { %s6833_s16 = smov %s5642_s19  ;;  %23 = sbr.rel (!%p21_p7) target bundleno = 4 (0x4), region = 124 }
 0x40e   :  { %4403 = vsyncpa [#allocation5], 1 }
 0x40f   :  { %4405 = vsyncpa [#allocation5 + $0x1], 1 }
 0x410   :  { %4406 = vsyncpa [#allocation6], 1 }
 0x411   :  { %4408 = vsyncpa [#allocation6 + $0x1], 1 }

</bundles_post_ra>
